<compile_context>
chip_gen: v5e
topology: v5e:2x2
jax: 0.10.0
libtpu: 0.0.40
codegen_flags: <defaults>
</compile_context>

<pallas_src>
import functools

import jax
import jax.numpy as jnp
from jax import lax
from jax.experimental import pallas as pl
from jax.experimental.pallas import tpu as pltpu

_NEG_SLOPE = 0.3
_BN_EPS = 1e-5


def _round_up(v, m):
    return ((v + m - 1) // m) * m


def _pick_row_tile(H, W, Cp):
    """Largest divisor of H giving roughly <= (4096*128/Cp) output pixels/tile."""
    target_px = max(256, (4096 * 128) // max(Cp, 1))
    max_rows = max(1, target_px // max(W, 1))
    th = 1
    for d in range(1, H + 1):
        if H % d == 0 and d <= max_rows:
            th = d
    return th


# ---------------------------------------------------------------------------
# Fused ResidualBlock kernel (one (batch, row-tile) grid step per invocation)
# ---------------------------------------------------------------------------
def _resblock_kernel(*refs, TH, W, Cin, Cp, identity, neg_slope):
    if identity:
        (x_ref, w1_ref, s1_ref, t1_ref, w2_ref, s2_ref, t2_ref,
         o_ref, hp_ref) = refs
    else:
        (x_ref, w1_ref, s1_ref, t1_ref, w2_ref, s2_ref, t2_ref,
         wsc_ref, tsc_ref, o_ref, hp_ref) = refs

    t = pl.program_id(1)
    nt = pl.num_programs(1)
    R1 = (TH + 2) * W           # conv1 output rows incl. 1-row halo each side
    R = TH * W                  # output pixels of this tile

    xt = x_ref[0]                                    # (TH+4, W+2, Cin) f32
    xb = xt.astype(jnp.bfloat16)                     # one cast feeds all 9 taps

    # ---- conv1 + folded BN1 + LeakyReLU: single im2col matmul, K = 9*Cin ----
    p1 = jnp.concatenate(
        [xb[dy:dy + TH + 2, dx:dx + W, :] for dy in range(3) for dx in range(3)],
        axis=-1).reshape(R1, 9 * Cin)
    h = jnp.dot(p1, w1_ref[...], preferred_element_type=jnp.float32)
    h = h * s1_ref[...] + t1_ref[...]
    h = jnp.where(h >= 0.0, h, h * neg_slope)
    hb = h.astype(jnp.bfloat16).reshape(TH + 2, W, Cp)

    # ---- assemble pad_reflect_circular(h) for this tile into VMEM scratch ----
    # interior rows + 4 halo strips (no full-copy concatenates).  At the image
    # top/bottom the halo row is the in-tile reflected row (PyTorch 'reflect').
    hp_ref[1:TH + 1, 1:W + 1, :] = hb[1:TH + 1]
    top = jnp.where(t == 0, hb[2], hb[0])
    bot = jnp.where(t == nt - 1, hb[TH - 1], hb[TH + 1])
    hp_ref[0:1, 1:W + 1, :] = top.reshape(1, W, Cp)
    hp_ref[TH + 1:TH + 2, 1:W + 1, :] = bot.reshape(1, W, Cp)
    hp_ref[:, 0:1, :] = hp_ref[:, W:W + 1, :]        # circular W: left  = col W-1
    hp_ref[:, W + 1:W + 2, :] = hp_ref[:, 1:2, :]    # circular W: right = col 0

    # ---- conv2 + folded BN2 + LeakyReLU: single im2col matmul, K = 9*Cp ----
    hp = hp_ref[...]
    p2 = jnp.concatenate(
        [hp[dy:dy + TH, dx:dx + W, :] for dy in range(3) for dx in range(3)],
        axis=-1).reshape(R, 9 * Cp)
    g = jnp.dot(p2, w2_ref[...], preferred_element_type=jnp.float32)
    g = g * s2_ref[...] + t2_ref[...]
    g = jnp.where(g >= 0.0, g, g * neg_slope)
    # TODO(synk): Dropout(p=0.1) is identity in eval mode; the training-mode
    #             random mask is not implemented.

    # ---- shortcut + bf16 store (residual add stays f32) ----------------------
    x2d = xt[2:TH + 2, 1:W + 1, :].reshape(R, Cin)   # un-padded x rows, f32
    if identity:
        if Cp > Cin:
            # padded lanes of g are exactly zero; only the first Cin lanes need x.
            res = jnp.concatenate([g[:, :Cin] + x2d, g[:, Cin:]], axis=-1)
        else:
            res = g + x2d
    else:
        sc = jnp.dot(x2d.astype(jnp.bfloat16), wsc_ref[...],
                     preferred_element_type=jnp.float32) + tsc_ref[...]
        res = g + sc
    o_ref[0, 0] = res.astype(jnp.bfloat16)           # lane-dense (R, Cp) store


def _residual_block_pallas(xt, w1, s1, t1, w2, s2, t2, wsc, tsc, *,
                           B, T, TH, W, Cin, Cp, identity):
    kern = functools.partial(_resblock_kernel, TH=TH, W=W, Cin=Cin, Cp=Cp,
                             identity=identity, neg_slope=_NEG_SLOPE)
    const = lambda b, t: (0, 0)
    in_specs = [
        pl.BlockSpec((1, TH + 4, W + 2, Cin), lambda b, t: (b * T + t, 0, 0, 0)),
        pl.BlockSpec((9 * Cin, Cp), const),
        pl.BlockSpec((1, Cp), const),
        pl.BlockSpec((1, Cp), const),
        pl.BlockSpec((9 * Cp, Cp), const),
        pl.BlockSpec((1, Cp), const),
        pl.BlockSpec((1, Cp), const),
    ]
    args = [xt, w1, s1, t1, w2, s2, t2]
    if not identity:
        in_specs += [pl.BlockSpec((Cin, Cp), const), pl.BlockSpec((1, Cp), const)]
        args += [wsc, tsc]

    # TODO(synk): pipeline_mode=pl.Buffered(1) on the constant weight specs
    #             would single-buffer them (VMEM headroom on v7x); left at the
    #             default for lowering safety.
    return pl.pallas_call(
        kern,
        out_shape=jax.ShapeDtypeStruct((B, T, TH * W, Cp), jnp.bfloat16),
        grid_spec=pltpu.PrefetchScalarGridSpec(
            num_scalar_prefetch=0,
            grid=(B, T),
            in_specs=in_specs,
            out_specs=pl.BlockSpec((1, 1, TH * W, Cp), lambda b, t: (b, t, 0, 0)),
            scratch_shapes=[pltpu.VMEM((TH + 2, W + 2, Cp), jnp.bfloat16)],
        ),
        compiler_params=pltpu.CompilerParams(
            dimension_semantics=("parallel", "parallel"),
            # Tiles are sized to stay well below this; raise on v5e/v6e
            # (128 MiB physical VMEM) for bigger row tiles, keep <= ~48-56 MiB
            # on v7x (64 MiB physical).
            vmem_limit_bytes=48 * 1024 * 1024,
        ),
    )(*args)


# ---------------------------------------------------------------------------
# Module wrapper (eval-mode semantics of the PyTorch ResidualBlock)
# ---------------------------------------------------------------------------
class ResidualBlock:
    def __init__(self, in_channels, out_channels, activation="gelu",
                 norm=False, n_groups=1, seed=0, row_tile=None):
        # `activation` is ignored by the reference (it always uses LeakyReLU(0.3)).
        assert not norm, "norm=True (GroupNorm) path not implemented"
        # TODO(synk): GroupNorm (norm=True) path not implemented; the reference
        #             default (norm=False -> Identity) is what is reproduced.
        self.in_channels = int(in_channels)
        self.out_channels = int(out_channels)
        self.identity_shortcut = in_channels == out_channels
        self.row_tile = row_tile

        key = jax.random.PRNGKey(seed)
        ks = jax.random.split(key, 6)

        def conv_init(kw, kb, kh, kwd, cin, cout):
            fan_in = kh * kwd * cin
            bound = 1.0 / (fan_in ** 0.5)
            w = jax.random.uniform(kw, (kh, kwd, cin, cout), jnp.float32, -bound, bound)
            b = jax.random.uniform(kb, (cout,), jnp.float32, -bound, bound)
            return w, b

        self.w1, self.b1 = conv_init(ks[0], ks[1], 3, 3, in_channels, out_channels)
        self.w2, self.b2 = conv_init(ks[2], ks[3], 3, 3, out_channels, out_channels)
        if not self.identity_shortcut:
            self.wsc, self.bsc = conv_init(ks[4], ks[5], 1, 1, in_channels, out_channels)
        else:
            self.wsc = self.bsc = None

        # BatchNorm2d params / running stats (eval mode).
        C = out_channels
        self.bn1_w = jnp.ones((C,), jnp.float32)
        self.bn1_b = jnp.zeros((C,), jnp.float32)
        self.bn2_w = jnp.ones((C,), jnp.float32)
        self.bn2_b = jnp.zeros((C,), jnp.float32)
        self.bn1_mean = jnp.zeros((C,), jnp.float32)
        self.bn1_var = jnp.ones((C,), jnp.float32)
        self.bn2_mean = jnp.zeros((C,), jnp.float32)
        self.bn2_var = jnp.ones((C,), jnp.float32)

        self._pack()

    def _pack(self):
        """Fold BN into scale/shift, pad output channels to lane-dense Cp, bf16 weights."""
        Cin, Cout = self.in_channels, self.out_channels
        Cp = _round_up(max(Cout, 1), 128)
        self.Cp = Cp

        def pad_vec(v, fill):
            out = jnp.full((Cp,), fill, jnp.float32)
            return out.at[:v.shape[0]].set(v).reshape(1, Cp)

        s1 = self.bn1_w / jnp.sqrt(self.bn1_var + _BN_EPS)
        t1 = (self.b1 - self.bn1_mean) * s1 + self.bn1_b
        s2 = self.bn2_w / jnp.sqrt(self.bn2_var + _BN_EPS)
        t2 = (self.b2 - self.bn2_mean) * s2 + self.bn2_b
        self._s1, self._t1 = pad_vec(s1, 1.0), pad_vec(t1, 0.0)
        self._s2, self._t2 = pad_vec(s2, 1.0), pad_vec(t2, 0.0)

        # im2col weight layout: (dy, dx, cin) flattened -> rows of a single matmul.
        w1p = jnp.zeros((3, 3, Cin, Cp), jnp.float32).at[..., :Cout].set(self.w1)
        self._w1 = w1p.reshape(9 * Cin, Cp).astype(jnp.bfloat16)
        w2p = jnp.zeros((3, 3, Cp, Cp), jnp.float32).at[:, :, :Cout, :Cout].set(self.w2)
        self._w2 = w2p.reshape(9 * Cp, Cp).astype(jnp.bfloat16)

        if self.identity_shortcut:
            self._wsc = None
            self._tsc = None
        else:
            wsc = jnp.zeros((Cin, Cp), jnp.float32).at[:, :Cout].set(
                self.wsc.reshape(Cin, Cout))
            self._wsc = wsc.astype(jnp.bfloat16)
            self._tsc = pad_vec(self.bsc, 0.0)

    def __call__(self, x_nchw, row_tile=None):
        B, C, H, W = x_nchw.shape
        assert C == self.in_channels
        assert H >= 2, "reflect padding needs H >= 2"
        Cout, Cp = self.out_channels, self.Cp

        TH = row_tile or self.row_tile or _pick_row_tile(H, W, Cp)
        # TODO(synk): ragged last tile (H % TH != 0) not supported; TH must divide H.
        assert H % TH == 0, f"row tile {TH} must divide H={H}"
        T = H // TH

        x = jnp.transpose(x_nchw, (0, 2, 3, 1)).astype(jnp.float32)     # NHWC

        # Per-tile input windows with a (TH+4)-row halo.  Row indices follow
        # PyTorch 'reflect' at the image boundary, columns are circular; the
        # two outermost rows of boundary tiles are clamped (their conv results
        # are discarded in-kernel).  This single gather replaces the
        # reference's two F.pad passes and yields clean non-overlapping blocks.
        # TODO(synk): for very large inputs, build the halo in-kernel via a
        #             manual DMA (memory_space=pl.ANY) to save this HBM pass.
        vrow = jnp.arange(T)[:, None] * TH - 2 + jnp.arange(TH + 4)[None, :]
        rrow = jnp.where(vrow == -1, 1, vrow)
        rrow = jnp.where(vrow == H, H - 2, rrow)
        rrow = jnp.clip(rrow, 0, H - 1)
        ccol = (jnp.arange(W + 2) - 1) % W
        xt = x[:, rrow][:, :, :, ccol, :]                    # (B, T, TH+4, W+2, Cin)
        xt = xt.reshape(B * T, TH + 4, W + 2, self.in_channels)

        out = _residual_block_pallas(
            xt, self._w1, self._s1, self._t1, self._w2, self._s2, self._t2,
            self._wsc, self._tsc,
            B=B, T=T, TH=TH, W=W, Cin=self.in_channels, Cp=Cp,
            identity=self.identity_shortcut)                 # (B, T, TH*W, Cp) bf16
        out = out.reshape(B, H, W, Cp)[..., :Cout]
        return jnp.transpose(out, (0, 3, 1, 2)).astype(jnp.float32)


# ---------------------------------------------------------------------------
# Pure-JAX reference (independent implementation) for a correctness smoke test
# ---------------------------------------------------------------------------
def _reference_forward(block, x_nchw):
    x = jnp.transpose(x_nchw, (0, 2, 3, 1)).astype(jnp.float32)

    def pad_rc(z):
        z = jnp.pad(z, ((0, 0), (1, 1), (0, 0), (0, 0)), mode="reflect")
        return jnp.pad(z, ((0, 0), (0, 0), (1, 1), (0, 0)), mode="wrap")

    def conv(z, w, b):
        y = lax.conv_general_dilated(
            z, w, window_strides=(1, 1), padding="VALID",
            dimension_numbers=("NHWC", "HWIO", "NHWC"),
            precision=lax.Precision.HIGHEST)
        return y + b

    def bn(z, g, bt, mean, var):
        return (z - mean) / jnp.sqrt(var + _BN_EPS) * g + bt

    act = lambda z: jnp.where(z >= 0, z, _NEG_SLOPE * z)

    h = act(bn(conv(pad_rc(x), block.w1, block.b1),
               block.bn1_w, block.bn1_b, block.bn1_mean, block.bn1_var))
    h = act(bn(conv(pad_rc(h), block.w2, block.b2),
               block.bn2_w, block.bn2_b, block.bn2_mean, block.bn2_var))
    sc = x if block.identity_shortcut else conv(x, block.wsc, block.bsc)
    return jnp.transpose(h + sc, (0, 3, 1, 2))


# ---------------------------------------------------------------------------
# Demo
# ---------------------------------------------------------------------------
if __name__ == "__main__":
    B, H, W = 2, 16, 16
    key = jax.random.PRNGKey(0)
    kx1, kx2 = jax.random.split(key)

    # Case 1: in_channels != out_channels (1x1-conv shortcut), auto row tile
    # (whole image fits in one tile at this size -> grid (B, 1)).
    blk1 = ResidualBlock(4, 32, seed=0)
    x1 = jax.random.normal(kx1, (B, 4, H, W), jnp.float32)
    y1 = jax.block_until_ready(blk1(x1))
    assert y1.shape == (B, 32, H, W)
    err1 = float(jnp.max(jnp.abs(y1 - _reference_forward(blk1, x1))))
    assert err1 < 5e-2, f"mismatch (conv shortcut): max abs err {err1}"

    # Case 2: same weights, forced 8-row tiles -> grid (B, 2); exercises the
    # multi-tile halo / boundary-reflect path for the conv-shortcut variant.
    y1t = jax.block_until_ready(blk1(x1, row_tile=8))
    err1t = float(jnp.max(jnp.abs(y1t - _reference_forward(blk1, x1))))
    assert err1t < 5e-2, f"mismatch (conv shortcut, tiled): max abs err {err1t}"

    # Case 3: in_channels == out_channels (identity shortcut), forced 4-row
    # tiles -> grid (B, 4); exercises interior and both boundary tiles.
    blk2 = ResidualBlock(32, 32, seed=1, row_tile=4)
    x2 = jax.random.normal(kx2, (B, 32, H, W), jnp.float32)
    y2 = jax.block_until_ready(blk2(x2))
    assert y2.shape == (B, 32, H, W)
    err2 = float(jnp.max(jnp.abs(y2 - _reference_forward(blk2, x2))))
    assert err2 < 5e-2, f"mismatch (identity shortcut): max abs err {err2}"

    print("KERNEL_OK")
</pallas_src>

<mosaic_0001>
module attributes {stable_mosaic.version = 11 : i64} {
  func.func @_resblock_kernel(%arg0: i32, %arg1: i32, %arg2: memref<1x20x18x4xf32, #tpu.memory_space<vmem>>, %arg3: memref<36x128xbf16, #tpu.memory_space<vmem>>, %arg4: memref<1x128xf32, #tpu.memory_space<vmem>>, %arg5: memref<1x128xf32, #tpu.memory_space<vmem>>, %arg6: memref<1152x128xbf16, #tpu.memory_space<vmem>>, %arg7: memref<1x128xf32, #tpu.memory_space<vmem>>, %arg8: memref<1x128xf32, #tpu.memory_space<vmem>>, %arg9: memref<4x128xbf16, #tpu.memory_space<vmem>>, %arg10: memref<1x128xf32, #tpu.memory_space<vmem>>, %arg11: memref<1x1x256x128xbf16, #tpu.memory_space<vmem>>, %arg12: memref<18x18x128xbf16, #tpu.memory_space<vmem>>) attributes {dimension_semantics = [#tpu.dimension_semantics<parallel>, #tpu.dimension_semantics<parallel>], iteration_bounds = array<i64: 2, 1>, scalar_prefetch = 0 : i64, scratch_operands = 1 : i64, tpu.core_type = #tpu.core_type<tc>, window_params = [{transform_indices = @transform_0, window_bounds = array<i64: 1, 20, 18, 4>}, {pipeline_mode = #tpu.pipeline_mode<synchronous>, transform_indices = @transform_1, window_bounds = array<i64: 36, 128>}, {pipeline_mode = #tpu.pipeline_mode<synchronous>, transform_indices = @transform_2, window_bounds = array<i64: 1, 128>}, {pipeline_mode = #tpu.pipeline_mode<synchronous>, transform_indices = @transform_3, window_bounds = array<i64: 1, 128>}, {pipeline_mode = #tpu.pipeline_mode<synchronous>, transform_indices = @transform_4, window_bounds = array<i64: 1152, 128>}, {pipeline_mode = #tpu.pipeline_mode<synchronous>, transform_indices = @transform_5, window_bounds = array<i64: 1, 128>}, {pipeline_mode = #tpu.pipeline_mode<synchronous>, transform_indices = @transform_6, window_bounds = array<i64: 1, 128>}, {pipeline_mode = #tpu.pipeline_mode<synchronous>, transform_indices = @transform_7, window_bounds = array<i64: 4, 128>}, {pipeline_mode = #tpu.pipeline_mode<synchronous>, transform_indices = @transform_8, window_bounds = array<i64: 1, 128>}, {transform_indices = @transform_9, window_bounds = array<i64: 1, 1, 256, 128>}]} {
    %c0 = arith.constant 0 : index
    %c0_0 = arith.constant 0 : index
    %c0_1 = arith.constant 0 : index
    %c0_2 = arith.constant 0 : index
    %0 = vector.load %arg2[%c0, %c0_0, %c0_1, %c0_2] : memref<1x20x18x4xf32, #tpu.memory_space<vmem>>, vector<1x20x18x4xf32>
    %1 = vector.shape_cast %0 : vector<1x20x18x4xf32> to vector<20x18x4xf32>
    %2 = arith.truncf %1 : vector<20x18x4xf32> to vector<20x18x4xbf16>
    %3 = vector.extract_strided_slice %2 {offsets = [0, 0, 0], sizes = [18, 16, 4], strides = [1, 1, 1]} : vector<20x18x4xbf16> to vector<18x16x4xbf16>
    %4 = vector.extract_strided_slice %2 {offsets = [0, 1, 0], sizes = [18, 16, 4], strides = [1, 1, 1]} : vector<20x18x4xbf16> to vector<18x16x4xbf16>
    %5 = vector.extract_strided_slice %2 {offsets = [0, 2, 0], sizes = [18, 16, 4], strides = [1, 1, 1]} : vector<20x18x4xbf16> to vector<18x16x4xbf16>
    %6 = vector.extract_strided_slice %2 {offsets = [1, 0, 0], sizes = [18, 16, 4], strides = [1, 1, 1]} : vector<20x18x4xbf16> to vector<18x16x4xbf16>
    %7 = vector.extract_strided_slice %2 {offsets = [1, 1, 0], sizes = [18, 16, 4], strides = [1, 1, 1]} : vector<20x18x4xbf16> to vector<18x16x4xbf16>
    %8 = vector.extract_strided_slice %2 {offsets = [1, 2, 0], sizes = [18, 16, 4], strides = [1, 1, 1]} : vector<20x18x4xbf16> to vector<18x16x4xbf16>
    %9 = vector.extract_strided_slice %2 {offsets = [2, 0, 0], sizes = [18, 16, 4], strides = [1, 1, 1]} : vector<20x18x4xbf16> to vector<18x16x4xbf16>
    %10 = vector.extract_strided_slice %2 {offsets = [2, 1, 0], sizes = [18, 16, 4], strides = [1, 1, 1]} : vector<20x18x4xbf16> to vector<18x16x4xbf16>
    %11 = vector.extract_strided_slice %2 {offsets = [2, 2, 0], sizes = [18, 16, 4], strides = [1, 1, 1]} : vector<20x18x4xbf16> to vector<18x16x4xbf16>
    %12 = tpu.concatenate %3, %4, %5, %6, %7, %8, %9, %10, %11 in 2 : vector<18x16x4xbf16>, vector<18x16x4xbf16>, vector<18x16x4xbf16>, vector<18x16x4xbf16>, vector<18x16x4xbf16>, vector<18x16x4xbf16>, vector<18x16x4xbf16>, vector<18x16x4xbf16>, vector<18x16x4xbf16> -> vector<18x16x36xbf16>
    %13 = vector.shape_cast %12 : vector<18x16x36xbf16> to vector<288x36xbf16>
    %c0_3 = arith.constant 0 : index
    %c0_4 = arith.constant 0 : index
    %14 = vector.load %arg3[%c0_3, %c0_4] : memref<36x128xbf16, #tpu.memory_space<vmem>>, vector<36x128xbf16>
    %cst = arith.constant dense<0.000000e+00> : vector<288x128xf32>
    %15 = tpu.matmul %13, %14, %cst {dimension_numbers = #tpu.dot_dimension_numbers<[1], [0], [0], [1], [0, 0, 1, 1], [], []>} : vector<288x36xbf16>, vector<36x128xbf16>, vector<288x128xf32> -> vector<288x128xf32>
    %c0_5 = arith.constant 0 : index
    %c0_6 = arith.constant 0 : index
    %16 = vector.load %arg4[%c0_5, %c0_6] : memref<1x128xf32, #tpu.memory_space<vmem>>, vector<1x128xf32>
    %17 = vector.broadcast %16 : vector<1x128xf32> to vector<288x128xf32>
    %18 = arith.mulf %15, %17 : vector<288x128xf32>
    %c0_7 = arith.constant 0 : index
    %c0_8 = arith.constant 0 : index
    %19 = vector.load %arg5[%c0_7, %c0_8] : memref<1x128xf32, #tpu.memory_space<vmem>>, vector<1x128xf32>
    %20 = vector.broadcast %19 : vector<1x128xf32> to vector<288x128xf32>
    %21 = arith.addf %18, %20 : vector<288x128xf32>
    %cst_9 = arith.constant 0.000000e+00 : f32
    %22 = vector.broadcast %cst_9 : f32 to vector<288x128xf32>
    %23 = arith.cmpf oge, %21, %22 : vector<288x128xf32>
    %cst_10 = arith.constant 3.000000e-01 : f32
    %24 = vector.broadcast %cst_10 : f32 to vector<288x128xf32>
    %25 = arith.mulf %21, %24 : vector<288x128xf32>
    %26 = arith.select %23, %21, %25 : vector<288x128xi1>, vector<288x128xf32>
    %27 = arith.truncf %26 : vector<288x128xf32> to vector<288x128xbf16>
    %28 = vector.shape_cast %27 : vector<288x128xbf16> to vector<18x16x128xbf16>
    %29 = vector.extract_strided_slice %28 {offsets = [1, 0, 0], sizes = [16, 16, 128], strides = [1, 1, 1]} : vector<18x16x128xbf16> to vector<16x16x128xbf16>
    %c1 = arith.constant 1 : index
    %c1_11 = arith.constant 1 : index
    %c0_12 = arith.constant 0 : index
    %30 = vector.load %arg12[%c1, %c1_11, %c0_12] : memref<18x18x128xbf16, #tpu.memory_space<vmem>>, vector<16x16x128xbf16>
    tpu.vector_store %arg12[%c1, %c1_11, %c0_12], %29 {strides = array<i32>} : memref<18x18x128xbf16, #tpu.memory_space<vmem>>, vector<16x16x128xbf16>,
    %c0_i32 = arith.constant 0 : i32
    %31 = arith.cmpi eq, %arg1, %c0_i32 : i32
    %32 = vector.extract_strided_slice %28 {offsets = [2, 0, 0], sizes = [1, 16, 128], strides = [1, 1, 1]} : vector<18x16x128xbf16> to vector<1x16x128xbf16>
    %33 = vector.shape_cast %32 : vector<1x16x128xbf16> to vector<16x128xbf16>
    %34 = vector.extract_strided_slice %28 {offsets = [0, 0, 0], sizes = [1, 16, 128], strides = [1, 1, 1]} : vector<18x16x128xbf16> to vector<1x16x128xbf16>
    %35 = vector.shape_cast %34 : vector<1x16x128xbf16> to vector<16x128xbf16>
    %36 = arith.select %31, %33, %35 : vector<16x128xbf16>
    %c0_i32_13 = arith.constant 0 : i32
    %37 = arith.cmpi eq, %arg1, %c0_i32_13 : i32
    %38 = vector.extract_strided_slice %28 {offsets = [15, 0, 0], sizes = [1, 16, 128], strides = [1, 1, 1]} : vector<18x16x128xbf16> to vector<1x16x128xbf16>
    %39 = vector.shape_cast %38 : vector<1x16x128xbf16> to vector<16x128xbf16>
    %40 = vector.extract_strided_slice %28 {offsets = [17, 0, 0], sizes = [1, 16, 128], strides = [1, 1, 1]} : vector<18x16x128xbf16> to vector<1x16x128xbf16>
    %41 = vector.shape_cast %40 : vector<1x16x128xbf16> to vector<16x128xbf16>
    %42 = arith.select %37, %39, %41 : vector<16x128xbf16>
    %43 = vector.shape_cast %36 : vector<16x128xbf16> to vector<1x16x128xbf16>
    %c0_14 = arith.constant 0 : index
    %c1_15 = arith.constant 1 : index
    %c0_16 = arith.constant 0 : index
    %44 = vector.load %arg12[%c0_14, %c1_15, %c0_16] : memref<18x18x128xbf16, #tpu.memory_space<vmem>>, vector<1x16x128xbf16>
    tpu.vector_store %arg12[%c0_14, %c1_15, %c0_16], %43 {strides = array<i32>} : memref<18x18x128xbf16, #tpu.memory_space<vmem>>, vector<1x16x128xbf16>,
    %45 = vector.shape_cast %42 : vector<16x128xbf16> to vector<1x16x128xbf16>
    %c17 = arith.constant 17 : index
    %c1_17 = arith.constant 1 : index
    %c0_18 = arith.constant 0 : index
    %46 = vector.load %arg12[%c17, %c1_17, %c0_18] : memref<18x18x128xbf16, #tpu.memory_space<vmem>>, vector<1x16x128xbf16>
    tpu.vector_store %arg12[%c17, %c1_17, %c0_18], %45 {strides = array<i32>} : memref<18x18x128xbf16, #tpu.memory_space<vmem>>, vector<1x16x128xbf16>,
    %c0_19 = arith.constant 0 : index
    %c16 = arith.constant 16 : index
    %c0_20 = arith.constant 0 : index
    %47 = vector.load %arg12[%c0_19, %c16, %c0_20] : memref<18x18x128xbf16, #tpu.memory_space<vmem>>, vector<18x1x128xbf16>
    %c0_21 = arith.constant 0 : index
    %c0_22 = arith.constant 0 : index
    %c0_23 = arith.constant 0 : index
    %48 = vector.load %arg12[%c0_21, %c0_22, %c0_23] : memref<18x18x128xbf16, #tpu.memory_space<vmem>>, vector<18x1x128xbf16>
    tpu.vector_store %arg12[%c0_21, %c0_22, %c0_23], %47 {strides = array<i32>} : memref<18x18x128xbf16, #tpu.memory_space<vmem>>, vector<18x1x128xbf16>,
    %c0_24 = arith.constant 0 : index
    %c1_25 = arith.constant 1 : index
    %c0_26 = arith.constant 0 : index
    %49 = vector.load %arg12[%c0_24, %c1_25, %c0_26] : memref<18x18x128xbf16, #tpu.memory_space<vmem>>, vector<18x1x128xbf16>
    %c0_27 = arith.constant 0 : index
    %c17_28 = arith.constant 17 : index
    %c0_29 = arith.constant 0 : index
    %50 = vector.load %arg12[%c0_27, %c17_28, %c0_29] : memref<18x18x128xbf16, #tpu.memory_space<vmem>>, vector<18x1x128xbf16>
    tpu.vector_store %arg12[%c0_27, %c17_28, %c0_29], %49 {strides = array<i32>} : memref<18x18x128xbf16, #tpu.memory_space<vmem>>, vector<18x1x128xbf16>,
    %c0_30 = arith.constant 0 : index
    %c0_31 = arith.constant 0 : index
    %c0_32 = arith.constant 0 : index
    %51 = vector.load %arg12[%c0_30, %c0_31, %c0_32] : memref<18x18x128xbf16, #tpu.memory_space<vmem>>, vector<18x18x128xbf16>
    %52 = vector.extract_strided_slice %51 {offsets = [0, 0, 0], sizes = [16, 16, 128], strides = [1, 1, 1]} : vector<18x18x128xbf16> to vector<16x16x128xbf16>
    %53 = vector.extract_strided_slice %51 {offsets = [0, 1, 0], sizes = [16, 16, 128], strides = [1, 1, 1]} : vector<18x18x128xbf16> to vector<16x16x128xbf16>
    %54 = vector.extract_strided_slice %51 {offsets = [0, 2, 0], sizes = [16, 16, 128], strides = [1, 1, 1]} : vector<18x18x128xbf16> to vector<16x16x128xbf16>
    %55 = vector.extract_strided_slice %51 {offsets = [1, 0, 0], sizes = [16, 16, 128], strides = [1, 1, 1]} : vector<18x18x128xbf16> to vector<16x16x128xbf16>
    %56 = vector.extract_strided_slice %51 {offsets = [1, 1, 0], sizes = [16, 16, 128], strides = [1, 1, 1]} : vector<18x18x128xbf16> to vector<16x16x128xbf16>
    %57 = vector.extract_strided_slice %51 {offsets = [1, 2, 0], sizes = [16, 16, 128], strides = [1, 1, 1]} : vector<18x18x128xbf16> to vector<16x16x128xbf16>
    %58 = vector.extract_strided_slice %51 {offsets = [2, 0, 0], sizes = [16, 16, 128], strides = [1, 1, 1]} : vector<18x18x128xbf16> to vector<16x16x128xbf16>
    %59 = vector.extract_strided_slice %51 {offsets = [2, 1, 0], sizes = [16, 16, 128], strides = [1, 1, 1]} : vector<18x18x128xbf16> to vector<16x16x128xbf16>
    %60 = vector.extract_strided_slice %51 {offsets = [2, 2, 0], sizes = [16, 16, 128], strides = [1, 1, 1]} : vector<18x18x128xbf16> to vector<16x16x128xbf16>
    %61 = tpu.concatenate %52, %53, %54, %55, %56, %57, %58, %59, %60 in 2 : vector<16x16x128xbf16>, vector<16x16x128xbf16>, vector<16x16x128xbf16>, vector<16x16x128xbf16>, vector<16x16x128xbf16>, vector<16x16x128xbf16>, vector<16x16x128xbf16>, vector<16x16x128xbf16>, vector<16x16x128xbf16> -> vector<16x16x1152xbf16>
    %62 = vector.shape_cast %61 : vector<16x16x1152xbf16> to vector<256x1152xbf16>
    %c0_33 = arith.constant 0 : index
    %c0_34 = arith.constant 0 : index
    %63 = vector.load %arg6[%c0_33, %c0_34] : memref<1152x128xbf16, #tpu.memory_space<vmem>>, vector<1152x128xbf16>
    %cst_35 = arith.constant dense<0.000000e+00> : vector<256x128xf32>
    %64 = tpu.matmul %62, %63, %cst_35 {dimension_numbers = #tpu.dot_dimension_numbers<[1], [0], [0], [1], [0, 0, 1, 1], [], []>} : vector<256x1152xbf16>, vector<1152x128xbf16>, vector<256x128xf32> -> vector<256x128xf32>
    %c0_36 = arith.constant 0 : index
    %c0_37 = arith.constant 0 : index
    %65 = vector.load %arg7[%c0_36, %c0_37] : memref<1x128xf32, #tpu.memory_space<vmem>>, vector<1x128xf32>
    %66 = vector.broadcast %65 : vector<1x128xf32> to vector<256x128xf32>
    %67 = arith.mulf %64, %66 : vector<256x128xf32>
    %c0_38 = arith.constant 0 : index
    %c0_39 = arith.constant 0 : index
    %68 = vector.load %arg8[%c0_38, %c0_39] : memref<1x128xf32, #tpu.memory_space<vmem>>, vector<1x128xf32>
    %69 = vector.broadcast %68 : vector<1x128xf32> to vector<256x128xf32>
    %70 = arith.addf %67, %69 : vector<256x128xf32>
    %cst_40 = arith.constant 0.000000e+00 : f32
    %71 = vector.broadcast %cst_40 : f32 to vector<256x128xf32>
    %72 = arith.cmpf oge, %70, %71 : vector<256x128xf32>
    %cst_41 = arith.constant 3.000000e-01 : f32
    %73 = vector.broadcast %cst_41 : f32 to vector<256x128xf32>
    %74 = arith.mulf %70, %73 : vector<256x128xf32>
    %75 = arith.select %72, %70, %74 : vector<256x128xi1>, vector<256x128xf32>
    %76 = vector.extract_strided_slice %1 {offsets = [2, 1, 0], sizes = [16, 16, 4], strides = [1, 1, 1]} : vector<20x18x4xf32> to vector<16x16x4xf32>
    %77 = vector.shape_cast %76 : vector<16x16x4xf32> to vector<256x4xf32>
    %78 = arith.truncf %77 : vector<256x4xf32> to vector<256x4xbf16>
    %c0_42 = arith.constant 0 : index
    %c0_43 = arith.constant 0 : index
    %79 = vector.load %arg9[%c0_42, %c0_43] : memref<4x128xbf16, #tpu.memory_space<vmem>>, vector<4x128xbf16>
    %cst_44 = arith.constant dense<0.000000e+00> : vector<256x128xf32>
    %80 = tpu.matmul %78, %79, %cst_44 {dimension_numbers = #tpu.dot_dimension_numbers<[1], [0], [0], [1], [0, 0, 1, 1], [], []>} : vector<256x4xbf16>, vector<4x128xbf16>, vector<256x128xf32> -> vector<256x128xf32>
    %c0_45 = arith.constant 0 : index
    %c0_46 = arith.constant 0 : index
    %81 = vector.load %arg10[%c0_45, %c0_46] : memref<1x128xf32, #tpu.memory_space<vmem>>, vector<1x128xf32>
    %82 = vector.broadcast %81 : vector<1x128xf32> to vector<256x128xf32>
    %83 = arith.addf %80, %82 : vector<256x128xf32>
    %84 = arith.addf %75, %83 : vector<256x128xf32>
    %85 = arith.truncf %84 : vector<256x128xf32> to vector<256x128xbf16>
    %c0_47 = arith.constant 0 : index
    %c0_48 = arith.constant 0 : index
    %c0_49 = arith.constant 0 : index
    %c0_50 = arith.constant 0 : index
    %86 = vector.load %arg11[%c0_47, %c0_48, %c0_49, %c0_50] : memref<1x1x256x128xbf16, #tpu.memory_space<vmem>>, vector<1x1x256x128xbf16>
    %87 = vector.shape_cast %86 : vector<1x1x256x128xbf16> to vector<256x128xbf16>
    %88 = vector.shape_cast %85 : vector<256x128xbf16> to vector<1x1x256x128xbf16>
    tpu.vector_store %arg11[%c0_47, %c0_48, %c0_49, %c0_50], %88 {strides = array<i32>} : memref<1x1x256x128xbf16, #tpu.memory_space<vmem>>, vector<1x1x256x128xbf16>,
    return
  }
  func.func @transform_0(%arg0: i32, %arg1: i32) -> (i32, i32, i32, i32) {
    %c1_i32 = arith.constant 1 : i32
    %0 = arith.muli %arg0, %c1_i32 : i32
    %1 = arith.addi %0, %arg1 : i32
    %c0_i32 = arith.constant 0 : i32
    %c0_i32_0 = arith.constant 0 : i32
    %c0_i32_1 = arith.constant 0 : i32
    %c0_i32_2 = arith.constant 0 : i32
    return %1, %c0_i32, %c0_i32_0, %c0_i32_1 : i32, i32, i32, i32
  }
  func.func @transform_1(%arg0: i32, %arg1: i32) -> (i32, i32) {
    %c0_i32 = arith.constant 0 : i32
    %c0_i32_0 = arith.constant 0 : i32
    %c0_i32_1 = arith.constant 0 : i32
    return %c0_i32, %c0_i32_0 : i32, i32
  }
  func.func @transform_2(%arg0: i32, %arg1: i32) -> (i32, i32) {
    %c0_i32 = arith.constant 0 : i32
    %c0_i32_0 = arith.constant 0 : i32
    %c0_i32_1 = arith.constant 0 : i32
    return %c0_i32, %c0_i32_0 : i32, i32
  }
  func.func @transform_3(%arg0: i32, %arg1: i32) -> (i32, i32) {
    %c0_i32 = arith.constant 0 : i32
    %c0_i32_0 = arith.constant 0 : i32
    %c0_i32_1 = arith.constant 0 : i32
    return %c0_i32, %c0_i32_0 : i32, i32
  }
  func.func @transform_4(%arg0: i32, %arg1: i32) -> (i32, i32) {
    %c0_i32 = arith.constant 0 : i32
    %c0_i32_0 = arith.constant 0 : i32
    %c0_i32_1 = arith.constant 0 : i32
    return %c0_i32, %c0_i32_0 : i32, i32
  }
  func.func @transform_5(%arg0: i32, %arg1: i32) -> (i32, i32) {
    %c0_i32 = arith.constant 0 : i32
    %c0_i32_0 = arith.constant 0 : i32
    %c0_i32_1 = arith.constant 0 : i32
    return %c0_i32, %c0_i32_0 : i32, i32
  }
  func.func @transform_6(%arg0: i32, %arg1: i32) -> (i32, i32) {
    %c0_i32 = arith.constant 0 : i32
    %c0_i32_0 = arith.constant 0 : i32
    %c0_i32_1 = arith.constant 0 : i32
    return %c0_i32, %c0_i32_0 : i32, i32
  }
  func.func @transform_7(%arg0: i32, %arg1: i32) -> (i32, i32) {
    %c0_i32 = arith.constant 0 : i32
    %c0_i32_0 = arith.constant 0 : i32
    %c0_i32_1 = arith.constant 0 : i32
    return %c0_i32, %c0_i32_0 : i32, i32
  }
  func.func @transform_8(%arg0: i32, %arg1: i32) -> (i32, i32) {
    %c0_i32 = arith.constant 0 : i32
    %c0_i32_0 = arith.constant 0 : i32
    %c0_i32_1 = arith.constant 0 : i32
    return %c0_i32, %c0_i32_0 : i32, i32
  }
  func.func @transform_9(%arg0: i32, %arg1: i32) -> (i32, i32, i32, i32) {
    %c0_i32 = arith.constant 0 : i32
    %c0_i32_0 = arith.constant 0 : i32
    %c0_i32_1 = arith.constant 0 : i32
    return %arg0, %arg1, %c0_i32, %c0_i32_0 : i32, i32, i32, i32
  }
}

</mosaic_0001>

<bundles_post_ra>
// kernel: tpu_custom_call.1
= control target key start
LH: loop header
LB: loop body
LE: loop exit
PB: predicated region body
PF: predicated region fallthrough
CT: control target
= control target key end

     0   :  { %s8292_s0 = inlined_call_operand.vmem [shape: f32[2,20,18,4], index: 0, kind: input, shape index: {}]   ;;  %s8293_s1 = inlined_call_operand.vmem [shape: bf16[36,128], index: 1, kind: input, shape index: {}]   ;;  %s8294_s2 = inlined_call_operand.vmem [shape: f32[1,128], index: 2, kind: input, shape index: {}]   ;;  %s8295_s3 = inlined_call_operand.vmem [shape: f32[1,128], index: 3, kind: input, shape index: {}]   ;;  %s8296_s4 = inlined_call_operand.vmem [shape: bf16[1152,128], index: 4, kind: input, shape index: {}]   ;;  %s8297_s5 = inlined_call_operand.vmem [shape: f32[1,128], index: 5, kind: input, shape index: {}]   ;;  %s8298_s6 = inlined_call_operand.vmem [shape: f32[1,128], index: 6, kind: input, shape index: {}]   ;;  %s8299_s7 = inlined_call_operand.vmem [shape: bf16[4,128], index: 7, kind: input, shape index: {}]   ;;  %s8300_s8 = inlined_call_operand.vmem [shape: f32[1,128], index: 8, kind: input, shape index: {}]   ;;  %s8301_s9 = inlined_call_operand.hbm [shape: bf16[2,1,256,128], index: 9, kind: output, shape index: {}]  }
   0x1   :  { %8331 = sst [smem:[#allocation45_spill]] %s8292_s0 }
   0x2   :  { %14 = vsyncpa [#allocation4], 0 }
   0x3   :  { %16 = vsyncpa [#allocation4 + $0x1], 0  ;;  %s6033_s30 = smov 0   ;;  %s6035_s10 = smov 0  }
   0x4   :  { %s6037_s11 = smov 0   ;;  %s6039_s12 = smov 0  }
   0x5   :  { %s6041_s13 = smov 0   ;;  %s6043_s14 = smov 0  }
   0x6 LB: > { %s5128_s15 = sadd.s32 4294967295, %s5972_s14   ;;  %s5129_s16 = sadd.s32 4294967294, %s5972_s14   ;;  %s5972_s14 = sphi %s6043_s14, %s22_s14   ;;  %s5968_s13 = sphi %s6041_s13, %s8452_s13   ;;  %s5964_s12 = sphi %s6039_s12, %s8451_s12   ;;  %s5960_s11 = sphi %s6037_s11, %s8450_s11   ;;  %s5956_s10 = sphi %s6035_s10, %s8449_s10   ;;  %s5952_s30 = sphi %s6033_s30, %s8448_s30  }
   0x7   : > { %s34_s17 = sadd.s32 1, %s5968_s13  ;;  %s239_s18 = sadd.s32 1, %s5960_s11 }
   0x8   : > { %p36_p0 = scmp.ge.s32.totalorder %s34_s17, 2  ;;  %p249_p1 = scmp.ne.s32.totalorder %s5960_s11, %s5956_s10 }
   0x9   : > { %p250_p2 = scmp.eq.s32.totalorder %s5128_s15, 1  ;;  %p255_p3 = scmp.ne.s32.totalorder %s5956_s10, %s5952_s30 }
   0xa   : > { %s8454_s17 = smov (%p36_p0, %s34_s17), 0  ;;  %p256_p5 = scmp.eq.s32.totalorder %s5129_s16, 1 }
   0xb   : > { %p6073_p4 = por %p250_p2, %p249_p1  ;;  %s234_s20 = ssub.s32 %s5968_s13, %s8454_s17 }
   0xc   : > { %p5132_p6 = scmp.ge.s32.totalorder %s5972_s14, 1  ;;  %p237_p7 = scmp.eq.s32.totalorder %s234_s20, 0 }
   0xd   : > { %p6080_p8 = por %p256_p5, %p255_p3  ;;  %p308_p9 = scmp.lt.s32.totalorder %s5972_s14, 3 }
   0xe   : > { %s6086_s22 = scalar_select %p237_p7, %s5960_s11, %s239_s18  }
   0xf   : > { %p309_p10 = pnand %p5132_p6, %p308_p9 }
  0x11   : > { %312 = sbr.rel (%p309_p10) target bundleno = 1348 (0x544), region = 56 }
  0x16   : > { %p346_p11 = scmp.lt.s32.totalorder %s5964_s12, 1  ;;  %s8334_s0 = sld [smem:[#allocation45_spill]]  ;;  %vm870_vm0 = vcmask 1046528   ;;  %vm617_vm1 = vsmask.f32 7424  ;;  %vm8310_vm2 = vcmask 1041408  }
  0x17   : > { %s8302_s28 = smov 12   ;;  %s5975_s29 = smov 24   ;;  %vm1223_vm3 = vcmask 31744   ;;  %vm1260_vm4 = vcmask 64512   ;;  %vm1297_vm5 = vcmask 97280   ;;  %vm1334_vm6 = vcmask 130048  }
  0x18   : > { %s347_s23 = scalar_select %p346_p11, %s5964_s12, 1  ;;  %vm1371_vm7 = vcmask 162816   ;;  %vm1408_vm8 = vcmask 195584   ;;  %vm8312_vm9 = vcmask 228352   ;;  %vm1482_vm10 = vcmask 261120  }
  0x19   : > { %s8313_s15 = smov 8   ;;  %s8306_s16 = smov 32   ;;  %vm1539_vm11 = vcmask 293888   ;;  %vm2227_vm13 = vcmask 1043456   ;;  %vm8311_vm14 = vsmask.f32 7938 }
  0x1a   : > { %s5754_s24 = smul.u32 480, %s347_s23  ;;  %s8317_s18 = smov 20   ;;  %vm6649_vm15 = vmand %vm2227_vm13, %vm8311_vm14  ;;  %vm1903_vm13 = vsmask.f32 256 }
  0x1b   : > { %s8308_s20 = smov 4   ;;  %s8304_s23 = smov 16  }
  0x1c   : > { %s6093_s27 = scalar_lea.vmem %s8334_s0, %s5754_s24  ;;  %s8315_s24 = smov 28  }
  0x1d   : > { %v356_v0 = vld [vmem:[%s6093_s27 + $0x18] sm:$0xff]  ;;  %v357_v1 = vld [vmem:[%s6093_s27 + $0x20] sm:$0xff]  ;;  %v354_v5 = vld [vmem:[%s6093_s27 + $0x8] sm:$0xff]  ;;  %s8352_s25 = smov 8   ;;  %s8354_s26 = smov 20  }
  0x1e   : > { %v353_v2 = vld [vmem:[%s6093_s27] sm:$0xff]  ;;  %v416_v3 = vpack.c.bf16 %v356_v0, %v356_v0  ;;  %v417_v4 = vpack.c.bf16 %v357_v1, %v357_v1  ;;  %v355_v6 = vld [vmem:[%s6093_s27 + $0x10] sm:$0x3]  ;;  %v414_v9 = vpack.c.bf16 %v354_v5, %v354_v5  ;;  %v360_v11 = vld [vmem:[%s6093_s27 + $0x38] sm:$0xff] }
  0x1f   : > { %v413_v7 = vpack.c.bf16 %v353_v2, %v353_v2  ;;  %v359_v8 = vld [vmem:[%s6093_s27 + $0x30] sm:$0xff]  ;;  %v415_v10 = vpack.c.bf16 %v355_v6, %v355_v6  ;;  %v361_v12 = vld [vmem:[%s6093_s27 + $0x40] sm:$0x3]  ;;  %v420_v18 = vpack.c.bf16 %v360_v11, %v360_v11  ;;  %v358_v19 = vld [vmem:[%s6093_s27 + $0x28] sm:$0x3]  ;;  %v4669_v26 = vrot.slane %v360_v11, 1 }
  0x20   : > { %v419_v13 = vpack.c.bf16 %v359_v8, %v359_v8  ;;  %v4668_v14 = vrot.slane %v359_v8, 1  ;;  %v511_v15 = vunpack.c.l.b16 %v416_v3  ;;  %v512_v16 = vunpack.c.l.b16 %v417_v4  ;;  %v362_v61 = vld [vmem:[%s6093_s27 + $0x48] sm:$0xff]  ;;  %v363_v62 = vld [vmem:[%s6093_s27 + $0x50] sm:$0xff]  ;;  %v364_v5 = vld [vmem:[%s6093_s27 + $0x58] sm:$0x3] }
  0x21   : > { %v509_v17 = vunpack.c.l.b16 %v413_v7  ;;  %v510_v20 = vunpack.c.l.b16 %v414_v9  ;;  %v581_v21 = vunpack.c.l.b16 %v415_v10  ;;  %v421_v22 = vpack.c.bf16 %v361_v12, %v361_v12 }
  0x22   : > { %v513_v23 = vunpack.c.l.b16 %v419_v13  ;;  %v6104_v24 = vpack.c.b16 %v512_v16, %v511_v15  ;;  %v514_v25 = vunpack.c.l.b16 %v420_v18  ;;  %v4671_v27 = vrot.slane %v361_v12, 1 }
  0x23   : > { %v6106_v28 = vpack.c.b16 %v510_v20, %v509_v17  ;;  %v599_v29 = vpack.c.b16 %v581_v21, %v581_v21  ;;  %v583_v30 = vunpack.c.l.b16 %v421_v22  ;;  %v418_v31 = vpack.c.bf16 %v358_v19, %v358_v19  ;;  %v365_v20 = vld [vmem:[%s6093_s27 + $0x60] sm:$0xff]  ;;  %v366_v21 = vld [vmem:[%s6093_s27 + $0x68] sm:$0xff] }
  0x24   : > { %966 = vrot.lane.b32.xlu1 %v6104_v24, %s8302_s28  ;;  %v6110_v32 = vpack.c.b16 %v514_v25, %v513_v23  ;;  %v6113_v33 = vsel %vm870_vm0, %v4668_v14, %v4669_v26  ;;  %v6116_v34 = vsel %vm870_vm0, %v4669_v26, %v4671_v27  ;;  %v633_v46 = vshll.u32 %v6104_v24, 16  ;;  %v367_v27 = vld [vmem:[%s6093_s27 + $0x70] sm:$0x3] }
  0x25   : > { %8335 = vst [vmem:[#allocation6_spill] sm:$0xff] %v6113_v33  ;;  %v871_v35 = vrot.slane %v6106_v28, 1  ;;  %v872_v36 = vrot.slane %v599_v29, 1  ;;  %v601_v37 = vpack.c.b16 %v583_v30, %v583_v30  ;;  %v619_v40 = vshrl.u32 %v6106_v28, 16 }
  0x26   : > { %8336 = vst [vmem:[#allocation7_spill] sm:$0xff] %v6116_v34  ;;  %v877_v39 = vrot.slane %v6110_v32, 1  ;;  %v621_v41 = vshll.u32 %v6106_v28, 16  ;;  %v626_v42 = vshll.u32 %v599_v29, 16  ;;  %1097 = vrot.lane.b32.xlu2 %v6110_v32, %s5975_s29  ;;  %v582_v45 = vunpack.c.l.b16 %v418_v31 }
  0x27   : > { %v873_v43 = vsel %vm870_vm0, %v871_v35, %v872_v36  ;;  %v878_v44 = vrot.slane %v601_v37, 1  ;;  %v631_v48 = vshrl.u32 %v6104_v24, 16  ;;  %v645_v49 = vshll.u32 %v6110_v32, 16 }
  0x28   : > { %925 = vrot.lane.b32.xlu0 %v873_v43, %s8313_s15  ;;  %v623_v47 = vrot.slane %v621_v41, 1  ;;  %v628_v51 = vrot.slane %v626_v42, 1  ;;  %v600_v52 = vpack.c.b16 %v582_v45, %v582_v45  ;;  %v635_v53 = vrot.slane %v633_v46, 1 }
  0x29   : > { %v6132_v50 = vsel %vm870_vm0, %v877_v39, %v878_v44  ;;  %v874_v55 = vrot.slane %v6104_v24, 1  ;;  %v643_v58 = vshrl.u32 %v6110_v32, 16  ;;  %v647_v59 = vrot.slane %v645_v49, 1 }
  0x2a   : > { %v624_v54 = vor.u32 %v623_v47, %v619_v40  ;;  %v638_v56 = vshll.u32 %v600_v52, 16  ;;  %v875_v57 = vrot.slane %v600_v52, 1  ;;  %v650_v60 = vshll.u32 %v601_v37, 16  ;;  %v368_v52 = vld [vmem:[%s6093_s27 + $0x78] sm:$0xff] }
  0x2b   : > { %v636_v0 = vor.u32 %v635_v53, %v631_v48  ;;  %v422_v3 = vpack.c.bf16 %v362_v61, %v362_v61  ;;  %v423_v4 = vpack.c.bf16 %v363_v62, %v363_v62  ;;  %v648_v7 = vor.u32 %v647_v59, %v643_v58  ;;  %v369_v53 = vld [vmem:[%s6093_s27 + $0x80] sm:$0xff] }
  0x2c   : > { %1187 = vrot.lane.b32.xlu1 %v6132_v50, %s8306_s16  ;;  %v629_v63 = vsel %vm617_vm1, %v624_v54, %v628_v51  ;;  %v640_v1 = vrot.slane %v638_v56, 1  ;;  %v876_v2 = vsel %vm870_vm0, %v874_v55, %v875_v57  ;;  %v652_v8 = vrot.slane %v650_v60, 1  ;;  %v370_v57 = vld [vmem:[%s6093_s27 + $0x88] sm:$0x3] }
  0x2d   : > { %v515_v9 = vunpack.c.l.b16 %v422_v3  ;;  %v516_v10 = vunpack.c.l.b16 %v423_v4  ;;  %v424_v11 = vpack.c.bf16 %v364_v5, %v364_v5  ;;  %v425_v25 = vpack.c.bf16 %v365_v20, %v365_v20  ;;  %v372_v3 = vld [vmem:[%s6093_s27 + $0x98] sm:$0xff] }
  0x2e   : > { %1056 = vrot.lane.b32.xlu2 %v876_v2, %s8317_s18  ;;  %v641_v6 = vsel %vm617_vm1, %v636_v0, %v640_v1  ;;  %v653_v12 = vsel %vm617_vm1, %v648_v7, %v652_v8  ;;  %v426_v26 = vpack.c.bf16 %v366_v21, %v366_v21  ;;  %v427_v35 = vpack.c.bf16 %v367_v27, %v367_v27 }
  0x2f   : > { %v6149_v13 = vpack.c.b16 %v516_v10, %v515_v9  ;;  %v584_v14 = vunpack.c.l.b16 %v424_v11  ;;  %v517_v30 = vunpack.c.l.b16 %v425_v25  ;;  %v428_v55 = vpack.c.bf16 %v368_v52, %v368_v52  ;;  %v373_v10 = vld [vmem:[%s6093_s27 + $0xa0] sm:$0x3] }
  0x30   : > { %834 = vrot.lane.b32.xlu0 %v629_v63, %s8308_s20  ;;  %v518_v31 = vunpack.c.l.b16 %v426_v26  ;;  %v585_v40 = vunpack.c.l.b16 %v427_v35  ;;  %v429_v56 = vpack.c.bf16 %v369_v53, %v369_v53  ;;  %v430_v58 = vpack.c.bf16 %v370_v57, %v370_v57 }
  0x31   : > { %v657_v15 = vshll.u32 %v6149_v13, 16  ;;  %v602_v16 = vpack.c.b16 %v584_v14, %v584_v14  ;;  %v655_v17 = vshrl.u32 %v6149_v13, 16  ;;  %v880_v36 = vrot.slane %v6149_v13, 1 }
  0x32   : > { %v6168_v39 = vpack.c.b16 %v518_v31, %v517_v30  ;;  %v603_v42 = vpack.c.b16 %v585_v40, %v585_v40  ;;  %v519_v59 = vunpack.c.l.b16 %v428_v55  ;;  %v520_v60 = vunpack.c.l.b16 %v429_v56  ;;  %v375_v31 = vld [vmem:[%s6093_s27 + $0xb0] sm:$0xff] }
  0x33   : > { %v659_v18 = vrot.slane %v657_v15, 1  ;;  %v662_v19 = vshll.u32 %v602_v16, 16  ;;  %v881_v37 = vrot.slane %v602_v16, 1  ;;  %v586_v62 = vunpack.c.l.b16 %v430_v58 }
  0x34   : > { %1017 = vrot.lane.b32.xlu1 %v641_v6, %s8304_s23  ;;  %v669_v43 = vshll.u32 %v6168_v39, 16  ;;  %v667_v44 = vshrl.u32 %v6168_v39, 16  ;;  %v674_v46 = vshll.u32 %v603_v42, 16  ;;  %v884_v51 = vrot.slane %v603_v42, 1 }
  0x35   : > { %v660_v22 = vor.u32 %v659_v18, %v655_v17  ;;  %v664_v23 = vrot.slane %v662_v19, 1  ;;  %v882_v41 = vsel %vm870_vm0, %v880_v36, %v881_v37  ;;  %v6192_v61 = vpack.c.b16 %v520_v60, %v519_v59 }
  0x36   : > { %836 = vrot.lane.b32.xlu2 %v641_v6, %s8308_s20  ;;  %v671_v45 = vrot.slane %v669_v43, 1  ;;  %v676_v48 = vrot.slane %v674_v46, 1  ;;  %v604_v63 = vpack.c.b16 %v586_v62, %v586_v62  ;;  %v432_v9 = vpack.c.bf16 %v372_v3, %v372_v3 }
  0x37   : > { %v665_v29 = vsel %vm617_vm1, %v660_v22, %v664_v23  ;;  %v681_v0 = vshll.u32 %v6192_v61, 16  ;;  %v679_v1 = vshrl.u32 %v6192_v61, 16  ;;  %v886_v6 = vrot.slane %v6192_v61, 1  ;;  %v1523_v23 = vld [vmem:[%s8293_s1 + $0x10] sm:$0x3] }
  0x38   : > { %1148 = vrot.lane.b32.xlu0 %v653_v12, %s8315_s24  ;;  %v672_v47 = vor.u32 %v671_v45, %v667_v44  ;;  %v686_v5 = vshll.u32 %v604_v63, 16  ;;  %v887_v7 = vrot.slane %v604_v63, 1  ;;  %v522_v16 = vunpack.c.l.b16 %v432_v9  ;;  %v376_v44 = vld [vmem:[%s6093_s27 + $0xb8] sm:$0x3]  ;;  %v5543_v45 = vld [vmem:[%s8293_s1 + $0x8] sm:$0xff] }
  0x39   : > { %v683_v4 = vrot.slane %v681_v0, 1  ;;  %v433_v17 = vpack.c.bf16 %v373_v10, %v373_v10  ;;  %v1533_v30 = vunpack.c.l.b16 %v1523_v23  ;;  %v435_v42 = vpack.c.bf16 %v375_v31, %v375_v31  ;;  %v378_v9 = vld [vmem:[%s6093_s27 + $0xc8] sm:$0xff] }
  0x3a   : > { %v677_v49 = vsel %vm617_vm1, %v672_v47, %v676_v48  ;;  %v888_v14 = vsel %vm870_vm0, %v886_v6, %v887_v7 }
  0x3b   : > { %v684_v11 = vor.u32 %v683_v4, %v679_v1  ;;  %v587_v20 = vunpack.c.l.b16 %v433_v17  ;;  %v1536_v35 = vpack.c.b16 %v1533_v30, %v1533_v30  ;;  %v524_v48 = vunpack.c.l.b16 %v435_v42 }
  0x3c   : > { %968 = vrot.lane.b32.xlu1 %v6110_v32, %s8302_s28 }
  0x3d   : > { %v605_v22 = vpack.c.b16 %v587_v20, %v587_v20  ;;  %v1578_v43 = vsel %vm8310_vm2, %v1536_v35, 0  ;;  %vm1904_vm2 = vsmask.f32 4368 }
  0x3e   : > { %1019 = vrot.lane.b32.xlu2 %v653_v12, %s8304_s23  ;;  %1585 = vmatpush.bf16.msra.mxu0 %v1578_v43  ;;  %vm6672_vm14 = vmor %vm1903_vm13, %vm1904_vm2 }
  0x3f   : > { %v698_v27 = vshll.u32 %v605_v22, 16  ;;  %v890_v53 = vrot.slane %v605_v22, 1 }
  0x40   : > { %927 = vrot.lane.b32.xlu0 %v876_v2, %s8313_s15  ;;  %v371_v2 = vld [vmem:[%s6093_s27 + $0x90] sm:$0xff] }
  0x41   : > { %v431_v8 = vpack.c.bf16 %v371_v2, %v371_v2 }
  0x42   : > { %1586 = vmatpush.bf16.msra.mxu0 %v5543_v45  ;;  %v380_v45 = vld [vmem:[%s6093_s27 + $0xd8] sm:$0xff] }
  0x43   : > { %v521_v15 = vunpack.c.l.b16 %v431_v8  ;;  %v377_v8 = vld [vmem:[%s6093_s27 + $0xc0] sm:$0xff] }
  0x44   : > { %1099 = vrot.lane.b32.xlu1 %v6149_v13, %s5975_s29 }
  0x45   : > { %v6211_v19 = vpack.c.b16 %v522_v16, %v521_v15  ;;  %v379_v15 = vld [vmem:[%s6093_s27 + $0xd0] sm:$0x3] }
  0x46   : > { %1150 = vrot.lane.b32.xlu2 %v665_v29, %s8315_s24  ;;  %v439_v17 = vpack.c.bf16 %v379_v15, %v379_v15 }
  0x47   : > { %v693_v21 = vshll.u32 %v6211_v19, 16  ;;  %v691_v25 = vshrl.u32 %v6211_v19, 16  ;;  %v889_v52 = vrot.slane %v6211_v19, 1 }
  0x48   : > { %1058 = vrot.lane.b32.xlu0 %v6132_v50, %s8317_s18 }
  0x49   : > { %v695_v26 = vrot.slane %v693_v21, 1  ;;  %v891_v56 = vsel %vm870_vm0, %v889_v52, %v890_v53 }
  0x4b   : > { %v696_v40 = vor.u32 %v695_v26, %v691_v25  ;;  %v589_v26 = vunpack.c.l.b16 %v439_v17 }
  0x4c   : > { %838 = vrot.lane.b32.xlu1 %v653_v12, %s8308_s20  ;;  %v688_v12 = vrot.slane %v686_v5, 1 }
  0x4e   : > { %929 = vrot.lane.b32.xlu2 %v6132_v50, %s8313_s15  ;;  %v883_v50 = vrot.slane %v6168_v39, 1  ;;  %v689_v18 = vsel %vm617_vm1, %v684_v11, %v688_v12  ;;  %v437_v11 = vpack.c.bf16 %v377_v8, %v377_v8  ;;  %v438_v12 = vpack.c.bf16 %v378_v9, %v378_v9 }
  0x50   : > { %1189 = vrot.lane.b32.xlu0 %v882_v41, %s8306_s16  ;;  %v885_v54 = vsel %vm870_vm0, %v883_v50, %v884_v51  ;;  %v5542_v51 = vld [vmem:[%s8293_s1] sm:$0xff]  ;;  %v526_v20 = vunpack.c.l.b16 %v438_v12 }
  0x51   : > { %1587 = vmatpush.bf16.msra.mxu0 %v5542_v51  ;;  %v440_v51 = vpack.c.bf16 %v380_v45, %v380_v45 }
  0x54   : > { %1021 = vrot.lane.b32.xlu1 %v665_v29, %s8304_s23 }
  0x56   : > { %1060 = vrot.lane.b32.xlu2 %v882_v41, %s8317_s18 }
  0x58   : > { %970 = vrot.lane.b32.xlu0 %v6149_v13, %s8302_s28 }
  0x5c   : > { %1152 = vrot.lane.b32.xlu1 %v677_v49, %s8315_s24 }
  0x5e   : > { %1191 = vrot.lane.b32.xlu2 %v885_v54, %s8306_s16 }
  0x60   : > { %1101 = vrot.lane.b32.xlu0 %v6168_v39, %s5975_s29 }
  0x64   : > { %931 = vrot.lane.b32.xlu1 %v882_v41, %s8313_s15  ;;  %v700_v41 = vrot.slane %v698_v27, 1 }
  0x66   : > { %972 = vrot.lane.b32.xlu2 %v6168_v39, %s8302_s28  ;;  %v6235_v46 = vsel %vm617_vm1, %v696_v40, %v700_v41 }
  0x68   : > { %840 = vrot.lane.b32.xlu0 %v665_v29, %s8308_s20  ;;  %v374_v29 = vld [vmem:[%s6093_s27 + $0xa8] sm:$0xff] }
  0x69   : > { %v434_v37 = vpack.c.bf16 %v374_v29, %v374_v29 }
  0x6b   : > { %v523_v47 = vunpack.c.l.b16 %v434_v37  ;;  %v607_v37 = vpack.c.b16 %v589_v26, %v589_v26 }
  0x6c   : > { %1062 = vrot.lane.b32.xlu1 %v885_v54, %s8317_s18 }
  0x6e   : > { %1103 = vrot.lane.b32.xlu2 %v6192_v61, %s5975_s29 }
  0x70   : > { %1023 = vrot.lane.b32.xlu0 %v677_v49, %s8304_s23 }
  0x74   : > { %1193 = vrot.lane.b32.xlu1 %v888_v14, %s8306_s16 }
  0x76   : > { %842 = vrot.lane.b32.xlu2 %v677_v49, %s8308_s20  ;;  %v436_v49 = vpack.c.bf16 %v376_v44, %v376_v44 }
  0x78   : > { %1154 = vrot.lane.b32.xlu0 %v689_v18, %s8315_s24  ;;  %v588_v55 = vunpack.c.l.b16 %v436_v49  ;;  %v896_v49 = vrot.slane %v607_v37, 1 }
  0x7a   : > { %v606_v57 = vpack.c.b16 %v588_v55, %v588_v55  ;;  %v382_v55 = vld [vmem:[%s6093_s27 + $0xe8] sm:$0x3] }
  0x7c   : > { %974 = vrot.lane.b32.xlu1 %v6192_v61, %s8302_s28  ;;  %v710_v63 = vshll.u32 %v606_v57, 16  ;;  %s8337_s28 = smov 16   ;;  %v893_v6 = vrot.slane %v606_v57, 1 }
  0x7e   : > { %1025 = vrot.lane.b32.xlu2 %v689_v18, %s8304_s23  ;;  %v712_v1 = vrot.slane %v710_v63, 1  ;;  %s8338_s23 = smov 12   ;;  %v527_v63 = vunpack.c.l.b16 %v440_v51 }
  0x80   : > { %933 = vrot.lane.b32.xlu0 %v885_v54, %s8313_s15  ;;  %v6225_v36 = vpop.permute.xlu2 %1097  ;;  %v6244_v54 = vpack.c.b16 %v524_v48, %v523_v47  ;;  %v722_v47 = vshll.u32 %v607_v37, 16  ;;  %v385_v37 = vld [vmem:[%s6093_s27 + $0x100] sm:$0x3] }
  0x82   : > { %v705_v58 = vshll.u32 %v6244_v54, 16  ;;  %v703_v60 = vshrl.u32 %v6244_v54, 16  ;;  %v892_v5 = vrot.slane %v6244_v54, 1  ;;  %v724_v57 = vrot.slane %v722_v47, 1 }
  0x84   : > { %1105 = vrot.lane.b32.xlu1 %v6211_v19, %s5975_s29  ;;  %v707_v62 = vrot.slane %v705_v58, 1  ;;  %v6270_v10 = vsel %vm870_vm0, %v892_v5, %v893_v6 }
  0x86   : > { %1156 = vrot.lane.b32.xlu2 %v6235_v46, %s8315_s24  ;;  %v708_v0 = vor.u32 %v707_v62, %v703_v60 }
  0x88   : > { %1064 = vrot.lane.b32.xlu0 %v888_v14, %s8317_s18  ;;  %v1057_v50 = vpop.permute.xlu2 %1056  ;;  %v6262_v4 = vsel %vm617_vm1, %v708_v0, %v712_v1  ;;  %v442_v1 = vpack.c.bf16 %v382_v55, %v382_v55 }
  0x8a   : > { %v590_v8 = vunpack.c.l.b16 %v442_v1 }
  0x8c   : > { %844 = vrot.lane.b32.xlu1 %v689_v18, %s8308_s20  ;;  %v525_v18 = vunpack.c.l.b16 %v437_v11 }
  0x8e   : > { %935 = vrot.lane.b32.xlu2 %v888_v14, %s8313_s15  ;;  %v6283_v25 = vpack.c.b16 %v526_v20, %v525_v18 }
  0x90   : > { %1195 = vrot.lane.b32.xlu0 %v891_v56, %s8306_s16  ;;  %v6251_v59 = vpop.permute.xlu2 %836  ;;  %v717_v40 = vshll.u32 %v6283_v25, 16  ;;  %v715_v44 = vshrl.u32 %v6283_v25, 16  ;;  %v895_v48 = vrot.slane %v6283_v25, 1 }
  0x91   : > { %v1227_v60 = vsel %vm1223_vm3, %v6104_v24, %v6251_v59 }
  0x92   : > { %v897_v58 = vsel %vm870_vm0, %v895_v48, %v896_v49 }
  0x94   : > { %1027 = vrot.lane.b32.xlu1 %v6235_v46, %s8337_s28 }
  0x96   : > { %v967_v2 = vpop.permute.xlu1 %966  ;;  %1066 = vrot.lane.b32.xlu2 %v891_v56, %s8317_s18 }
  0x98   : > { %976 = vrot.lane.b32.xlu0 %v6211_v19, %s8338_s23  ;;  %v6259_v3 = vpop.permute.xlu2 %1019 }
  0x9a   : > { %v926_v7 = vpop.permute.xlu0 %925 }
  0x9c   : > { %1158 = vrot.lane.b32.xlu1 %v6262_v4, %s8315_s24 }
  0x9e   : > { %v1188_v14 = vpop.permute.xlu1 %1187  ;;  %1197 = vrot.lane.b32.xlu2 %v6270_v10, %s8306_s16 }
  0xa0   : > { %1107 = vrot.lane.b32.xlu0 %v6244_v54, %s5975_s29  ;;  %v6277_v16 = vpop.permute.xlu2 %1150 }
  0xa2   : > { %v835_v21 = vpop.permute.xlu0 %834 }
  0xa3   : > { %v1225_v22 = vsel %vm1223_vm3, %v6106_v28, %v835_v21  ;;  %v383_v21 = vld [vmem:[%s6093_s27 + $0xf0] sm:$0xff] }
  0xa4   : > { %v1262_v23 = vsel %vm1260_vm4, %v1225_v22, %v926_v7  ;;  %937 = vrot.lane.b32.xlu1 %v891_v56, %s8313_s15  ;;  %v384_v22 = vld [vmem:[%s6093_s27 + $0xf8] sm:$0xff] }
  0xa5   : > { %v1299_v29 = vsel %vm1297_vm5, %v1262_v23, %v967_v2 }
  0xa6   : > { %v1018_v27 = vpop.permute.xlu1 %1017  ;;  %978 = vrot.lane.b32.xlu2 %v6244_v54, %s8338_s23 }
  0xa7   : > { %v1336_v28 = vsel %vm1334_vm6, %v1299_v29, %v1018_v27  ;;  %v443_v29 = vpack.c.bf16 %v383_v21, %v383_v21 }
  0xa8   : > { %v1373_v30 = vsel %vm1371_vm7, %v1336_v28, %v1057_v50  ;;  %846 = vrot.lane.b32.xlu0 %v6235_v46, %s8308_s20  ;;  %v6292_v31 = vpop.permute.xlu2 %929  ;;  %v381_v46 = vld [vmem:[%s6093_s27 + $0xe0] sm:$0xff]  ;;  %v444_v28 = vpack.c.bf16 %v384_v22, %v384_v22  ;;  %v388_v22 = vld [vmem:[%s6093_s27 + $0x118] sm:$0x3] }
  0xa9   : > { %v1410_v35 = vsel %vm1408_vm8, %v1373_v30, %v6225_v36  ;;  %v719_v36 = vrot.slane %v717_v40, 1  ;;  %v441_v52 = vpack.c.bf16 %v381_v46, %v381_v46 }
  0xaa   : > { %v1149_v41 = vpop.permute.xlu0 %1148 }
  0xab   : > { %v1447_v42 = vsel %vm8312_vm9, %v1410_v35, %v1149_v41  ;;  %v720_v56 = vor.u32 %v719_v36, %v715_v44  ;;  %v528_v0 = vunpack.c.l.b16 %v441_v52  ;;  %v529_v41 = vunpack.c.l.b16 %v443_v29 }
  0xac   : > { %v1484_v43 = vsel %vm1482_vm10, %v1447_v42, %v1188_v14  ;;  %1068 = vrot.lane.b32.xlu1 %v6270_v10, %s8317_s18  ;;  %v608_v14 = vpack.c.b16 %v590_v8, %v590_v8  ;;  %v530_v42 = vunpack.c.l.b16 %v444_v28 }
  0xad   : > { %5143 = vmatmul.msk.bf16.vlgmr.msra.gmra.mxu0 %vm1539_vm11, %v1484_v43  ;;  %v725_v5 = vsel %vm617_vm1, %v720_v56, %v724_v57  ;;  %v6322_v7 = vpack.c.b16 %v528_v0, %v527_v63  ;;  %v445_v43 = vpack.c.bf16 %v385_v37, %v385_v37 }
  0xae   : > { %v969_v50 = vpop.permute.xlu1 %968  ;;  %1109 = vrot.lane.b32.xlu2 %v6283_v25, %s5975_s29  ;;  %v734_v18 = vshll.u32 %v608_v14, 16  ;;  %v899_v36 = vrot.slane %v608_v14, 1  ;;  %v6359_v47 = vpack.c.b16 %v530_v42, %v529_v41  ;;  %v386_v14 = vld [vmem:[%s6093_s27 + $0x108] sm:$0xff] }
  0xaf   : > { %v729_v9 = vshll.u32 %v6322_v7, 16  ;;  %v898_v46 = vrot.slane %v6322_v7, 1  ;;  %v591_v48 = vunpack.c.l.b16 %v445_v43 }
  0xb0   : > { %1029 = vrot.lane.b32.xlu0 %v6262_v4, %s8337_s28  ;;  %v6310_v53 = vpop.permute.xlu2 %1060  ;;  %v736_v27 = vrot.slane %v734_v18, 1  ;;  %v741_v55 = vshll.u32 %v6359_v47, 16  ;;  %v446_v18 = vpack.c.bf16 %v386_v14, %v386_v14 }
  0xb1   : > { %v731_v17 = vrot.slane %v729_v9, 1  ;;  %v609_v52 = vpack.c.b16 %v591_v48, %v591_v48 }
  0xb2   : > { %v928_v62 = vpop.permute.xlu0 %927  ;;  %v531_v29 = vunpack.c.l.b16 %v446_v18 }
  0xb3   : > { %v1264_v2 = vsel %vm1260_vm4, %v1227_v60, %v928_v62  ;;  %v743_v62 = vrot.slane %v741_v55, 1  ;;  %v746_v63 = vshll.u32 %v609_v52, 16 }
  0xb4   : > { %1199 = vrot.lane.b32.xlu1 %v897_v58, %s8306_s16  ;;  %v1301_v24 = vsel %vm1297_vm5, %v1264_v2, %v969_v50 }
  0xb5   : > { %v1338_v12 = vsel %vm1334_vm6, %v1301_v24, %v6259_v3  ;;  %v748_v8 = vrot.slane %v746_v63, 1 }
  0xb6   : > { %v1100_v6 = vpop.permute.xlu1 %1099  ;;  %848 = vrot.lane.b32.xlu2 %v6262_v4, %s8308_s20  ;;  %v727_v4 = vshrl.u32 %v6322_v7, 16 }
  0xb8   : > { %1160 = vrot.lane.b32.xlu0 %v725_v5, %s8315_s24  ;;  %v1192_v59 = vpop.permute.xlu2 %1191  ;;  %v732_v26 = vor.u32 %v731_v17, %v727_v4 }
  0xba   : > { %v1059_v11 = vpop.permute.xlu0 %1058 }
  0xbb   : > { %v1375_v15 = vsel %vm1371_vm7, %v1338_v12, %v1059_v11  ;;  %v901_v11 = vrot.slane %v6359_v47, 1  ;;  %v902_v12 = vrot.slane %v609_v52, 1 }
  0xbc   : > { %980 = vrot.lane.b32.xlu1 %v6283_v25, %s8338_s23  ;;  %v1412_v23 = vsel %vm1408_vm8, %v1375_v15, %v1100_v6  ;;  %v387_v15 = vld [vmem:[%s6093_s27 + $0x110] sm:$0xff] }
  0xbd   : > { %v1449_v30 = vsel %vm8312_vm9, %v1412_v23, %v6277_v16  ;;  %v6397_v17 = vsel %vm870_vm0, %v901_v11, %v902_v12 }
  0xbe   : > { %v839_v20 = vpop.permute.xlu1 %838  ;;  %1031 = vrot.lane.b32.xlu2 %v725_v5, %s8337_s28 }
  0xbf   : > { %v1229_v16 = vsel %vm1223_vm3, %v6110_v32, %v839_v20  ;;  %v900_v32 = vsel %vm870_vm0, %v898_v46, %v899_v36  ;;  %v447_v20 = vpack.c.bf16 %v387_v15, %v387_v15 }
  0xc0   : > { %939 = vrot.lane.b32.xlu0 %v6270_v10, %s8313_s15  ;;  %v6339_v3 = vpop.permute.xlu2 %972  ;;  %v6349_v10 = vsel %vm617_vm1, %v732_v26, %v736_v27  ;;  %v1266_v50 = vsel %vm1260_vm4, %v1229_v16, %v6292_v31  ;;  %v739_v31 = vshrl.u32 %v6359_v47, 16  ;;  %v448_v27 = vpack.c.bf16 %v388_v22, %v388_v22 }
  0xc2   : > { %v1190_v35 = vpop.permute.xlu0 %1189  ;;  %v744_v6 = vor.u32 %v743_v62, %v739_v31  ;;  %v391_v62 = vld [vmem:[%s6093_s27 + $0x130] sm:$0x3] }
  0xc3   : > { %v1486_v40 = vsel %vm1482_vm10, %v1449_v30, %v1190_v35 }
  0xc4   : > { %5144 = vmatmul.msk.bf16.gmra.mxu0 %vm1539_vm11, %v1486_v40  ;;  %1111 = vrot.lane.b32.xlu1 %v6322_v7, %s5975_s29  ;;  %v6387_v9 = vsel %vm617_vm1, %v744_v6, %v748_v8  ;;  %v592_v40 = vunpack.c.l.b16 %v448_v27  ;;  %v451_v8 = vpack.c.bf16 %v391_v62, %v391_v62 }
  0xc6   : > { %v1022_v44 = vpop.permute.xlu1 %1021  ;;  %1162 = vrot.lane.b32.xlu2 %v6349_v10, %s8315_s24  ;;  %v593_v14 = vunpack.c.l.b16 %v451_v8 }
  0xc8   : > { %1070 = vrot.lane.b32.xlu0 %v897_v58, %s8317_s18  ;;  %v6356_v45 = vpop.permute.xlu2 %1103 }
  0xca   : > { %v971_v49 = vpop.permute.xlu0 %970 }
  0xcb   : > { %v1303_v51 = vsel %vm1297_vm5, %v1266_v50, %v971_v49  ;;  %v390_v50 = vld [vmem:[%s6093_s27 + $0x128] sm:$0xff] }
  0xcc   : > { %850 = vrot.lane.b32.xlu1 %v725_v5, %s8308_s20  ;;  %v1340_v57 = vsel %vm1334_vm6, %v1303_v51, %v1022_v44 }
  0xcd   : > { %v1377_v0 = vsel %vm1371_vm7, %v1340_v57, %v6310_v53  ;;  %v450_v57 = vpack.c.bf16 %v390_v50, %v390_v50 }
  0xce   : > { %v1153_v56 = vpop.permute.xlu1 %1152  ;;  %941 = vrot.lane.b32.xlu2 %v897_v58, %s8313_s15 }
  0xcf   : > { %v534_v6 = vunpack.c.l.b16 %v450_v57 }
  0xd0   : > { %1201 = vrot.lane.b32.xlu0 %v900_v32, %s8306_s16  ;;  %v6370_v60 = vpop.permute.xlu2 %842 }
  0xd2   : > { %v1102_v1 = vpop.permute.xlu0 %1101 }
  0xd3   : > { %v1414_v2 = vsel %vm1408_vm8, %v1377_v0, %v1102_v1 }
  0xd4   : > { %v1451_v58 = vsel %vm8312_vm9, %v1414_v2, %v1153_v56  ;;  %1033 = vrot.lane.b32.xlu1 %v6349_v10, %s8337_s28  ;;  %v1233_v2 = vsel %vm1223_vm3, %v6168_v39, %v6370_v60 }
  0xd5   : > { %v1488_v5 = vsel %vm1482_vm10, %v1451_v58, %v1192_v59 }
  0xd6   : > { %5145 = vmatmul.msk.bf16.gmra.mxu0 %vm1539_vm11, %v1488_v5  ;;  %v932_v24 = vpop.permute.xlu1 %931  ;;  %1072 = vrot.lane.b32.xlu2 %v900_v32, %s8317_s18 }
  0xd8   : > { %982 = vrot.lane.b32.xlu0 %v6322_v7, %s8338_s23  ;;  %v6384_v53 = vpop.permute.xlu2 %1025 }
  0xda   : > { %v841_v59 = vpop.permute.xlu0 %840 }
  0xdb   : > { %v1231_v4 = vsel %vm1223_vm3, %v6149_v13, %v841_v59  ;;  %v532_v13 = vunpack.c.l.b16 %v447_v20  ;;  %v611_v20 = vpack.c.b16 %v593_v14, %v593_v14 }
  0xdc   : > { %1164 = vrot.lane.b32.xlu1 %v6387_v9, %s8315_s24  ;;  %v1268_v23 = vsel %vm1260_vm4, %v1231_v4, %v932_v24 }
  0xdd   : > { %v1305_v30 = vsel %vm1297_vm5, %v1268_v23, %v6339_v3  ;;  %v6411_v37 = vpack.c.b16 %v532_v13, %v531_v29  ;;  %v610_v3 = vpack.c.b16 %v592_v40, %v592_v40  ;;  %v770_v23 = vshll.u32 %v611_v20, 16  ;;  %v392_v29 = vld [vmem:[%s6093_s27 + $0x138] sm:$0xff]  ;;  %v393_v13 = vld [vmem:[%s6093_s27 + $0x140] sm:$0xff] }
  0xde   : > { %v1063_v21 = vpop.permute.xlu1 %1062  ;;  %1203 = vrot.lane.b32.xlu2 %v6397_v17, %s8306_s16  ;;  %v452_v40 = vpack.c.bf16 %v392_v29, %v392_v29 }
  0xdf   : > { %v753_v44 = vshll.u32 %v6411_v37, 16  ;;  %v751_v49 = vshrl.u32 %v6411_v37, 16  ;;  %v904_v52 = vrot.slane %v6411_v37, 1 }
  0xe0   : > { %1113 = vrot.lane.b32.xlu0 %v6359_v47, %s5975_s29  ;;  %v6405_v26 = vpop.permute.xlu2 %1156 }
  0xe1   : > { %v755_v51 = vrot.slane %v753_v44, 1  ;;  %v394_v44 = vld [vmem:[%s6093_s27 + $0x148] sm:$0x3] }
  0xe2   : > { %v1024_v28 = vpop.permute.xlu0 %1023 }
  0xe3   : > { %v1342_v35 = vsel %vm1334_vm6, %v1305_v30, %v1024_v28  ;;  %v756_v63 = vor.u32 %v755_v51, %v751_v49  ;;  %v908_v51 = vrot.slane %v611_v20, 1  ;;  %v395_v20 = vld [vmem:[%s6093_s27 + $0x150] sm:$0xff] }
  0xe4   : > { %943 = vrot.lane.b32.xlu1 %v900_v32, %s8313_s15  ;;  %v1379_v42 = vsel %vm1371_vm7, %v1342_v35, %v1063_v21  ;;  %v758_v32 = vshll.u32 %v610_v3, 16  ;;  %v772_v35 = vrot.slane %v770_v23, 1  ;;  %v455_v23 = vpack.c.bf16 %v395_v20, %v395_v20 }
  0xe5   : > { %v1416_v16 = vsel %vm1408_vm8, %v1379_v42, %v6356_v45  ;;  %v905_v45 = vrot.slane %v610_v3, 1 }
  0xe6   : > { %v1194_v41 = vpop.permute.xlu1 %1193  ;;  %984 = vrot.lane.b32.xlu2 %v6359_v47, %s8338_s23  ;;  %v760_v0 = vrot.slane %v758_v32, 1 }
  0xe7   : > { %v906_v1 = vsel %vm870_vm0, %v904_v52, %v905_v45 }
  0xe8   : > { %852 = vrot.lane.b32.xlu0 %v6349_v10, %s8308_s20  ;;  %v6418_v43 = vpop.permute.xlu2 %935  ;;  %v389_v10 = vld [vmem:[%s6093_s27 + $0x120] sm:$0xff]  ;;  %v761_v11 = vsel %vm617_vm1, %v756_v63, %v760_v0 }
  0xe9   : > { %v449_v56 = vpack.c.bf16 %v389_v10, %v389_v10 }
  0xea   : > { %v1155_v46 = vpop.permute.xlu0 %1154 }
  0xeb   : > { %v1453_v36 = vsel %vm8312_vm9, %v1416_v16, %v1155_v46  ;;  %v533_v5 = vunpack.c.l.b16 %v449_v56  ;;  %v535_v46 = vunpack.c.l.b16 %v452_v40  ;;  %v537_v40 = vunpack.c.l.b16 %v455_v23 }
  0xec   : > { %v1490_v48 = vsel %vm1482_vm10, %v1453_v36, %v1194_v41  ;;  %1074 = vrot.lane.b32.xlu1 %v6397_v17, %s8317_s18  ;;  %v453_v41 = vpack.c.bf16 %v393_v13, %v393_v13  ;;  %v397_v13 = vld [vmem:[%s6093_s27 + $0x160] sm:$0x3] }
  0xed   : > { %5146 = vmatmul.msk.bf16.gmra.mxu0 %vm1539_vm11, %v1490_v48  ;;  %v6448_v59 = vpack.c.b16 %v534_v6, %v533_v5  ;;  %v454_v48 = vpack.c.bf16 %v394_v44, %v394_v44 }
  0xee   : > { %v975_v55 = vpop.permute.xlu1 %974  ;;  %1115 = vrot.lane.b32.xlu2 %v6411_v37, %s5975_s29  ;;  %v536_v36 = vunpack.c.l.b16 %v453_v41 }
  0xef   : > { %v765_v15 = vshll.u32 %v6448_v59, 16  ;;  %v907_v50 = vrot.slane %v6448_v59, 1  ;;  %v594_v52 = vunpack.c.l.b16 %v454_v48 }
  0xf0   : > { %1035 = vrot.lane.b32.xlu0 %v6387_v9, %s8337_s28  ;;  %v6436_v31 = vpop.permute.xlu2 %1066  ;;  %v6485_v32 = vpack.c.b16 %v536_v36, %v535_v46 }
  0xf1   : > { %v767_v22 = vrot.slane %v765_v15, 1  ;;  %v612_v57 = vpack.c.b16 %v594_v52, %v594_v52 }
  0xf2   : > { %v934_v58 = vpop.permute.xlu0 %933  ;;  %v777_v62 = vshll.u32 %v6485_v32, 16 }
  0xf3   : > { %v1270_v24 = vsel %vm1260_vm4, %v1233_v2, %v934_v58  ;;  %v782_v5 = vshll.u32 %v612_v57, 16 }
  0xf4   : > { %1205 = vrot.lane.b32.xlu1 %v906_v1, %s8306_s16  ;;  %v1307_v39 = vsel %vm1297_vm5, %v1270_v24, %v975_v55  ;;  %v779_v58 = vrot.slane %v777_v62, 1 }
  0xf5   : > { %v1344_v18 = vsel %vm1334_vm6, %v1307_v39, %v6384_v53  ;;  %v784_v14 = vrot.slane %v782_v5, 1  ;;  %v400_v5 = vld [vmem:[%s6093_s27 + $0x178] sm:$0x3] }
  0xf6   : > { %v1106_v12 = vpop.permute.xlu1 %1105  ;;  %854 = vrot.lane.b32.xlu2 %v6387_v9, %s8308_s20  ;;  %v763_v9 = vshrl.u32 %v6448_v59, 16 }
  0xf8   : > { %1166 = vrot.lane.b32.xlu0 %v761_v11, %s8315_s24  ;;  %v1198_v60 = vpop.permute.xlu2 %1197  ;;  %v768_v30 = vor.u32 %v767_v22, %v763_v9 }
  0xfa   : > { %v1065_v4 = vpop.permute.xlu0 %1064 }
  0xfb   : > { %v1381_v21 = vsel %vm1371_vm7, %v1344_v18, %v1065_v4  ;;  %v910_v4 = vrot.slane %v6485_v32, 1  ;;  %v911_v18 = vrot.slane %v612_v57, 1 }
  0xfc   : > { %986 = vrot.lane.b32.xlu1 %v6411_v37, %s8338_s23  ;;  %v1418_v28 = vsel %vm1408_vm8, %v1381_v21, %v1106_v12  ;;  %v396_v21 = vld [vmem:[%s6093_s27 + $0x158] sm:$0xff] }
  0xfd   : > { %v1455_v42 = vsel %vm8312_vm9, %v1418_v28, %v6405_v26  ;;  %v6523_v22 = vsel %vm870_vm0, %v910_v4, %v911_v18  ;;  %v460_v4 = vpack.c.bf16 %v400_v5, %v400_v5 }
  0xfe   : > { %v845_v27 = vpop.permute.xlu1 %844  ;;  %1037 = vrot.lane.b32.xlu2 %v761_v11, %s8337_s28 }
  0xff   : > { %v1235_v26 = vsel %vm1223_vm3, %v6192_v61, %v845_v27  ;;  %v909_v61 = vsel %vm870_vm0, %v907_v50, %v908_v51  ;;  %v456_v27 = vpack.c.bf16 %v396_v21, %v396_v21 }
 0x100   : > { %945 = vrot.lane.b32.xlu0 %v6397_v17, %s8313_s15  ;;  %v6465_v53 = vpop.permute.xlu2 %978  ;;  %v6475_v17 = vsel %vm617_vm1, %v768_v30, %v772_v35  ;;  %v1272_v55 = vsel %vm1260_vm4, %v1235_v26, %v6418_v43  ;;  %v775_v43 = vshrl.u32 %v6485_v32, 16  ;;  %v457_v35 = vpack.c.bf16 %v397_v13, %v397_v13 }
 0x102   : > { %v1196_v3 = vpop.permute.xlu0 %1195  ;;  %v780_v12 = vor.u32 %v779_v58, %v775_v43 }
 0x103   : > { %v1492_v16 = vsel %vm1482_vm10, %v1455_v42, %v1196_v3 }
 0x104   : > { %5147 = vmatmul.msk.bf16.gmra.mxu0 %vm1539_vm11, %v1492_v16  ;;  %1117 = vrot.lane.b32.xlu1 %v6448_v59, %s5975_s29  ;;  %v6513_v15 = vsel %vm617_vm1, %v780_v12, %v784_v14  ;;  %v595_v16 = vunpack.c.l.b16 %v457_v35 }
 0x106   : > { %v1028_v49 = vpop.permute.xlu1 %1027  ;;  %1168 = vrot.lane.b32.xlu2 %v6475_v17, %s8315_s24 }
 0x108   : > { %1076 = vrot.lane.b32.xlu0 %v906_v1, %s8317_s18  ;;  %v6482_v10 = vpop.permute.xlu2 %1109 }
 0x10a   : > { %v977_v45 = vpop.permute.xlu0 %976 }
 0x10b   : > { %v1309_v56 = vsel %vm1297_vm5, %v1272_v55, %v977_v45  ;;  %v398_v55 = vld [vmem:[%s6093_s27 + $0x168] sm:$0xff] }
 0x10c   : > { %856 = vrot.lane.b32.xlu1 %v761_v11, %s8308_s20  ;;  %v1346_v0 = vsel %vm1334_vm6, %v1309_v56, %v1028_v49  ;;  %v399_v56 = vld [vmem:[%s6093_s27 + $0x170] sm:$0xff] }
 0x10d   : > { %v1383_v6 = vsel %vm1371_vm7, %v1346_v0, %v6436_v31  ;;  %v458_v0 = vpack.c.bf16 %v398_v55, %v398_v55  ;;  %v459_v43 = vpack.c.bf16 %v399_v56, %v399_v56 }
 0x10e   : > { %v1159_v63 = vpop.permute.xlu1 %1158  ;;  %947 = vrot.lane.b32.xlu2 %v906_v1, %s8313_s15 }
 0x10f   : > { %v539_v14 = vunpack.c.l.b16 %v458_v0 }
 0x110   : > { %1207 = vrot.lane.b32.xlu0 %v909_v61, %s8306_s16  ;;  %v6496_v2 = vpop.permute.xlu2 %848 }
 0x112   : > { %v1108_v8 = vpop.permute.xlu0 %1107 }
 0x113   : > { %v1420_v24 = vsel %vm1408_vm8, %v1383_v6, %v1108_v8 }
 0x114   : > { %v1457_v1 = vsel %vm8312_vm9, %v1420_v24, %v1159_v63  ;;  %1039 = vrot.lane.b32.xlu1 %v6475_v17, %s8337_s28 }
 0x115   : > { %v1494_v11 = vsel %vm1482_vm10, %v1457_v1, %v1198_v60  ;;  %v1239_v1 = vsel %vm1223_vm3, %v6244_v54, %v6496_v2  ;;  %v596_v2 = vunpack.c.l.b16 %v460_v4 }
 0x116   : > { %5148 = vmatmul.msk.bf16.gmra.mxu0 %vm1539_vm11, %v1494_v11  ;;  %v938_v39 = vpop.permute.xlu1 %937  ;;  %1078 = vrot.lane.b32.xlu2 %v909_v61, %s8317_s18 }
 0x117   : > { %v614_v13 = vpack.c.b16 %v596_v2, %v596_v2 }
 0x118   : > { %988 = vrot.lane.b32.xlu0 %v6448_v59, %s8338_s23  ;;  %v6510_v31 = vpop.permute.xlu2 %1031 }
 0x11a   : > { %v847_v60 = vpop.permute.xlu0 %846 }
 0x11b   : > { %v1237_v9 = vsel %vm1223_vm3, %v6211_v19, %v847_v60  ;;  %v538_v19 = vunpack.c.l.b16 %v456_v27 }
 0x11c   : > { %1170 = vrot.lane.b32.xlu1 %v6513_v15, %s8315_s24  ;;  %v1274_v28 = vsel %vm1260_vm4, %v1237_v9, %v938_v39  ;;  %v540_v39 = vunpack.c.l.b16 %v459_v43 }
 0x11d   : > { %v1311_v42 = vsel %vm1297_vm5, %v1274_v28, %v6465_v53  ;;  %v6537_v44 = vpack.c.b16 %v538_v19, %v537_v40  ;;  %v613_v53 = vpack.c.b16 %v595_v16, %v595_v16  ;;  %v806_v40 = vshll.u32 %v614_v13, 16  ;;  %v401_v19 = vld [vmem:[%s6093_s27 + $0x180] sm:$0xff] }
 0x11e   : > { %v1069_v29 = vpop.permute.xlu1 %1068  ;;  %1209 = vrot.lane.b32.xlu2 %v6523_v22, %s8306_s16  ;;  %v6579_v54 = vpack.c.b16 %v540_v39, %v539_v14  ;;  %v6608_v16 = vld [vmem:[%s8295_s3] ss:$0 sm:$0xff] }
 0x11f   : > { %v789_v49 = vshll.u32 %v6537_v44, 16  ;;  %v794_v57 = vshll.u32 %v613_v53, 16  ;;  %v914_v62 = vrot.slane %v613_v53, 1 }
 0x120   : > { %1119 = vrot.lane.b32.xlu0 %v6485_v32, %s5975_s29  ;;  %v6531_v30 = vpop.permute.xlu2 %1162  ;;  %v801_v23 = vshll.u32 %v6579_v54, 16  ;;  %v799_v28 = vshrl.u32 %v6579_v54, 16 }
 0x121   : > { %v796_v8 = vrot.slane %v794_v57, 1 }
 0x122   : > { %v1030_v41 = vpop.permute.xlu0 %1029  ;;  %v803_v35 = vrot.slane %v801_v23, 1 }
 0x123   : > { %v1348_v3 = vsel %vm1334_vm6, %v1311_v42, %v1030_v41  ;;  %v402_v41 = vld [vmem:[%s6093_s27 + $0x188] sm:$0xff]  ;;  %v6598_v42 = vld [vmem:[%s8294_s2] ss:$0 sm:$0xff] }
 0x124   : > { %949 = vrot.lane.b32.xlu1 %v909_v61, %s8313_s15  ;;  %v1385_v36 = vsel %vm1371_vm7, %v1348_v3, %v1069_v29  ;;  %v791_v61 = vrot.slane %v789_v49, 1  ;;  %v462_v53 = vpack.c.bf16 %v402_v41, %v402_v41 }
 0x125   : > { %v1422_v26 = vsel %vm1408_vm8, %v1385_v36, %v6482_v10  ;;  %v913_v10 = vrot.slane %v6537_v44, 1  ;;  %v461_v36 = vpack.c.bf16 %v401_v19, %v401_v19 }
 0x126   : > { %v1200_v46 = vpop.permute.xlu1 %1199  ;;  %990 = vrot.lane.b32.xlu2 %v6485_v32, %s8338_s23 }
 0x127   : > { %v6566_v24 = vsel %vm870_vm0, %v913_v10, %v914_v62  ;;  %v541_v56 = vunpack.c.l.b16 %v461_v36 }
 0x128   : > { %858 = vrot.lane.b32.xlu0 %v6475_v17, %s8308_s20  ;;  %v6544_v48 = vpop.permute.xlu2 %941  ;;  %v787_v17 = vshrl.u32 %v6537_v44, 16 }
 0x12a   : > { %v1589_v50 = vpop.f32.mrf.mxu0  ;;  %v1161_v51 = vpop.permute.xlu0 %1160  ;;  %v792_v6 = vor.u32 %v791_v61, %v787_v17  ;;  %v542_v61 = vunpack.c.l.b16 %v462_v53 }
 0x12b   : > { %v1459_v52 = vsel %vm8312_vm9, %v1422_v26, %v1161_v51  ;;  %v804_v26 = vor.u32 %v803_v35, %v799_v28  ;;  %v808_v50 = vrot.slane %v806_v40, 1  ;;  %v403_v51 = vld [vmem:[%s6093_s27 + $0x190] sm:$0x3] }
 0x12c   : > { %v1496_v45 = vsel %vm1482_vm10, %v1459_v52, %v1200_v46  ;;  %1080 = vrot.lane.b32.xlu1 %v6523_v22, %s8317_s18  ;;  %v6575_v60 = vsel %vm617_vm1, %v792_v6, %v796_v8  ;;  %v463_v57 = vpack.c.bf16 %v403_v51, %v403_v51  ;;  %v6630_v43 = vpack.c.b16 %v542_v61, %v541_v56 }
 0x12d   : > { %5149 = vmatmul.msk.bf16.gmra.mxu0 %vm1539_vm11, %v1496_v45  ;;  %v6622_v10 = vsel %vm617_vm1, %v804_v26, %v808_v50 }
 0x12e   : > { %v981_v63 = vpop.permute.xlu1 %980  ;;  %1121 = vrot.lane.b32.xlu2 %v6537_v44, %s5975_s29  ;;  %v597_v5 = vunpack.c.l.b16 %v463_v57  ;;  %v811_v19 = vshrl.u32 %v6630_v43, 16 }
 0x130   : > { %1041 = vrot.lane.b32.xlu0 %v6513_v15, %s8337_s28  ;;  %v6562_v58 = vpop.permute.xlu2 %1072  ;;  %v6642_v2 = vpack.c.b16 %v597_v5, %v597_v5 }
 0x132   : > { %v1591_v11 = vpop.f32.mrf.mxu0  ;;  %v940_v12 = vpop.permute.xlu0 %939 }
 0x133   : > { %v1276_v18 = vsel %vm1260_vm4, %v1239_v1, %v940_v12  ;;  %v916_v11 = vrot.slane %v6579_v54, 1  ;;  %v917_v12 = vrot.slane %v614_v13, 1 }
 0x134   : > { %1211 = vrot.lane.b32.xlu1 %v6566_v24, %s8306_s16  ;;  %v1313_v21 = vsel %vm1297_vm5, %v1276_v18, %v981_v63  ;;  %s8339_s16 = smov 4  }
 0x135   : > { %v1350_v29 = vsel %vm1334_vm6, %v1313_v21, %v6510_v31  ;;  %v813_v21 = vshll.u32 %v6630_v43, 16 }
 0x136   : > { %v1112_v20 = vpop.permute.xlu1 %1111  ;;  %860 = vrot.lane.b32.xlu2 %v6513_v15, %s8308_s20  ;;  %s8342_s20 = smov 32  }
 0x137   : > { %v815_v41 = vrot.slane %v813_v21, 1 }
 0x138   : > { %1172 = vrot.lane.b32.xlu0 %v6575_v60, %s8315_s24  ;;  %v6584_v9 = vpop.permute.xlu2 %1203 }
 0x13a   : > { %v1071_v27 = vpop.permute.xlu0 %1070 }
 0x13b   : > { %v1387_v15 = vsel %vm1371_vm7, %v1350_v29, %v1071_v27  ;;  %v6646_v29 = vsel %vm870_vm0, %v916_v11, %v917_v12 }
 0x13c   : > { %992 = vrot.lane.b32.xlu1 %v6537_v44, %s8338_s23  ;;  %v1424_v31 = vsel %vm1408_vm8, %v1387_v15, %v1112_v20 }
 0x13d   : > { %v1461_v52 = vsel %vm8312_vm9, %v1424_v31, %v6531_v30 }
 0x13e   : > { %v851_v3 = vpop.permute.xlu1 %850  ;;  %1043 = vrot.lane.b32.xlu2 %v6575_v60, %s8337_s28 }
 0x13f   : > { %v1241_v0 = vsel %vm1223_vm3, %v6283_v25, %v851_v3  ;;  %v818_v3 = vshll.u32 %v6642_v2, 16 }
 0x140   : > { %951 = vrot.lane.b32.xlu0 %v6523_v22, %s8313_s15  ;;  %v6610_v46 = vpop.permute.xlu2 %984  ;;  %v1278_v25 = vsel %vm1260_vm4, %v1241_v0, %v6544_v48  ;;  %v2230_v48 = vld [vmem:[#allocation2 + $0xc] sm:$0xf] }
 0x141   : > { %v1594_v49 = vpop.f32.mrf.mxu0 }
 0x142   : > { %v1685_v45 = vmul.f32 %v6598_v42, %v1594_v49  ;;  %v1202_v17 = vpop.permute.xlu0 %1201 }
 0x143   : > { %v1498_v22 = vsel %vm1482_vm10, %v1461_v52, %v1202_v17  ;;  %v816_v17 = vor.u32 %v815_v41, %v811_v19 }
 0x144   : > { %v1725_v55 = vadd.f32 %v6608_v16, %v1685_v45  ;;  %5150 = vmatmul.msk.bf16.gmra.mxu0 %vm1539_vm11, %v1498_v22  ;;  %1123 = vrot.lane.b32.xlu1 %v6579_v54, %s5975_s29  ;;  %v820_v22 = vrot.slane %v818_v3, 1 }
 0x146   : > { %vm1761_vm12 = vcmp.ge.f32.partialorder %v1725_v55, 0.0  ;;  %v1797_v30 = vmul.f32 0.3, %v1725_v55  ;;  %v1034_v62 = vpop.permute.xlu1 %1033  ;;  %1174 = vrot.lane.b32.xlu2 %v6622_v10, %s8315_s24  ;;  %v6693_v12 = vsel %vm617_vm1, %v816_v17, %v820_v22  ;;  %v5567_v17 = vld [vmem:[%s8296_s4 + $0x28] sm:$0xff] }
 0x148   : > { %v1833_v63 = vsel %vm1761_vm12, %v1725_v55, %v1797_v30  ;;  %1082 = vrot.lane.b32.xlu0 %v6566_v24, %s8317_s18  ;;  %v6632_v6 = vpop.permute.xlu2 %1115  ;;  %v2236_v30 = vld [vmem:[#allocation2 + $0x14] sm:$0x1] }
 0x149   : > { %v1869_v8 = vpack.c.bf16 %v1833_v63, %v1833_v63  ;;  %v1596_v1 = vpop.f32.mrf.mxu0 }
 0x14a   : > { %v1686_v14 = vmul.f32 %v6598_v42, %v1596_v1  ;;  %v983_v39 = vpop.permute.xlu0 %982  ;;  %v404_v1 = vld [vmem:[%s6093_s27 + $0x198] sm:$0xff] }
 0x14b   : > { %v1907_v4 = vshrl.u32 %v1869_v8, 16  ;;  %v1315_v20 = vsel %vm1297_vm5, %v1278_v25, %v983_v39  ;;  %v1910_v27 = vshll.u32 %v1869_v8, 16  ;;  %v5569_v39 = vld [vmem:[%s8296_s4 + $0x38] sm:$0xff] }
 0x14c   : > { %v1726_v18 = vadd.f32 %v6608_v16, %v1686_v14  ;;  %862 = vrot.lane.b32.xlu1 %v6575_v60, %s8339_s16  ;;  %v1352_v35 = vsel %vm1334_vm6, %v1315_v20, %v1034_v62  ;;  %v920_v20 = vrot.slane %v6642_v2, 1  ;;  %5730 = vmatpush.bf16.msra.mxu1 %v5569_v39  ;;  %v5568_v2 = vld [vmem:[%s8296_s4 + $0x30] sm:$0xff] }
 0x14d   : > { %v1909_v23 = vrot.slane %v1907_v4, 7  ;;  %3650 = vmatpush.bf16.msrb.mxu0 %v5569_v39  ;;  %v5566_v39 = vld [vmem:[%s8296_s4 + $0x20] sm:$0xff] }
 0x14e   : > { %vm1762_vm12 = vcmp.ge.f32.partialorder %v1726_v18, 0.0  ;;  %v1798_v15 = vmul.f32 0.3, %v1726_v18  ;;  %v1165_v28 = vpop.permute.xlu1 %1164  ;;  %953 = vrot.lane.b32.xlu2 %v6566_v24, %s8313_s15  ;;  %v1389_v24 = vsel %vm1371_vm7, %v1352_v35, %v6562_v58  ;;  %v5611_v58 = vld [vmem:[%s8296_s4 + $0x188] sm:$0xff] }
 0x14f   : > { %v1912_v60 = vor.u32 %v1910_v27, %v1909_v23  ;;  %v1913_v0 = vrot.slane %v1909_v23, 4  ;;  %v406_v27 = vld [vmem:[%s6093_s27 + $0x1a8] sm:$0x3] }
 0x150   : > { %v1834_v40 = vsel %vm1762_vm12, %v1726_v18, %v1798_v15  ;;  %1213 = vrot.lane.b32.xlu0 %v6646_v29, %s8342_s20  ;;  %v6660_v31 = vpop.permute.xlu2 %854  ;;  %vm2234_vm12 = vcmask 1040384   ;;  %v919_v18 = vrot.slane %v6630_v43, 1  ;;  %v466_v41 = vpack.c.bf16 %v406_v27, %v406_v27  ;;  %5731 = vmatpush.bf16.msra.mxu1 %v5568_v2  ;;  %v2243_v27 = vld [vmem:[#allocation2 + $0x20] sm:$0x1] }
 0x151   : > { %v2231_v36 = vsel %vm6649_vm15, %v1912_v60, %v2230_v48  ;;  %v1870_v53 = vpack.c.bf16 %v1834_v40, %v1834_v40  ;;  %v464_v48 = vpack.c.bf16 %v404_v1, %v404_v1  ;;  %3651 = vmatpush.bf16.msrb.mxu0 %v5568_v2 }
 0x152   : > { %2232 = vst [vmem:[#allocation2 + $0xc] sm:$0xf] %v2231_v36  ;;  %v1114_v49 = vpop.permute.xlu0 %1113  ;;  %v6714_v19 = vsel %vm870_vm0, %v919_v18, %v920_v20 }
 0x153   : > { %v1915_v26 = vshrl.u32 %v1870_v53, 16  ;;  %v1426_v50 = vsel %vm1408_vm8, %v1389_v24, %v1114_v49  ;;  %v1599_v51 = vpop.f32.mrf.mxu0  ;;  %v1918_v56 = vshll.u32 %v1870_v53, 16  ;;  %v543_v24 = vunpack.c.l.b16 %v464_v48 }
 0x154   : > { %v1463_v52 = vsel %vm8312_vm9, %v1426_v50, %v1165_v28  ;;  %v1687_v45 = vmul.f32 %v6598_v42, %v1599_v51  ;;  %1045 = vrot.lane.b32.xlu1 %v6622_v10, %s8337_s28  ;;  %vm6680_vm9 = vmand %vm2234_vm12, %vm1903_vm13  ;;  %v2239_v51 = vld [vmem:[#allocation2 + $0x18] sm:$0xf]  ;;  %5732 = vmatpush.bf16.msra.mxu1 %v5567_v17 }
 0x155   : > { %v1917_v55 = vrot.slane %v1915_v26, 7  ;;  %v1500_v61 = vsel %vm1482_vm10, %v1463_v52, %v6584_v9  ;;  %v405_v9 = vld [vmem:[%s6093_s27 + $0x1a0] sm:$0xff]  ;;  %3652 = vmatpush.bf16.msrb.mxu0 %v5567_v17 }
 0x156   : > { %v1727_v62 = vadd.f32 %v6608_v16, %v1687_v45  ;;  %5151 = vmatmul.msk.bf16.gmra.mxu0 %vm1539_vm11, %v1500_v61  ;;  %v944_v63 = vpop.permute.xlu1 %943  ;;  %1084 = vrot.lane.b32.xlu2 %v6646_v29, %s8317_s18  ;;  %v465_v15 = vpack.c.bf16 %v405_v9, %v405_v9  ;;  %v2372_v52 = vld [vmem:[#allocation2] sm:$0xf] }
 0x157   : > { %v1920_v5 = vor.u32 %v1918_v56, %v1917_v55  ;;  %v1922_v8 = vrot.slane %v1917_v55, 4 }
 0x158   : > { %vm1763_vm2 = vcmp.ge.f32.partialorder %v1727_v62, 0.0  ;;  %v1799_v11 = vmul.f32 0.3, %v1727_v62  ;;  %994 = vrot.lane.b32.xlu0 %v6579_v54, %s8338_s23  ;;  %v6695_v14 = vpop.permute.xlu2 %1037  ;;  %v544_v49 = vunpack.c.l.b16 %v465_v15  ;;  %5733 = vmatpush.bf16.msra.mxu1 %v5566_v39 }
 0x159   : > { %v1921_v4 = vsel %vm6672_vm14, %v1913_v0, %v1920_v5  ;;  %v2237_v25 = vsel %vm6680_vm9, %v1922_v8, %v2236_v30  ;;  %v2428_v61 = vld [vmem:[#allocation2 + $0xc] sm:$0x1]  ;;  %v598_v5 = vunpack.c.l.b16 %v466_v41  ;;  %3653 = vmatpush.bf16.msrb.mxu0 %v5566_v39  ;;  %v2376_v41 = vld [vmem:[#allocation2 + $0x8] sm:$0x1] }
 0x15a   : > { %2233 = vst [vmem:[#allocation2 + $0x10] sm:$0xf] %v1921_v4  ;;  %v1835_v21 = vsel %vm1763_vm2, %v1727_v62, %v1799_v11  ;;  %v853_v23 = vpop.permute.xlu0 %852  ;;  %v6732_v0 = vpack.c.b16 %v544_v49, %v543_v24  ;;  %vm8347_vm2 = vsmask.f32 7938 }
 0x15b   : > { %2238 = vst [vmem:[#allocation2 + $0x14] sm:$0x1] %v2237_v25  ;;  %v1871_v28 = vpack.c.bf16 %v1835_v21, %v1835_v21  ;;  %v1601_v60 = vpop.f32.mrf.mxu0  ;;  %v1243_v3 = vsel %vm1223_vm3, %v6322_v7, %v853_v23  ;;  %v6748_v20 = vpack.c.b16 %v598_v5, %v598_v5  ;;  %v5585_v23 = vld [vmem:[%s8296_s4 + $0xb8] sm:$0xff] }
 0x15c   : > { %v1688_v35 = vmul.f32 %v6598_v42, %v1601_v60  ;;  %1176 = vrot.lane.b32.xlu1 %v6693_v12, %s8315_s24  ;;  %v1280_v55 = vsel %vm1260_vm4, %v1243_v3, %v944_v63  ;;  %v825_v21 = vshll.u32 %v6732_v0, 16  ;;  %5746 = vmatpush.bf16.msra.mxu3 %v5585_v23  ;;  %v5632_v60 = vld [vmem:[%s8296_s4 + $0x230] sm:$0xff] }
 0x15d   : > { %v1924_v40 = vshrl.u32 %v1871_v28, 16  ;;  %v1927_v50 = vshll.u32 %v1871_v28, 16  ;;  %v1317_v63 = vsel %vm1297_vm5, %v1280_v55, %v6610_v46  ;;  %v5565_v28 = vld [vmem:[%s8296_s4 + $0x18] sm:$0xff]  ;;  %v830_v49 = vshll.u32 %v6748_v20, 16 }
 0x15e   : > { %v1728_v36 = vadd.f32 %v6608_v16, %v1688_v35  ;;  %v1075_v53 = vpop.permute.xlu1 %1074  ;;  %1215 = vrot.lane.b32.xlu2 %v6714_v19, %s8342_s20  ;;  %v827_v24 = vrot.slane %v825_v21, 1  ;;  %5734 = vmatpush.bf16.msra.mxu1 %v5565_v28  ;;  %v5563_v21 = vld [vmem:[%s8296_s4 + $0x8] sm:$0xff] }
 0x15f   : > { %v6721_v26 = vrot.slane %v1924_v40, 7  ;;  %3654 = vmatpush.bf16.msrb.mxu0 %v5565_v28  ;;  %v6831_v28 = vld [vmem:[%s8296_s4 + $0x68] sm:$0xff] }
 0x160   : > { %vm1764_vm13 = vcmp.ge.f32.partialorder %v1728_v36, 0.0  ;;  %v1800_v45 = vmul.f32 0.3, %v1728_v36  ;;  %1125 = vrot.lane.b32.xlu0 %v6630_v43, %s5975_s29  ;;  %v6725_v7 = vpop.permute.xlu2 %1168 }
 0x161   : > { %v1929_v22 = vor.u32 %v1927_v50, %v6721_v26  ;;  %v1930_v35 = vrot.slane %v6721_v26, 4 }
 0x162   : > { %v2408_v56 = vld [vmem:[#allocation2 + $0x14] sm:$0x1]  ;;  %v1836_v30 = vsel %vm1764_vm13, %v1728_v36, %v1800_v45  ;;  %v1036_v62 = vpop.permute.xlu0 %1035  ;;  %vm6766_vm13 = vmand %vm2234_vm12, %vm8347_vm2  ;;  %vm8350_vm12 = vcmask 228352  }
 0x163   : > { %v2429_v8 = vsel %vm6680_vm9, %v2408_v56, %v2428_v61  ;;  %v2240_v1 = vsel %vm6649_vm15, %v1929_v22, %v2239_v51  ;;  %v2373_v9 = vsel %vm6649_vm15, %v1929_v22, %v2372_v52  ;;  %v1872_v11 = vpack.c.bf16 %v1836_v30, %v1836_v30  ;;  %v2501_v50 = vld [vmem:[#allocation2 + $0x14] sm:$0x1]  ;;  %v408_v30 = vld [vmem:[%s6093_s27 + $0x1b8] sm:$0xff] }
 0x164   : > { %2430 = vst [vmem:[#allocation2 + $0xc] sm:$0x1] %v2429_v8  ;;  %955 = vrot.lane.b32.xlu1 %v6646_v29, %s8313_s15  ;;  %v1354_v25 = vsel %vm1334_vm6, %v1317_v63, %v1036_v62  ;;  %v5584_v22 = vld [vmem:[%s8296_s4 + $0xb0] sm:$0xff]  ;;  %v922_v61 = vrot.slane %v6732_v0, 1  ;;  %s8351_s15 = smov 28  }
 0x165   : > { %2241 = vst [vmem:[#allocation2 + $0x18] sm:$0xf] %v2240_v1  ;;  %v1932_v4 = vshrl.u32 %v1872_v11, 16  ;;  %v1935_v29 = vshll.u32 %v1872_v11, 16  ;;  %v1391_v48 = vsel %vm1371_vm7, %v1354_v25, %v1075_v53  ;;  %v823_v53 = vshrl.u32 %v6732_v0, 16  ;;  %v5564_v62 = vld [vmem:[%s8296_s4 + $0x10] sm:$0xff]  ;;  %5747 = vmatpush.bf16.msra.mxu3 %v5584_v22 }
 0x166   : > { %2374 = vst [vmem:[#allocation2] sm:$0xf] %v2373_v9  ;;  %v1206_v18 = vpop.permute.xlu1 %1205  ;;  %996 = vrot.lane.b32.xlu2 %v6630_v43, %s8338_s23  ;;  %v1428_v45 = vsel %vm1408_vm8, %v1391_v48, %v6632_v6  ;;  %v407_v6 = vld [vmem:[%s6093_s27 + $0x1b0] sm:$0xff]  ;;  %v923_v9 = vrot.slane %v6748_v20, 1  ;;  %v468_v25 = vpack.c.bf16 %v408_v30, %v408_v30  ;;  %5735 = vmatpush.bf16.msra.mxu1 %v5564_v62 }
 0x167   : > { %v1934_v46 = vrot.slane %v1932_v4, 7  ;;  %v6808_v11 = vld [vmem:[%s8296_s4 + $0x70] sm:$0xff]  ;;  %v467_v4 = vpack.c.bf16 %v407_v6, %v407_v6  ;;  %3655 = vmatpush.bf16.msrb.mxu0 %v5564_v62  ;;  %v828_v23 = vor.u32 %v827_v24, %v823_v53 }
 0x168   : > { %864 = vrot.lane.b32.xlu0 %v6622_v10, %s8339_s16  ;;  %v6759_v15 = vpop.permute.xlu2 %947  ;;  %v6774_v10 = vld [vmem:[%s8296_s4 + $0x78] sm:$0xff]  ;;  %v6826_v48 = vsel %vm870_vm0, %v922_v61, %v923_v9  ;;  %v964_v53 = vunpack.c.l.b16 %v468_v25  ;;  %v2246_v61 = vld [vmem:[#allocation2 + $0x24] sm:$0xf] }
 0x169   : > { %v1937_v2 = vor.u32 %v1935_v29, %v1934_v46  ;;  %v1939_v40 = vrot.slane %v1934_v46, 4  ;;  %5738 = vmatpush.bf16.msra.mxu2 %v6774_v10  ;;  %v409_v46 = vld [vmem:[%s6093_s27 + $0x1c0] sm:$0x3] }
 0x16a   : > { %v1604_v3 = vpop.f32.mrf.mxu0  ;;  %v1167_v36 = vpop.permute.xlu0 %1166  ;;  %5736 = vmatpush.bf16.msra.mxu1 %v5563_v21  ;;  %v469_v24 = vpack.c.bf16 %v409_v46, %v409_v46 }
 0x16b   : > { %v2480_v26 = vld [vmem:[#allocation2 + $0xc] sm:$0x1]  ;;  %v1938_v51 = vsel %vm6672_vm14, %v1930_v35, %v1937_v2  ;;  %v2244_v52 = vsel %vm6680_vm9, %v1939_v40, %v2243_v27  ;;  %v1689_v17 = vmul.f32 %v6598_v42, %v1604_v3  ;;  %v1465_v56 = vsel %vm8350_vm12, %v1428_v45, %v1167_v36  ;;  %3656 = vmatpush.bf16.msrb.mxu0 %v5563_v21 }
 0x16c   : > { %v2502_v55 = vsel %vm6766_vm13, %v2480_v26, %v2501_v50  ;;  %2242 = vst [vmem:[#allocation2 + $0x1c] sm:$0xf] %v1938_v51  ;;  %1086 = vrot.lane.b32.xlu1 %v6714_v19, %s8317_s18  ;;  %v2377_v5 = vsel %vm6680_vm9, %v1939_v40, %v2376_v41  ;;  %v1502_v1 = vsel %vm1482_vm10, %v1465_v56, %v1206_v18  ;;  %v5583_v18 = vld [vmem:[%s8296_s4 + $0xa8] sm:$0xff]  ;;  %v832_v27 = vrot.slane %v830_v49, 1  ;;  %v5582_v49 = vld [vmem:[%s8296_s4 + $0xa0] sm:$0xff] }
 0x16d   : > { %2503 = vst [vmem:[#allocation2 + $0x14] sm:$0x1] %v2502_v55  ;;  %v1729_v8 = vadd.f32 %v6608_v16, %v1689_v17  ;;  %5152 = vmatmul.msk.bf16.gmra.mxu0 %vm1539_vm11, %v1502_v1  ;;  %5739 = vmatpush.bf16.msra.mxu2 %v6808_v11  ;;  %v1245_v2 = vsel %vm1223_vm3, %v6359_v47, %v6660_v31  ;;  %v963_v36 = vunpack.c.l.b16 %v467_v4  ;;  %v5562_v47 = vld [vmem:[%s8296_s4] sm:$0xff]  ;;  %v2431_v50 = vld [vmem:[#allocation2 + $0x18] sm:$0x1] }
 0x16e   : > { %2245 = vst [vmem:[#allocation2 + $0x20] sm:$0x1] %v2244_v52  ;;  %v987_v63 = vpop.permute.xlu1 %986  ;;  %1127 = vrot.lane.b32.xlu2 %v6732_v0, %s5975_s29  ;;  %5748 = vmatpush.bf16.msra.mxu3 %v5583_v18  ;;  %v6849_v45 = vsel %vm617_vm1, %v828_v23, %v832_v27  ;;  %v6854_v17 = vld [vmem:[%s8296_s4 + $0x60] sm:$0xff]  ;;  %v5581_v4 = vld [vmem:[%s8296_s4 + $0x98] sm:$0xff] }
 0x16f   : > { %2375 = vst [vmem:[#allocation2 + $0x4] sm:$0xf] %v1938_v51  ;;  %vm1765_vm2 = vcmp.ge.f32.partialorder %v1729_v8, 0.0  ;;  %v1801_v39 = vmul.f32 0.3, %v1729_v8  ;;  %5737 = vmatpush.bf16.msra.mxu1 %v5562_v47  ;;  %3657 = vmatpush.bf16.msrb.mxu0 %v5562_v47  ;;  %v6879_v18 = vld [vmem:[%s8296_s4 + $0x58] sm:$0xff] }
 0x170   : > { %2378 = vst [vmem:[#allocation2 + $0x8] sm:$0x1] %v2377_v5  ;;  %1047 = vrot.lane.b32.xlu0 %v6693_v12, %s8337_s28  ;;  %v6819_v20 = vpop.permute.xlu2 %1078  ;;  %v2425_v62 = vld [vmem:[#allocation2] sm:$0x1]  ;;  %v6862_v5 = vpack.c.b16 %v964_v53, %v963_v36  ;;  %v6902_v36 = vld [vmem:[%s8296_s4 + $0x50] sm:$0xff] }
 0x171   : > { %v1837_v29 = vsel %vm1765_vm2, %v1729_v8, %v1801_v39  ;;  %5740 = vmatpush.bf16.msra.mxu2 %v6831_v28  ;;  %v1003_v8 = vunpack.c.l.b16 %v469_v24  ;;  %v411_v53 = vld [vmem:[%s6093_s27 + $0x1d0] sm:$0xff]  ;;  %vm8353_vm2 = vcmask 228352  }
 0x172   : > { %v1873_v35 = vpack.c.bf16 %v1837_v29, %v1837_v29  ;;  %v1606_v40 = vpop.f32.mrf.mxu0  ;;  %v946_v41 = vpop.permute.xlu0 %945  ;;  %5749 = vmatpush.bf16.msra.mxu3 %v5582_v49 }
 0x173   : > { %v1690_v3 = vmul.f32 %v6598_v42, %v1606_v40  ;;  %v1282_v52 = vsel %vm1260_vm4, %v1245_v2, %v946_v41  ;;  %3739 = vmatpush.bf16.msra.mxu0 %v6774_v10  ;;  %v6887_v27 = vpack.c.b16 %v1003_v8, %v1003_v8  ;;  %v410_v40 = vld [vmem:[%s6093_s27 + $0x1c8] sm:$0xff]  ;;  %v1006_v41 = vshrl.u32 %v6862_v5, 16 }
 0x174   : > { %v1941_v26 = vshrl.u32 %v1873_v35, 16  ;;  %1217 = vrot.lane.b32.xlu1 %v6826_v48, %s8342_s20  ;;  %v1944_v56 = vshll.u32 %v1873_v35, 16  ;;  %v1319_v39 = vsel %vm1297_vm5, %v1282_v52, %v987_v63  ;;  %v1008_v63 = vshll.u32 %v6862_v5, 16  ;;  %v5580_v35 = vld [vmem:[%s8296_s4 + $0x90] sm:$0xff] }
 0x175   : > { %v2409_v31 = vld [vmem:[#allocation2 + $0x20] sm:$0x1]  ;;  %v1730_v51 = vadd.f32 %v6608_v16, %v1690_v3  ;;  %5741 = vmatpush.bf16.msra.mxu2 %v6854_v17  ;;  %v1356_v23 = vsel %vm1334_vm6, %v1319_v39, %v6695_v14  ;;  %v1013_v14 = vshll.u32 %v6887_v27, 16  ;;  %v470_v52 = vpack.c.bf16 %v410_v40, %v410_v40 }
 0x176   : > { %v2432_v22 = vsel %vm6680_vm9, %v2409_v31, %v2431_v50  ;;  %v6858_v55 = vrot.slane %v1941_v26, 7  ;;  %v1118_v6 = vpop.permute.xlu1 %1117  ;;  %866 = vrot.lane.b32.xlu2 %v6693_v12, %s8339_s16  ;;  %5750 = vmatpush.bf16.msra.mxu3 %v5581_v4  ;;  %v1010_v3 = vrot.slane %v1008_v63, 1  ;;  %v2504_v49 = vld [vmem:[#allocation2 + $0x20] sm:$0x1] }
 0x177   : > { %v2407_v30 = vld [vmem:[#allocation2 + $0x8] sm:$0x1]  ;;  %2433 = vst [vmem:[#allocation2 + $0x18] sm:$0x1] %v2432_v22  ;;  %vm1766_vm12 = vcmp.ge.f32.partialorder %v1730_v51, 0.0  ;;  %3740 = vmatpush.bf16.msra.mxu0 %v6808_v11  ;;  %v1015_v4 = vrot.slane %v1013_v14, 1 }
 0x178   : > { %v2426_v1 = vsel %vm6680_vm9, %v2407_v30, %v2425_v62  ;;  %v1946_v9 = vor.u32 %v1944_v56, %v6858_v55  ;;  %1178 = vrot.lane.b32.xlu0 %v6849_v45, %s8351_s15  ;;  %v6871_v12 = vpop.permute.xlu2 %1209  ;;  %v1802_v25 = vmul.f32 0.3, %v1730_v51  ;;  %v2498_v31 = vld [vmem:[#allocation2 + $0x8] sm:$0x1]  ;;  %v471_v62 = vpack.c.bf16 %v411_v53, %v411_v53  ;;  %v6951_v14 = vld [vmem:[%s8296_s4 + $0x40] sm:$0xff] }
 0x179   : > { %2427 = vst [vmem:[#allocation2] sm:$0x1] %v2426_v1  ;;  %5742 = vmatpush.bf16.msra.mxu2 %v6879_v18  ;;  %v5579_v11 = vld [vmem:[%s8296_s4 + $0x88] sm:$0xff]  ;;  %v1947_v8 = vrot.slane %v6858_v55, 4  ;;  %v1011_v39 = vor.u32 %v1010_v3, %v1006_v41 }
 0x17a   : > { %v2247_v21 = vsel %vm6649_vm15, %v1946_v9, %v2246_v61  ;;  %v1077_v46 = vpop.permute.xlu0 %1076  ;;  %v1838_v29 = vsel %vm1766_vm12, %v1730_v51, %v1802_v25  ;;  %5751 = vmatpush.bf16.msra.mxu3 %v5580_v35  ;;  %v2250_v1 = vld [vmem:[#allocation2 + $0x2c] sm:$0x1]  ;;  %v1094_v35 = vunpack.c.l.b16 %v470_v52  ;;  %v1095_v40 = vunpack.c.l.b16 %v471_v62 }
 0x17b   : > { %2248 = vst [vmem:[#allocation2 + $0x24] sm:$0xf] %v2247_v21  ;;  %v1874_v10 = vpack.c.bf16 %v1838_v29, %v1838_v29  ;;  %v1393_v2 = vsel %vm1371_vm7, %v1356_v23, %v1077_v46  ;;  %v6925_v25 = vld [vmem:[%s8296_s4 + $0x48] sm:$0xff]  ;;  %3741 = vmatpush.bf16.msra.mxu0 %v6831_v28  ;;  %v412_v29 = vld [vmem:[%s6093_s27 + $0x1d8] sm:$0x3]  ;;  %v5578_v28 = vld [vmem:[%s8296_s4 + $0x80] sm:$0xff]  ;;  %v6946_v41 = vsel %vm617_vm1, %v1011_v39, %v1015_v4 }
 0x17c   : > { %998 = vrot.lane.b32.xlu1 %v6732_v0, %s8338_s23  ;;  %v1430_v51 = vsel %vm1408_vm8, %v1393_v2, %v1118_v6  ;;  %v472_v3 = vpack.c.bf16 %v412_v29, %v412_v29  ;;  %v1054_v52 = vrot.slane %v6887_v27, 1 }
 0x17d   : > { %v1949_v26 = vshrl.u32 %v1874_v10, 16  ;;  %5743 = vmatpush.bf16.msra.mxu2 %v6902_v36  ;;  %v1952_v61 = vshll.u32 %v1874_v10, 16  ;;  %v1467_v21 = vsel %vm8353_vm2, %v1430_v51, %v6725_v7 }
 0x17e   : > { %v2481_v24 = vld [vmem:[#allocation2 + $0x18] sm:$0x1]  ;;  %v857_v47 = vpop.permute.xlu1 %856  ;;  %1049 = vrot.lane.b32.xlu2 %v6849_v45, %s8337_s28  ;;  %5752 = vmatpush.bf16.msra.mxu3 %v5579_v11  ;;  %v1053_v11 = vrot.slane %v6862_v5, 1 }
 0x17f   : > { %v2505_v50 = vsel %vm6766_vm13, %v2481_v24, %v2504_v49  ;;  %v1951_v56 = vrot.slane %v1949_v26, 7  ;;  %3742 = vmatpush.bf16.msra.mxu0 %v6854_v17  ;;  %v1247_v26 = vsel %vm1223_vm3, %v6411_v37, %v857_v47 }
 0x180   : > { %v2479_v22 = vld [vmem:[#allocation2] sm:$0x1]  ;;  %2506 = vst [vmem:[#allocation2 + $0x20] sm:$0x1] %v2505_v50  ;;  %957 = vrot.lane.b32.xlu0 %v6714_v19, %s8352_s25  ;;  %v6917_v30 = vpop.permute.xlu2 %990  ;;  %v1284_v47 = vsel %vm1260_vm4, %v1247_v26, %v6759_v15  ;;  %v1055_v39 = vsel %vm870_vm0, %v1053_v11, %v1054_v52 }
 0x181   : > { %v2499_v6 = vsel %vm6766_vm13, %v2479_v22, %v2498_v31  ;;  %v1609_v9 = vpop.f32.mrf.mxu0  ;;  %v1954_v19 = vor.u32 %v1952_v61, %v1951_v56  ;;  %v1956_v63 = vrot.slane %v1951_v56, 4  ;;  %5744 = vmatpush.bf16.msra.mxu2 %v6925_v25  ;;  %v6961_v31 = vpack.c.b16 %v1095_v40, %v1094_v35 }
 0x182   : > { %2500 = vst [vmem:[#allocation2 + $0x8] sm:$0x1] %v2499_v6  ;;  %v1691_v46 = vmul.f32 %v6598_v42, %v1609_v9  ;;  %v1208_v55 = vpop.permute.xlu0 %1207  ;;  %5753 = vmatpush.bf16.msra.mxu3 %v5578_v28  ;;  %v1134_v22 = vunpack.c.l.b16 %v472_v3 }
 0x183   : > { %v1504_v23 = vsel %vm1482_vm10, %v1467_v21, %v1208_v55  ;;  %v1955_v10 = vsel %vm6672_vm14, %v1947_v8, %v1954_v19  ;;  %v2251_v7 = vsel %vm6680_vm9, %v1956_v63, %v2250_v1  ;;  %3743 = vmatpush.bf16.msra.mxu0 %v6879_v18  ;;  %v1139_v8 = vshll.u32 %v6961_v31, 16  ;;  %v2434_v1 = vld [vmem:[#allocation2 + $0x24] sm:$0x1]  ;;  %v2253_v19 = vld [vmem:[#allocation2 + $0x30] sm:$0xf] }
 0x184   : > { %v1731_v2 = vadd.f32 %v6608_v16, %v1691_v46  ;;  %5153 = vmatmul.msk.bf16.gmra.mxu0 %vm1539_vm11, %v1504_v23  ;;  %1129 = vrot.lane.b32.xlu1 %v6862_v5, %s5975_s29  ;;  %2249 = vst [vmem:[#allocation2 + $0x28] sm:$0xf] %v1955_v10  ;;  %v6977_v4 = vpack.c.b16 %v1134_v22, %v1134_v22  ;;  %v1137_v29 = vshrl.u32 %v6961_v31, 16 }
 0x185   : > { %2252 = vst [vmem:[#allocation2 + $0x2c] sm:$0x1] %v2251_v7  ;;  %5745 = vmatpush.bf16.msra.mxu2 %v6951_v14 }
 0x186   : > { %vm1767_vm12 = vcmp.ge.f32.partialorder %v1731_v2, 0.0  ;;  %v1803_v53 = vmul.f32 0.3, %v1731_v2  ;;  %v1040_v24 = vpop.permute.xlu1 %1039  ;;  %1180 = vrot.lane.b32.xlu2 %v6946_v41, %s8351_s15  ;;  %v1144_v10 = vshll.u32 %v6977_v4, 16 }
 0x187   : > { %3744 = vmatpush.bf16.msra.mxu0 %v6902_v36  ;;  %v1141_v36 = vrot.slane %v1139_v8, 1 }
 0x188   : > { %v1839_v49 = vsel %vm1767_vm12, %v1731_v2, %v1803_v53  ;;  %1088 = vrot.lane.b32.xlu0 %v6826_v48, %s8354_s26  ;;  %v6963_v17 = vpop.permute.xlu2 %1121  ;;  %vm8355_vm12 = vcmask 228352  }
 0x189   : > { %v1875_v50 = vpack.c.bf16 %v1839_v49, %v1839_v49  ;;  %v1611_v51 = vpop.f32.mrf.mxu0  ;;  %v1142_v49 = vor.u32 %v1141_v36, %v1137_v29 }
 0x18a   : > { %v1692_v56 = vmul.f32 %v6598_v42, %v1611_v51  ;;  %v989_v61 = vpop.permute.xlu0 %988 }
 0x18b   : > { %v1958_v37 = vshrl.u32 %v1875_v50, 16  ;;  %v1321_v6 = vsel %vm1297_vm5, %v1284_v47, %v989_v61  ;;  %v1961_v18 = vshll.u32 %v1875_v50, 16  ;;  %3745 = vmatpush.bf16.msra.mxu0 %v6925_v25  ;;  %v2257_v25 = vld [vmem:[#allocation2 + $0x38] sm:$0x1] }
 0x18c   : > { %v1732_v62 = vadd.f32 %v6608_v16, %v1692_v56  ;;  %868 = vrot.lane.b32.xlu1 %v6849_v45, %s8339_s16  ;;  %v2410_v27 = vld [vmem:[#allocation2 + $0x2c] sm:$0x1]  ;;  %v1358_v46 = vsel %vm1334_vm6, %v1321_v6, %v1040_v24 }
 0x18d   : > { %v1960_v9 = vrot.slane %v1958_v37, 7  ;;  %v2435_v15 = vsel %vm6680_vm9, %v2410_v27, %v2434_v1  ;;  %v2507_v52 = vld [vmem:[#allocation2 + $0x2c] sm:$0x1] }
 0x18e   : > { %vm1768_vm2 = vcmp.ge.f32.partialorder %v1732_v62, 0.0  ;;  %v1804_v63 = vmul.f32 0.3, %v1732_v62  ;;  %v1171_v21 = vpop.permute.xlu1 %1170  ;;  %959 = vrot.lane.b32.xlu2 %v6826_v48, %s8352_s25  ;;  %2436 = vst [vmem:[#allocation2 + $0x24] sm:$0x1] %v2435_v15  ;;  %v1395_v48 = vsel %vm1371_vm7, %v1358_v46, %v6819_v20  ;;  %v1146_v20 = vrot.slane %v1144_v10, 1 }
 0x18f   : > { %v1963_v45 = vor.u32 %v1961_v18, %v1960_v9  ;;  %3746 = vmatpush.bf16.msra.mxu0 %v6951_v14  ;;  %v1964_v37 = vrot.slane %v1960_v9, 4  ;;  %v1184_v15 = vrot.slane %v6961_v31, 1  ;;  %v2260_v10 = vld [vmem:[#allocation2 + $0x3c] sm:$0xf] }
 0x190   : > { %v1840_v55 = vsel %vm1768_vm2, %v1732_v62, %v1804_v63  ;;  %1219 = vrot.lane.b32.xlu0 %v1055_v39, %s8342_s20  ;;  %v6987_v23 = vpop.permute.xlu2 %860  ;;  %v1147_v8 = vsel %vm617_vm1, %v1142_v49, %v1146_v20 }
 0x191   : > { %v2254_v35 = vsel %vm6649_vm15, %v1963_v45, %v2253_v19  ;;  %v1876_v28 = vpack.c.bf16 %v1840_v55, %v1840_v55  ;;  %v1185_v19 = vrot.slane %v6977_v4, 1 }
 0x192   : > { %2255 = vst [vmem:[#allocation2 + $0x30] sm:$0xf] %v2254_v35  ;;  %v1120_v7 = vpop.permute.xlu0 %1119 }
 0x193   : > { %v1966_v2 = vshrl.u32 %v1876_v28, 16  ;;  %v1432_v40 = vsel %vm1408_vm8, %v1395_v48, %v1120_v7  ;;  %v1614_v3 = vpop.f32.mrf.mxu0  ;;  %v1969_v50 = vshll.u32 %v1876_v28, 16  ;;  %v1186_v29 = vsel %vm870_vm0, %v1184_v15, %v1185_v19 }
 0x194   : > { %v1469_v53 = vsel %vm8355_vm12, %v1432_v40, %v1171_v21  ;;  %v1693_v24 = vmul.f32 %v6598_v42, %v1614_v3  ;;  %1051 = vrot.lane.b32.xlu1 %v6946_v41, %s8337_s28 }
 0x195   : > { %v1968_v26 = vrot.slane %v1966_v2, 7  ;;  %v1506_v51 = vsel %vm1482_vm10, %v1469_v53, %v6871_v12  ;;  %v2482_v11 = vld [vmem:[#allocation2 + $0x24] sm:$0x1] }
 0x196   : > { %v1733_v22 = vadd.f32 %v6608_v16, %v1693_v24  ;;  %5154 = vmatmul.msk.bf16.gmra.mxu0 %vm1539_vm11, %v1506_v51  ;;  %v7005_v56 = vld [vmem:[#allocation2 + $0x24] sm:$0xff]  ;;  %v950_v61 = vpop.permute.xlu1 %949  ;;  %1090 = vrot.lane.b32.xlu2 %v1055_v39, %s8354_s26  ;;  %v2508_v41 = vsel %vm6766_vm13, %v2482_v11, %v2507_v52  ;;  %s5634_s26 = sshll.u32 %s5964_s12, 7 }
 0x197   : > { %v1971_v47 = vor.u32 %v1969_v50, %v1968_v26  ;;  %v1973_v12 = vrot.slane %v1968_v26, 4  ;;  %2509 = vst [vmem:[#allocation2 + $0x2c] sm:$0x1] %v2508_v41  ;;  %3673 = vmatmul.bf16.vlgmr.msra.gmra.mxu1 %v7005_v56  ;;  %v2789_v55 = vshll.u32 %v7005_v56, 16  ;;  %v2967_v49 = vrot.slane %v7005_v56, 1  ;;  %s5051_s25 = scalar_lea.hbm %s8301_s9, %s5634_s26 }
 0x198   : > { %vm1769_vm2 = vcmp.ge.f32.partialorder %v1733_v22, 0.0  ;;  %v1805_v14 = vmul.f32 0.3, %v1733_v22  ;;  %1000 = vrot.lane.b32.xlu0 %v6862_v5, %s8338_s23  ;;  %v7018_v9 = vpop.permute.xlu2 %1043  ;;  %v2787_v52 = vshrl.u32 %v7005_v56, 16  ;;  %s342_s23 = sand.u32 1, %s5956_s10   ;;  %s5054_s18 = sshll.u32 %s5051_s25, 4  ;;  %s5055_s18 = int_to_ptr.hbm [resolvable:$true] %s5054_s18 }
 0x199   : > { %v1972_v62 = vsel %vm6672_vm14, %v1964_v37, %v1971_v47  ;;  %v2258_v6 = vsel %vm6680_vm9, %v1973_v12, %v2257_v25  ;;  %v2437_v40 = vld [vmem:[#allocation2 + $0x30] sm:$0x1]  ;;  %v2791_v26 = vrot.slane %v2789_v55, 1  ;;  %s5038_s24 = scalar_lea.sflag [#allocation4], %s342_s23 }
 0x19a   : > { %2256 = vst [vmem:[#allocation2 + $0x34] sm:$0xf] %v1972_v62  ;;  %v1841_v27 = vsel %vm1769_vm2, %v1733_v22, %v1805_v14  ;;  %v859_v1 = vpop.permute.xlu0 %858  ;;  %vm8357_vm2 = vcmask 228352  }
 0x19b   : > { %2259 = vst [vmem:[#allocation2 + $0x38] sm:$0x1] %v2258_v6  ;;  %v1877_v18 = vpack.c.bf16 %v1841_v27, %v1841_v27  ;;  %v1616_v39 = vpop.f32.mrf.mxu0  ;;  %v1249_v21 = vsel %vm1223_vm3, %v6448_v59, %v859_v1  ;;  %v2792_v47 = vor.u32 %v2791_v26, %v2787_v52 }
 0x19c   : > { %v1694_v5 = vmul.f32 %v6598_v42, %v1616_v39  ;;  %1182 = vrot.lane.b32.xlu1 %v1147_v8, %s8351_s15  ;;  %v1286_v48 = vsel %vm1260_vm4, %v1249_v21, %v950_v61  ;;  %v2264_v8 = vld [vmem:[#allocation2 + $0x44] sm:$0x1] }
 0x19d   : > { %v1975_v63 = vshrl.u32 %v1877_v18, 16  ;;  %v1978_v35 = vshll.u32 %v1877_v18, 16 }
 0x19e   : > { %v1734_v45 = vadd.f32 %v6608_v16, %v1694_v5  ;;  %v1081_v46 = vpop.permute.xlu1 %1080  ;;  %v2563_v28 = vld [vmem:[#allocation2 + $0x2c] sm:$0x1]  ;;  %1221 = vrot.lane.b32.xlu2 %v1186_v29, %s8342_s20  ;;  %s5133_s20 = sshll.u32 %s342_s23, 7 }
 0x19f   : > { %v1977_v36 = vrot.slane %v1975_v63, 7  ;;  %v2721_v59 = vunpack.c.l.b16 %v2563_v28  ;;  %s8036_s15 = scalar_lea.vmem [#allocation3], %s5133_s20 }
 0x1a0   : > { %vm1770_vm12 = vcmp.ge.f32.partialorder %v1734_v45, 0.0  ;;  %v1806_v4 = vmul.f32 0.3, %v1734_v45  ;;  %1131 = vrot.lane.b32.xlu0 %v6961_v31, %s5975_s29  ;;  %v1323_v31 = vsel %vm1297_vm5, %v1286_v48, %v6917_v30  ;;  %v7042_v61 = vpop.permute.xlu2 %1174  ;;  %s5052_s12 = sshll.u32 %s8036_s15, 4  ;;  %s5908_s29 = sshra.s32 %s5055_s18, 4  ;;  %s5053_s12 = int_to_ptr.vmem [resolvable:$true] %s5052_s12  ;;  %s5909_s29 = int_to_ptr.hbm [resolvable:$true] %s5908_s29 }
 0x1a1   : > { %v1980_v7 = vor.u32 %v1978_v35, %v1977_v36  ;;  %v2737_v24 = vpack.c.b16 %v2721_v59, %v2721_v59  ;;  %v1981_v27 = vrot.slane %v1977_v36, 4  ;;  %v1251_v59 = vsel %vm1223_vm3, %v6485_v32, %v6987_v23  ;;  %s5910_s28 = scalar_lea.hbm %s5909_s29, 128  ;;  %p5915_p1 = scmp.lt.s32.totalorder %s5909_s29, %s8301_s9 }
 0x1a2   : > { %v2411_v2 = vld [vmem:[#allocation2 + $0x38] sm:$0x1]  ;;  %v1842_v3 = vsel %vm1770_vm12, %v1734_v45, %v1806_v4  ;;  %v1042_v53 = vpop.permute.xlu0 %1041  ;;  %p5911_p12 = scmp.ne.s32.totalorder %s5909_s29, %s5910_s28 }
 0x1a3   : > { %v2438_v50 = vsel %vm6680_vm9, %v2411_v2, %v2437_v40  ;;  %v2261_v25 = vsel %vm6649_vm15, %v1980_v7, %v2260_v10  ;;  %v1878_v51 = vpack.c.bf16 %v1842_v3, %v1842_v3  ;;  %v1360_v20 = vsel %vm1334_vm6, %v1323_v31, %v1042_v53  ;;  %v2510_v63 = vld [vmem:[#allocation2 + $0x38] sm:$0x1] }
 0x1a4   : > { %2439 = vst [vmem:[#allocation2 + $0x30] sm:$0x1] %v2438_v50  ;;  %v2968_v11 = vrot.slane %v2737_v24, 1  ;;  %v2794_v22 = vshll.u32 %v2737_v24, 16  ;;  %v1397_v30 = vsel %vm1371_vm7, %v1360_v20, %v1081_v46  ;;  %v7080_v50 = vld [vmem:[%s8295_s3] ss:$0 sm:$0xff]  ;;  %p5912_p13 = pnand %p5911_p12, %p6073_p4 }
 0x1a5   : > { %2262 = vst [vmem:[#allocation2 + $0x3c] sm:$0xf] %v2261_v25  ;;  %v1983_v41 = vshrl.u32 %v1878_v51, 16  ;;  %v1986_v6 = vshll.u32 %v1878_v51, 16  ;;  %v1434_v39 = vsel %vm1408_vm8, %v1397_v30, %v6963_v17 }
 0x1a6   : > { %v7045_v37 = vsel %vm870_vm0, %v2967_v49, %v2968_v11  ;;  %v2796_v12 = vrot.slane %v2794_v22, 1  ;;  %v1212_v14 = vpop.permute.xlu1 %1211  ;;  %v2267_v11 = vld [vmem:[#allocation2 + $0x48] sm:$0xf]  ;;  %p5913_p0 = pneg %p5912_p13 }
 0x1a7   : > { %8356 = vst [vmem:[#allocation8_spill] sm:$0xff] %v7045_v37  ;;  %v1985_v62 = vrot.slane %v1983_v41, 7  ;;  %3851 = vmatmul.bf16.vlgmr.msra.gmra.mxu3 %v7045_v37 }
 0x1a8   : > { %v7050_v56 = vsel %vm617_vm1, %v2792_v47, %v2796_v12  ;;  %v7066_v10 = vpop.permute.xlu2 %953 }
 0x1a9   : > { %v1988_v1 = vor.u32 %v1986_v6, %v1985_v62  ;;  %v1990_v18 = vrot.slane %v1985_v62, 4  ;;  %3762 = vmatmul.bf16.vlgmr.msra.gmra.mxu2 %v7050_v56 }
 0x1aa   : > { %v1619_v15 = vpop.f32.mrf.mxu0  ;;  %v1173_v5 = vpop.permute.xlu0 %1172 }
 0x1ab   : > { %v2483_v19 = vld [vmem:[#allocation2 + $0x30] sm:$0x1]  ;;  %v1989_v21 = vsel %vm6672_vm14, %v1981_v27, %v1988_v1  ;;  %v2265_v45 = vsel %vm6680_vm9, %v1990_v18, %v2264_v8  ;;  %v1695_v46 = vmul.f32 %v6598_v42, %v1619_v15  ;;  %v1471_v55 = vsel %vm8357_vm2, %v1434_v39, %v1173_v5 }
 0x1ac   : > { %v5548_v29 = vld [vmem:[#allocation2 + $0x30] sm:$0xff]  ;;  %v2511_v36 = vsel %vm6766_vm13, %v2483_v19, %v2510_v63  ;;  %2263 = vst [vmem:[#allocation2 + $0x40] sm:$0xf] %v1989_v21  ;;  %v1508_v17 = vsel %vm1482_vm10, %v1471_v55, %v1212_v14  ;;  %v2440_v26 = vld [vmem:[#allocation2 + $0x3c] sm:$0x1] }
 0x1ad   : > { %2512 = vst [vmem:[#allocation2 + $0x38] sm:$0x1] %v2511_v36  ;;  %v1735_v35 = vadd.f32 %v6608_v16, %v1695_v46  ;;  %5155 = vmatmul.msk.bf16.gmra.mxu0 %vm1539_vm11, %v1508_v17  ;;  %3678 = vmatmul.bf16.gmra.mxu1 %v5548_v29  ;;  %v7074_v16 = vld [vmem:[%s8294_s2] ss:$0 sm:$0xff]  ;;  %v2801_v3 = vshll.u32 %v5548_v29, 16  ;;  %v2970_v62 = vrot.slane %v5548_v29, 1 }
 0x1ae   : > { %2266 = vst [vmem:[#allocation2 + $0x44] sm:$0x1] %v2265_v45  ;;  %v993_v28 = vpop.permute.xlu1 %992  ;;  %v2799_v27 = vshrl.u32 %v5548_v29, 16 }
 0x1af   : > { %vm1771_vm12 = vcmp.ge.f32.partialorder %v1735_v35, 0.0  ;;  %v1807_v42 = vmul.f32 0.3, %v1735_v35  ;;  %v2803_v47 = vrot.slane %v2801_v3, 1 }
 0x1b0   : > { %v7087_v6 = vpop.permute.xlu2 %1084 }
 0x1b1   : > { %v1843_v48 = vsel %vm1771_vm12, %v1735_v35, %v1807_v42  ;;  %v2804_v63 = vor.u32 %v2803_v47, %v2799_v27  ;;  %vm8359_vm12 = vcmask 228352  }
 0x1b2   : > { %v1879_v4 = vpack.c.bf16 %v1843_v48, %v1843_v48  ;;  %v1621_v7 = vpop.f32.mrf.mxu0  ;;  %v952_v2 = vpop.permute.xlu0 %951  ;;  %v2271_v48 = vld [vmem:[#allocation2 + $0x50] sm:$0x1] }
 0x1b3   : > { %v1696_v40 = vmul.f32 %v7074_v16, %v1621_v7  ;;  %v1288_v23 = vsel %vm1260_vm4, %v1251_v59, %v952_v2 }
 0x1b4   : > { %v1992_v53 = vshrl.u32 %v1879_v4, 16  ;;  %v2566_v24 = vld [vmem:[#allocation2 + $0x38] sm:$0x1]  ;;  %v1995_v20 = vshll.u32 %v1879_v4, 16  ;;  %v1325_v14 = vsel %vm1297_vm5, %v1288_v23, %v993_v28 }
 0x1b5   : > { %v2412_v49 = vld [vmem:[#allocation2 + $0x44] sm:$0x1]  ;;  %v1736_v32 = vadd.f32 %v7080_v50, %v1696_v40  ;;  %v2722_v25 = vunpack.c.l.b16 %v2566_v24  ;;  %v1362_v5 = vsel %vm1334_vm6, %v1325_v14, %v7018_v9 }
 0x1b6   : > { %v2441_v51 = vsel %vm6680_vm9, %v2412_v49, %v2440_v26  ;;  %v1994_v31 = vrot.slane %v1992_v53, 7  ;;  %v1124_v52 = vpop.permute.xlu1 %1123  ;;  %v2513_v55 = vld [vmem:[#allocation2 + $0x44] sm:$0x1] }
 0x1b7   : > { %2442 = vst [vmem:[#allocation2 + $0x3c] sm:$0x1] %v2441_v51  ;;  %vm1772_vm2 = vcmp.ge.f32.partialorder %v1736_v32, 0.0  ;;  %v1808_v22 = vmul.f32 0.3, %v1736_v32  ;;  %v2738_v41 = vpack.c.b16 %v2722_v25, %v2722_v25 }
 0x1b8   : > { %v1997_v12 = vor.u32 %v1995_v20, %v1994_v31  ;;  %v1998_v59 = vrot.slane %v1994_v31, 4 }
 0x1b9   : > { %v1844_v30 = vsel %vm1772_vm2, %v1736_v32, %v1808_v22  ;;  %v2971_v8 = vrot.slane %v2738_v41, 1  ;;  %v2806_v1 = vshll.u32 %v2738_v41, 16  ;;  %v7112_v32 = vpop.permute.xlu2 %1215 }
 0x1ba   : > { %v2268_v18 = vsel %vm6649_vm15, %v1997_v12, %v2267_v11  ;;  %v1880_v39 = vpack.c.bf16 %v1844_v30, %v1844_v30  ;;  %v1083_v15 = vpop.permute.xlu0 %1082 }
 0x1bb   : > { %2269 = vst [vmem:[#allocation2 + $0x48] sm:$0xf] %v2268_v18  ;;  %v7094_v19 = vsel %vm870_vm0, %v2970_v62, %v2971_v8  ;;  %v2808_v21 = vrot.slane %v2806_v1, 1  ;;  %v1399_v46 = vsel %vm1371_vm7, %v1362_v5, %v1083_v15 }
 0x1bc   : > { %8358 = vst [vmem:[#allocation9_spill] sm:$0xff] %v7094_v19  ;;  %v2000_v45 = vshrl.u32 %v1880_v39, 16  ;;  %3856 = vmatmul.bf16.gmra.mxu3 %v7094_v19  ;;  %v2003_v35 = vshll.u32 %v1880_v39, 16  ;;  %v1436_v4 = vsel %vm1408_vm8, %v1399_v46, %v1124_v52 }
 0x1bd   : > { %v7099_v29 = vsel %vm617_vm1, %v2804_v63, %v2808_v21  ;;  %v1473_v24 = vsel %vm8359_vm12, %v1436_v4, %v7042_v61 }
 0x1be   : > { %v2484_v36 = vld [vmem:[#allocation2 + $0x3c] sm:$0x1]  ;;  %v2002_v17 = vrot.slane %v2000_v45, 7  ;;  %3767 = vmatmul.bf16.gmra.mxu2 %v7099_v29  ;;  %v863_v28 = vpop.permute.xlu1 %862 }
 0x1bf   : > { %v5549_v9 = vld [vmem:[#allocation2 + $0x3c] sm:$0xff]  ;;  %v2514_v42 = vsel %vm6766_vm13, %v2484_v36, %v2513_v55  ;;  %v1253_v61 = vsel %vm1223_vm3, %v6537_v44, %v863_v28 }
 0x1c0   : > { %2515 = vst [vmem:[#allocation2 + $0x44] sm:$0x1] %v2514_v42  ;;  %v2005_v7 = vor.u32 %v2003_v35, %v2002_v17  ;;  %v2007_v2 = vrot.slane %v2002_v17, 4  ;;  %3683 = vmatmul.bf16.gmra.mxu1 %v5549_v9  ;;  %v2813_v11 = vshll.u32 %v5549_v9, 16  ;;  %v2973_v30 = vrot.slane %v5549_v9, 1 }
 0x1c1   : > { %v1624_v40 = vpop.f32.mrf.mxu0  ;;  %v1290_v18 = vsel %vm1260_vm4, %v1253_v61, %v7066_v10  ;;  %v7126_v21 = vpop.permute.xlu2 %996  ;;  %v2811_v55 = vshrl.u32 %v5549_v9, 16  ;;  %v2274_v17 = vld [vmem:[#allocation2 + $0x54] sm:$0xf] }
 0x1c2   : > { %v2006_v3 = vsel %vm6672_vm14, %v1998_v59, %v2005_v7  ;;  %v2272_v53 = vsel %vm6680_vm9, %v2007_v2, %v2271_v48  ;;  %v1697_v49 = vmul.f32 %v7074_v16, %v1624_v40  ;;  %v1214_v26 = vpop.permute.xlu0 %1213  ;;  %v2443_v27 = vld [vmem:[#allocation2 + $0x48] sm:$0x1]  ;;  %v2815_v39 = vrot.slane %v2813_v11, 1 }
 0x1c3   : > { %2270 = vst [vmem:[#allocation2 + $0x4c] sm:$0xf] %v2006_v3  ;;  %v1510_v23 = vsel %vm1482_vm10, %v1473_v24, %v1214_v26 }
 0x1c4   : > { %2273 = vst [vmem:[#allocation2 + $0x50] sm:$0x1] %v2272_v53  ;;  %v1737_v25 = vadd.f32 %v7080_v50, %v1697_v49  ;;  %5156 = vmatmul.msk.bf16.gmra.mxu0 %vm1539_vm11, %v1510_v23  ;;  %v2816_v4 = vor.u32 %v2815_v39, %v2811_v55 }
 0x1c6   : > { %vm1773_vm2 = vcmp.ge.f32.partialorder %v1737_v25, 0.0  ;;  %v1809_v51 = vmul.f32 0.3, %v1737_v25  ;;  %v1046_v31 = vpop.permute.xlu1 %1045 }
 0x1c7   : > { %v2569_v20 = vld [vmem:[#allocation2 + $0x44] sm:$0x1] }
 0x1c8   : > { %v1845_v52 = vsel %vm1773_vm2, %v1737_v25, %v1809_v51  ;;  %v2723_v22 = vunpack.c.l.b16 %v2569_v20  ;;  %vm8361_vm2 = vcmask 228352  }
 0x1c9   : > { %v1881_v41 = vpack.c.bf16 %v1845_v52, %v1845_v52  ;;  %v1626_v47 = vpop.f32.mrf.mxu0 }
 0x1ca   : > { %v1698_v12 = vmul.f32 %v7074_v16, %v1626_v47  ;;  %v995_v14 = vpop.permute.xlu0 %994  ;;  %v2739_v62 = vpack.c.b16 %v2723_v22, %v2723_v22  ;;  %v2278_v22 = vld [vmem:[#allocation2 + $0x5c] sm:$0x1] }
 0x1cb   : > { %v2413_v8 = vld [vmem:[#allocation2 + $0x50] sm:$0x1]  ;;  %v2009_v1 = vshrl.u32 %v1881_v41, 16  ;;  %v1327_v5 = vsel %vm1297_vm5, %v1290_v18, %v995_v14  ;;  %v2012_v46 = vshll.u32 %v1881_v41, 16 }
 0x1cc   : > { %v2444_v15 = vsel %vm6680_vm9, %v2413_v8, %v2443_v27  ;;  %v1738_v44 = vadd.f32 %v7080_v50, %v1698_v12  ;;  %v2974_v63 = vrot.slane %v2739_v62, 1  ;;  %v2818_v36 = vshll.u32 %v2739_v62, 16  ;;  %v2516_v25 = vld [vmem:[#allocation2 + $0x50] sm:$0x1]  ;;  %v7153_v12 = vpop.permute.xlu2 %1127 }
 0x1cd   : > { %2445 = vst [vmem:[#allocation2 + $0x48] sm:$0x1] %v2444_v15  ;;  %v2011_v45 = vrot.slane %v2009_v1, 7  ;;  %v1364_v48 = vsel %vm1334_vm6, %v1327_v5, %v1046_v31 }
 0x1ce   : > { %vm1774_vm12 = vcmp.ge.f32.partialorder %v1738_v44, 0.0  ;;  %v1810_v35 = vmul.f32 0.3, %v1738_v44  ;;  %v7129_v10 = vsel %vm870_vm0, %v2973_v30, %v2974_v63  ;;  %v1177_v28 = vpop.permute.xlu1 %1176  ;;  %v2820_v59 = vrot.slane %v2818_v36, 1 }
 0x1cf   : > { %8360 = vst [vmem:[#allocation10_spill] sm:$0xff] %v7129_v10  ;;  %v2014_v42 = vor.u32 %v2012_v46, %v2011_v45  ;;  %3861 = vmatmul.bf16.gmra.mxu3 %v7129_v10  ;;  %v1401_v3 = vsel %vm1371_vm7, %v1364_v48, %v7087_v6  ;;  %v2015_v14 = vrot.slane %v2011_v45, 4 }
 0x1d0   : > { %v1846_v7 = vsel %vm1774_vm12, %v1738_v44, %v1810_v35  ;;  %v7136_v40 = vsel %vm617_vm1, %v2816_v4, %v2820_v59 }
 0x1d1   : > { %v2275_v2 = vsel %vm6649_vm15, %v2014_v42, %v2274_v17  ;;  %v1882_v9 = vpack.c.bf16 %v1846_v7, %v1846_v7  ;;  %3772 = vmatmul.bf16.gmra.mxu2 %v7136_v40  ;;  %v2281_v42 = vld [vmem:[#allocation2 + $0x60] sm:$0xf] }
 0x1d2   : > { %2276 = vst [vmem:[#allocation2 + $0x54] sm:$0xf] %v2275_v2  ;;  %v1126_v53 = vpop.permute.xlu0 %1125  ;;  %v5601_v2 = vld [vmem:[%s8296_s4 + $0x138] sm:$0xff] }
 0x1d3   : > { %v2017_v24 = vshrl.u32 %v1882_v9, 16  ;;  %v1438_v49 = vsel %vm1408_vm8, %v1401_v3, %v1126_v53  ;;  %v1629_v26 = vpop.f32.mrf.mxu0  ;;  %v2020_v6 = vshll.u32 %v1882_v9, 16  ;;  %v5609_v3 = vld [vmem:[%s8296_s4 + $0x178] sm:$0xff]  ;;  %4006 = vmatpush.bf16.msrb.mxu2 %v5601_v2 }
 0x1d4   : > { %v2485_v23 = vld [vmem:[#allocation2 + $0x48] sm:$0x1]  ;;  %v1475_v51 = vsel %vm8361_vm2, %v1438_v49, %v1177_v28  ;;  %v1699_v31 = vmul.f32 %v7074_v16, %v1629_v26  ;;  %v867_v9 = vpop.permute.xlu2 %866  ;;  %4095 = vmatpush.bf16.msrb.mxu3 %v5609_v3 }
 0x1d5   : > { %v7144_v20 = vld [vmem:[#allocation2 + $0x48] sm:$0xff]  ;;  %v2517_v11 = vsel %vm6766_vm13, %v2485_v23, %v2516_v25  ;;  %v2019_v52 = vrot.slane %v2017_v24, 7  ;;  %v1512_v61 = vsel %vm1482_vm10, %v1475_v51, %v7112_v32  ;;  %v1257_v2 = vsel %vm1223_vm3, %v6630_v43, %v867_v9 }
 0x1d6   : > { %2518 = vst [vmem:[#allocation2 + $0x50] sm:$0x1] %v2517_v11  ;;  %v1739_v41 = vadd.f32 %v7080_v50, %v1699_v31  ;;  %5157 = vmatmul.msk.bf16.gmra.mxu0 %vm1539_vm11, %v1512_v61  ;;  %3688 = vmatmul.bf16.gmra.mxu1 %v7144_v20  ;;  %v956_v47 = vpop.permute.xlu1 %955  ;;  %v2825_v44 = vshll.u32 %v7144_v20, 16  ;;  %v2976_v24 = vrot.slane %v7144_v20, 1  ;;  %v2823_v49 = vshrl.u32 %v7144_v20, 16 }
 0x1d7   : > { %v2022_v62 = vor.u32 %v2020_v6, %v2019_v52  ;;  %v2024_v30 = vrot.slane %v2019_v52, 4 }
 0x1d8   : > { %vm1775_vm12 = vcmp.ge.f32.partialorder %v1739_v41, 0.0  ;;  %v1811_v8 = vmul.f32 0.3, %v1739_v41  ;;  %v2827_v48 = vrot.slane %v2825_v44, 1 }
 0x1d9   : > { %v2023_v27 = vsel %vm6672_vm14, %v2015_v14, %v2022_v62  ;;  %v2279_v32 = vsel %vm6680_vm9, %v2024_v30, %v2278_v22  ;;  %v2446_v23 = vld [vmem:[#allocation2 + $0x54] sm:$0x1] }
 0x1da   : > { %2277 = vst [vmem:[#allocation2 + $0x58] sm:$0xf] %v2023_v27  ;;  %v1847_v1 = vsel %vm1775_vm12, %v1739_v41, %v1811_v8  ;;  %v865_v18 = vpop.permute.xlu0 %864  ;;  %vm8363_vm12 = vcmask 228352  }
 0x1db   : > { %2280 = vst [vmem:[#allocation2 + $0x5c] sm:$0x1] %v2279_v32  ;;  %v1883_v39 = vpack.c.bf16 %v1847_v1, %v1847_v1  ;;  %v1631_v15 = vpop.f32.mrf.mxu0  ;;  %v1255_v45 = vsel %vm1223_vm3, %v6579_v54, %v865_v18  ;;  %v5593_v54 = vld [vmem:[%s8296_s4 + $0xf8] sm:$0xff]  ;;  %v2285_v1 = vld [vmem:[#allocation2 + $0x68] sm:$0x1] }
 0x1dc   : > { %v1700_v5 = vmul.f32 %v7074_v16, %v1631_v15  ;;  %v1292_v4 = vsel %vm1260_vm4, %v1255_v45, %v956_v47  ;;  %3917 = vmatpush.bf16.msrb.mxu1 %v5593_v54  ;;  %v2828_v47 = vor.u32 %v2827_v48, %v2823_v49 }
 0x1dd   : > { %v2026_v63 = vshrl.u32 %v1883_v39, 16  ;;  %v2572_v46 = vld [vmem:[#allocation2 + $0x50] sm:$0x1]  ;;  %v2029_v28 = vshll.u32 %v1883_v39, 16  ;;  %v1329_v22 = vsel %vm1297_vm5, %v1292_v4, %v7126_v21 }
 0x1de   : > { %v1740_v55 = vadd.f32 %v7080_v50, %v1700_v5  ;;  %v1087_v36 = vpop.permute.xlu1 %1086  ;;  %v2724_v17 = vunpack.c.l.b16 %v2572_v46 }
 0x1df   : > { %v2028_v35 = vrot.slane %v2026_v63, 7  ;;  %v1050_v63 = vpop.permute.xlu2 %1049 }
 0x1e0   : > { %vm1776_vm2 = vcmp.ge.f32.partialorder %v1740_v55, 0.0  ;;  %v1812_v59 = vmul.f32 0.3, %v1740_v55  ;;  %v2740_v7 = vpack.c.b16 %v2724_v17, %v2724_v17 }
 0x1e1   : > { %v2031_v53 = vor.u32 %v2029_v28, %v2028_v35  ;;  %v2032_v18 = vrot.slane %v2028_v35, 4 }
 0x1e2   : > { %v2414_v26 = vld [vmem:[#allocation2 + $0x5c] sm:$0x1]  ;;  %v1848_v25 = vsel %vm1776_vm2, %v1740_v55, %v1812_v59  ;;  %v1048_v51 = vpop.permute.xlu0 %1047  ;;  %v2977_v31 = vrot.slane %v2740_v7, 1  ;;  %v2830_v11 = vshll.u32 %v2740_v7, 16 }
 0x1e3   : > { %v2447_v52 = vsel %vm6680_vm9, %v2414_v26, %v2446_v23  ;;  %v2282_v6 = vsel %vm6649_vm15, %v2031_v53, %v2281_v42  ;;  %v1884_v61 = vpack.c.bf16 %v1848_v25, %v1848_v25  ;;  %v1366_v20 = vsel %vm1334_vm6, %v1329_v22, %v1048_v51  ;;  %v2519_v46 = vld [vmem:[#allocation2 + $0x5c] sm:$0x1] }
 0x1e4   : > { %2448 = vst [vmem:[#allocation2 + $0x54] sm:$0x1] %v2447_v52  ;;  %v7184_v41 = vsel %vm870_vm0, %v2976_v24, %v2977_v31  ;;  %v2832_v14 = vrot.slane %v2830_v11, 1  ;;  %v1403_v21 = vsel %vm1371_vm7, %v1366_v20, %v1087_v36 }
 0x1e5   : > { %8362 = vst [vmem:[#allocation11_spill] sm:$0xff] %v7184_v41  ;;  %v2034_v62 = vshrl.u32 %v1884_v61, 16  ;;  %3866 = vmatmul.bf16.gmra.mxu3 %v7184_v41  ;;  %v2037_v32 = vshll.u32 %v1884_v61, 16  ;;  %v1440_v44 = vsel %vm1408_vm8, %v1403_v21, %v7153_v12 }
 0x1e6   : > { %2283 = vst [vmem:[#allocation2 + $0x60] sm:$0xf] %v2282_v6  ;;  %v7188_v30 = vsel %vm617_vm1, %v2828_v47, %v2832_v14  ;;  %v1218_v8 = vpop.permute.xlu1 %1217 }
 0x1e7   : > { %v2036_v27 = vrot.slane %v2034_v62, 7  ;;  %3777 = vmatmul.bf16.gmra.mxu2 %v7188_v30  ;;  %v1181_v25 = vpop.permute.xlu2 %1180  ;;  %v5600_v62 = vld [vmem:[%s8296_s4 + $0x130] sm:$0xff] }
 0x1e8   : > { %4007 = vmatpush.bf16.msrb.mxu2 %v5600_v62 }
 0x1e9   : > { %v2039_v39 = vor.u32 %v2037_v32, %v2036_v27  ;;  %v2041_v15 = vrot.slane %v2036_v27, 4  ;;  %v5608_v27 = vld [vmem:[%s8296_s4 + $0x170] sm:$0xff]  ;;  %v2288_v32 = vld [vmem:[#allocation2 + $0x6c] sm:$0xf] }
 0x1ea   : > { %v1179_v5 = vpop.permute.xlu0 %1178  ;;  %v1634_v36 = vpop.f32.mrf.mxu0  ;;  %4096 = vmatpush.bf16.msrb.mxu3 %v5608_v27 }
 0x1eb   : > { %v2486_v45 = vld [vmem:[#allocation2 + $0x54] sm:$0x1]  ;;  %v2040_v55 = vsel %vm6672_vm14, %v2032_v18, %v2039_v39  ;;  %v2286_v17 = vsel %vm6680_vm9, %v2041_v15, %v2285_v1  ;;  %v1477_v28 = vsel %vm8363_vm12, %v1440_v44, %v1179_v5  ;;  %v1701_v12 = vmul.f32 %v7074_v16, %v1634_v36 }
 0x1ec   : > { %v5551_v42 = vld [vmem:[#allocation2 + $0x54] sm:$0xff]  ;;  %v2520_v35 = vsel %vm6766_vm13, %v2486_v45, %v2519_v46  ;;  %2284 = vst [vmem:[#allocation2 + $0x64] sm:$0xf] %v2040_v55  ;;  %v1514_v48 = vsel %vm1482_vm10, %v1477_v28, %v1218_v8 }
 0x1ed   : > { %2521 = vst [vmem:[#allocation2 + $0x5c] sm:$0x1] %v2520_v35  ;;  %5158 = vmatmul.msk.bf16.gmra.mxu0 %vm1539_vm11, %v1514_v48  ;;  %3693 = vmatmul.bf16.gmra.mxu1 %v5551_v42  ;;  %v1741_v4 = vadd.f32 %v7080_v50, %v1701_v12  ;;  %v2837_v51 = vshll.u32 %v5551_v42, 16  ;;  %v2449_v11 = vld [vmem:[#allocation2 + $0x60] sm:$0x1]  ;;  %v5592_v8 = vld [vmem:[%s8296_s4 + $0xf0] sm:$0xff] }
 0x1ee   : > { %2287 = vst [vmem:[#allocation2 + $0x68] sm:$0x1] %v2286_v17  ;;  %v999_v59 = vpop.permute.xlu1 %998  ;;  %v2979_v15 = vrot.slane %v5551_v42, 1  ;;  %3918 = vmatpush.bf16.msrb.mxu1 %v5592_v8  ;;  %v2835_v55 = vshrl.u32 %v5551_v42, 16 }
 0x1ef   : > { %vm1777_vm2 = vcmp.ge.f32.partialorder %v1741_v4, 0.0  ;;  %v1813_v7 = vmul.f32 0.3, %v1741_v4  ;;  %v2839_v18 = vrot.slane %v2837_v51, 1 }
 0x1f1   : > { %v1849_v54 = vsel %vm1777_vm2, %v1741_v4, %v1813_v7  ;;  %vm8365_vm2 = vcmask 228352  }
 0x1f2   : > { %v958_v3 = vpop.permute.xlu0 %957  ;;  %v1885_v53 = vpack.c.bf16 %v1849_v54, %v1849_v54  ;;  %v1636_v24 = vpop.f32.mrf.mxu0 }
 0x1f3   : > { %v1294_v49 = vsel %vm1260_vm4, %v1257_v2, %v958_v3  ;;  %v1702_v26 = vmul.f32 %v7074_v16, %v1636_v24  ;;  %v960_v3 = vpop.permute.xlu2 %959 }
 0x1f4   : > { %v2575_v23 = vld [vmem:[#allocation2 + $0x5c] sm:$0x1]  ;;  %v2043_v52 = vshrl.u32 %v1885_v53, 16  ;;  %v1331_v6 = vsel %vm1297_vm5, %v1294_v49, %v999_v59  ;;  %v2046_v9 = vshll.u32 %v1885_v53, 16 }
 0x1f5   : > { %v2415_v31 = vld [vmem:[#allocation2 + $0x68] sm:$0x1]  ;;  %v2725_v61 = vunpack.c.l.b16 %v2575_v23  ;;  %v1742_v22 = vadd.f32 %v7080_v50, %v1702_v26  ;;  %v1368_v1 = vsel %vm1334_vm6, %v1331_v6, %v1050_v63  ;;  %v2840_v63 = vor.u32 %v2839_v18, %v2835_v55  ;;  %v2292_v26 = vld [vmem:[#allocation2 + $0x74] sm:$0x1] }
 0x1f6   : > { %v2450_v43 = vsel %vm6680_vm9, %v2415_v31, %v2449_v11  ;;  %v1130_v20 = vpop.permute.xlu1 %1129  ;;  %v2045_v47 = vrot.slane %v2043_v52, 7  ;;  %v2522_v42 = vld [vmem:[#allocation2 + $0x68] sm:$0x1] }
 0x1f7   : > { %2451 = vst [vmem:[#allocation2 + $0x60] sm:$0x1] %v2450_v43  ;;  %v2741_v14 = vpack.c.b16 %v2725_v61, %v2725_v61  ;;  %vm1778_vm12 = vcmp.ge.f32.partialorder %v1742_v22, 0.0  ;;  %v1814_v21 = vmul.f32 0.3, %v1742_v22 }
 0x1f8   : > { %v2048_v39 = vor.u32 %v2046_v9, %v2045_v47  ;;  %v2049_v51 = vrot.slane %v2045_v47, 4 }
 0x1f9   : > { %v2980_v44 = vrot.slane %v2741_v14, 1  ;;  %v2842_v5 = vshll.u32 %v2741_v14, 16  ;;  %v1850_v45 = vsel %vm1778_vm12, %v1742_v22, %v1814_v21 }
 0x1fa   : > { %v1089_v46 = vpop.permute.xlu0 %1088  ;;  %v2289_v17 = vsel %vm6649_vm15, %v2048_v39, %v2288_v32  ;;  %v1886_v36 = vpack.c.bf16 %v1850_v45, %v1850_v45 }
 0x1fb   : > { %v1405_v28 = vsel %vm1371_vm7, %v1368_v1, %v1089_v46  ;;  %v7227_v35 = vsel %vm870_vm0, %v2979_v15, %v2980_v44  ;;  %2290 = vst [vmem:[#allocation2 + $0x6c] sm:$0xf] %v2289_v17  ;;  %v2844_v12 = vrot.slane %v2842_v5, 1  ;;  %v1091_v21 = vpop.permute.xlu2 %1090 }
 0x1fc   : > { %8364 = vst [vmem:[#allocation12_spill] sm:$0xff] %v7227_v35  ;;  %3871 = vmatmul.bf16.gmra.mxu3 %v7227_v35  ;;  %v2051_v48 = vshrl.u32 %v1886_v36, 16  ;;  %v1442_v4 = vsel %vm1408_vm8, %v1405_v28, %v1130_v20  ;;  %v2054_v49 = vshll.u32 %v1886_v36, 16 }
 0x1fd   : > { %v7232_v7 = vsel %vm617_vm1, %v2840_v63, %v2844_v12  ;;  %v1479_v23 = vsel %vm8365_vm2, %v1442_v4, %v1181_v25 }
 0x1fe   : > { %v2487_v59 = vld [vmem:[#allocation2 + $0x60] sm:$0x1]  ;;  %v869_v54 = vpop.permute.xlu1 %868  ;;  %v2053_v24 = vrot.slane %v2051_v48, 7  ;;  %3782 = vmatmul.bf16.gmra.mxu2 %v7232_v7 }
 0x1ff   : > { %v5552_v2 = vld [vmem:[#allocation2 + $0x60] sm:$0xff]  ;;  %v2523_v53 = vsel %vm6766_vm13, %v2487_v59, %v2522_v42  ;;  %v1259_v47 = vsel %vm1223_vm3, %v6732_v0, %v869_v54 }
 0x200   : > { %2524 = vst [vmem:[#allocation2 + $0x68] sm:$0x1] %v2523_v53  ;;  %3698 = vmatmul.bf16.gmra.mxu1 %v5552_v2  ;;  %v2056_v31 = vor.u32 %v2054_v49, %v2053_v24  ;;  %v2058_v11 = vrot.slane %v2053_v24, 4  ;;  %v2849_v25 = vshll.u32 %v5552_v2, 16  ;;  %v1296_v32 = vsel %vm1260_vm4, %v1259_v47, %v960_v3  ;;  %v2295_v3 = vld [vmem:[#allocation2 + $0x78] sm:$0xf] }
 0x201   : > { %v1639_v52 = vpop.f32.mrf.mxu0  ;;  %v2847_v46 = vshrl.u32 %v5552_v2, 16  ;;  %v2982_v17 = vrot.slane %v5552_v2, 1  ;;  %v5599_v24 = vld [vmem:[%s8296_s4 + $0x128] sm:$0xff] }
 0x202   : > { %v1703_v6 = vmul.f32 %v7074_v16, %v1639_v52  ;;  %v1220_v61 = vpop.permute.xlu0 %1219  ;;  %v2057_v43 = vsel %vm6672_vm14, %v2049_v51, %v2056_v31  ;;  %v2293_v9 = vsel %vm6680_vm9, %v2058_v11, %v2292_v26  ;;  %v2851_v18 = vrot.slane %v2849_v25, 1  ;;  %v2452_v28 = vld [vmem:[#allocation2 + $0x6c] sm:$0x1]  ;;  %4008 = vmatpush.bf16.msrb.mxu2 %v5599_v24 }
 0x203   : > { %v1516_v22 = vsel %vm1482_vm10, %v1479_v23, %v1220_v61  ;;  %2291 = vst [vmem:[#allocation2 + $0x70] sm:$0xf] %v2057_v43 }
 0x204   : > { %v1743_v20 = vadd.f32 %v7080_v50, %v1703_v6  ;;  %5159 = vmatmul.msk.bf16.gmra.mxu0 %vm1539_vm11, %v1516_v22  ;;  %2294 = vst [vmem:[#allocation2 + $0x74] sm:$0x1] %v2293_v9  ;;  %v2852_v48 = vor.u32 %v2851_v18, %v2847_v46  ;;  %v1222_v9 = vpop.permute.xlu2 %1221 }
 0x206   : > { %vm1779_vm12 = vcmp.ge.f32.partialorder %v1743_v20, 0.0  ;;  %v1815_v14 = vmul.f32 0.3, %v1743_v20  ;;  %v1052_v62 = vpop.permute.xlu1 %1051 }
 0x207   : > { %v2578_v8 = vld [vmem:[#allocation2 + $0x68] sm:$0x1] }
 0x208   : > { %v1851_v27 = vsel %vm1779_vm12, %v1743_v20, %v1815_v14  ;;  %v2726_v1 = vunpack.c.l.b16 %v2578_v8 }
 0x209   : > { %v1887_v39 = vpack.c.bf16 %v1851_v27, %v1851_v27  ;;  %v1641_v15 = vpop.f32.mrf.mxu0 }
 0x20a   : > { %v1704_v44 = vmul.f32 %v7074_v16, %v1641_v15  ;;  %v1001_v5 = vpop.permute.xlu0 %1000  ;;  %v2742_v45 = vpack.c.b16 %v2726_v1, %v2726_v1 }
 0x20b   : > { %v2060_v55 = vshrl.u32 %v1887_v39, 16  ;;  %v1333_v0 = vsel %vm1297_vm5, %v1296_v32, %v1001_v5  ;;  %v2416_v36 = vld [vmem:[#allocation2 + $0x74] sm:$0x1]  ;;  %v2063_v54 = vshll.u32 %v1887_v39, 16  ;;  %vm8367_vm5 = vmmov %vm8365_vm2  ;;  %v2299_v39 = vld [vmem:[#allocation2 + $0x80] sm:$0x1] }
 0x20c   : > { %v1744_v63 = vadd.f32 %v7080_v50, %v1704_v44  ;;  %v2983_v12 = vrot.slane %v2742_v45, 1  ;;  %v2854_v4 = vshll.u32 %v2742_v45, 16  ;;  %v2453_v59 = vsel %vm6680_vm9, %v2416_v36, %v2452_v28  ;;  %v2525_v47 = vld [vmem:[#allocation2 + $0x74] sm:$0x1] }
 0x20d   : > { %v2062_v42 = vrot.slane %v2060_v55, 7  ;;  %v1370_v53 = vsel %vm1334_vm6, %v1333_v0, %v1052_v62  ;;  %2454 = vst [vmem:[#allocation2 + $0x6c] sm:$0x1] %v2453_v59 }
 0x20e   : > { %vm1780_vm4 = vcmp.ge.f32.partialorder %v1744_v63, 0.0  ;;  %v1816_v2 = vmul.f32 0.3, %v1744_v63  ;;  %v7259_v49 = vsel %vm870_vm0, %v2982_v17, %v2983_v12  ;;  %v2856_v26 = vrot.slane %v2854_v4, 1  ;;  %v1183_v61 = vpop.permute.xlu1 %1182 }
 0x20f   : > { %8366 = vst [vmem:[#allocation13_spill] sm:$0xff] %v7259_v49  ;;  %v2065_v23 = vor.u32 %v2063_v54, %v2062_v42  ;;  %3876 = vmatmul.bf16.gmra.mxu3 %v7259_v49  ;;  %v1407_v31 = vsel %vm1371_vm7, %v1370_v53, %v1091_v21  ;;  %v2066_v44 = vrot.slane %v2062_v42, 4 }
 0x210   : > { %v1852_v51 = vsel %vm1780_vm4, %v1744_v63, %v1816_v2  ;;  %v7264_v11 = vsel %vm617_vm1, %v2852_v48, %v2856_v26  ;;  %v5591_v2 = vld [vmem:[%s8296_s4 + $0xe8] sm:$0xff] }
 0x211   : > { %v2296_v52 = vsel %vm6649_vm15, %v2065_v23, %v2295_v3  ;;  %v1888_v6 = vpack.c.bf16 %v1852_v51, %v1852_v51  ;;  %3787 = vmatmul.bf16.gmra.mxu2 %v7264_v11  ;;  %v2302_v3 = vld [vmem:[#allocation2 + $0x84] sm:$0xf]  ;;  %v5607_v26 = vld [vmem:[%s8296_s4 + $0x168] sm:$0xff]  ;;  %3919 = vmatpush.bf16.msrb.mxu1 %v5591_v2 }
 0x212   : > { %2297 = vst [vmem:[#allocation2 + $0x78] sm:$0xf] %v2296_v52  ;;  %v1132_v43 = vpop.permute.xlu0 %1131  ;;  %4097 = vmatpush.bf16.msrb.mxu3 %v5607_v26  ;;  %v5828_v2 = vld [vmem:[%s8296_s4 + $0xa8] sm:$0xff] }
 0x213   : > { %v2068_v22 = vshrl.u32 %v1888_v6, 16  ;;  %v1444_v20 = vsel %vm1408_vm8, %v1407_v31, %v1132_v43  ;;  %v1644_v25 = vpop.f32.mrf.mxu0  ;;  %v2071_v32 = vshll.u32 %v1888_v6, 16 }
 0x214   : > { %v1481_v14 = vsel %vm8367_vm5, %v1444_v20, %v1183_v61  ;;  %v1705_v62 = vmul.f32 %v7074_v16, %v1644_v25  ;;  %v2488_v8 = vld [vmem:[#allocation2 + $0x6c] sm:$0x1] }
 0x215   : > { %v2070_v27 = vrot.slane %v2068_v22, 7  ;;  %v1518_v21 = vsel %vm1482_vm10, %v1481_v14, %v1222_v9  ;;  %v5553_v1 = vld [vmem:[#allocation2 + $0x6c] sm:$0xff]  ;;  %v2526_v18 = vsel %vm6766_vm13, %v2488_v8, %v2525_v47  ;;  %v7293_v47 = vld [vmem:[#allocation2] sm:$0xff] }
 0x216   : > { %v1745_v15 = vadd.f32 %v7080_v50, %v1705_v62  ;;  %5160 = vmatmul.msk.bf16.gmra.mxu0 %vm1539_vm11, %v1518_v21  ;;  %2527 = vst [vmem:[#allocation2 + $0x74] sm:$0x1] %v2526_v18  ;;  %3703 = vmatmul.bf16.gmra.mxu1 %v5553_v1  ;;  %v2861_v59 = vshll.u32 %v5553_v1, 16  ;;  %v2985_v61 = vrot.slane %v5553_v1, 1  ;;  %v2859_v14 = vshrl.u32 %v5553_v1, 16 }
 0x217   : > { %v2073_v5 = vor.u32 %v2071_v32, %v2070_v27  ;;  %v2075_v45 = vrot.slane %v2070_v27, 4  ;;  %v2306_v1 = vld [vmem:[#allocation2 + $0x8c] sm:$0x1] }
 0x218   : > { %vm1781_vm6 = vcmp.ge.f32.partialorder %v1745_v15, 0.0  ;;  %v1817_v46 = vmul.f32 0.3, %v1745_v15  ;;  %v2863_v43 = vrot.slane %v2861_v59, 1  ;;  %v3674_v59 = vpop.f32.mrf.mxu1 }
 0x219   : > { %v2074_v55 = vsel %vm6672_vm14, %v2066_v44, %v2073_v5  ;;  %v2300_v0 = vsel %vm6680_vm9, %v2075_v45, %v2299_v39  ;;  %v2455_v52 = vld [vmem:[#allocation2 + $0x78] sm:$0x1] }
 0x21a   : > { %2298 = vst [vmem:[#allocation2 + $0x7c] sm:$0xf] %v2074_v55  ;;  %v1853_v17 = vsel %vm1781_vm6, %v1745_v15, %v1817_v46  ;;  %v2864_v32 = vor.u32 %v2863_v43, %v2859_v14  ;;  %v5826_v15 = vld [vmem:[%s8296_s4 + $0xb8] sm:$0xff]  ;;  %v2309_v14 = vld [vmem:[#allocation2 + $0x90] sm:$0xf] }
 0x21b   : > { %2301 = vst [vmem:[#allocation2 + $0x80] sm:$0x1] %v2300_v0  ;;  %v1889_v36 = vpack.c.bf16 %v1853_v17, %v1853_v17  ;;  %v1646_v28 = vpop.f32.mrf.mxu0 }
 0x21c   : > { %v1706_v63 = vmul.f32 %v7074_v16, %v1646_v28 }
 0x21d   : > { %v2077_v12 = vshrl.u32 %v1889_v36, 16  ;;  %v2581_v4 = vld [vmem:[#allocation2 + $0x74] sm:$0x1]  ;;  %v2080_v54 = vshll.u32 %v1889_v36, 16 }
 0x21e   : > { %v1746_v48 = vadd.f32 %v7080_v50, %v1706_v63  ;;  %v2727_v53 = vunpack.c.l.b16 %v2581_v4 }
 0x21f   : > { %v2079_v42 = vrot.slane %v2077_v12, 7 }
 0x220   : > { %vm1782_vm7 = vcmp.ge.f32.partialorder %v1746_v48, 0.0  ;;  %v1818_v24 = vmul.f32 0.3, %v1746_v48  ;;  %v2743_v51 = vpack.c.b16 %v2727_v53, %v2727_v53 }
 0x221   : > { %v2082_v23 = vor.u32 %v2080_v54, %v2079_v42  ;;  %v2083_v5 = vrot.slane %v2079_v42, 4 }
 0x222   : > { %v2417_v31 = vld [vmem:[#allocation2 + $0x80] sm:$0x1]  ;;  %v1854_v6 = vsel %vm1782_vm7, %v1746_v48, %v1818_v24  ;;  %v2986_v25 = vrot.slane %v2743_v51, 1  ;;  %v2866_v62 = vshll.u32 %v2743_v51, 16  ;;  %v5827_v48 = vld [vmem:[%s8296_s4 + $0xb0] sm:$0xff] }
 0x223   : > { %v2456_v9 = vsel %vm6680_vm9, %v2417_v31, %v2455_v52  ;;  %v2303_v22 = vsel %vm6649_vm15, %v2082_v23, %v2302_v3  ;;  %v1890_v20 = vpack.c.bf16 %v1854_v6, %v1854_v6  ;;  %v2528_v17 = vld [vmem:[#allocation2 + $0x80] sm:$0x1] }
 0x224   : > { %2457 = vst [vmem:[#allocation2 + $0x78] sm:$0x1] %v2456_v9  ;;  %v7296_v27 = vsel %vm870_vm0, %v2985_v61, %v2986_v25  ;;  %v2868_v21 = vrot.slane %v2866_v62, 1  ;;  %v5829_v61 = vld [vmem:[%s8296_s4 + $0xa0] sm:$0xff]  ;;  %v7331_v9 = vld [vmem:[#allocation2 + $0xc] sm:$0xff] }
 0x225   : > { %2304 = vst [vmem:[#allocation2 + $0x84] sm:$0xf] %v2303_v22  ;;  %v2085_v8 = vshrl.u32 %v1890_v20, 16  ;;  %3881 = vmatmul.bf16.gmra.mxu3 %v7296_v27  ;;  %v2088_v39 = vshll.u32 %v1890_v20, 16 }
 0x226   : > { %8368 = vst [vmem:[#allocation14_spill] sm:$0xff] %v7296_v27  ;;  %3658 = vmatmul.bf16.vlgmr.msrb.gmra.mxu0 %v7293_v47  ;;  %v7304_v44 = vsel %vm617_vm1, %v2864_v32, %v2868_v21 }
 0x227   : > { %v2087_v18 = vrot.slane %v2085_v8, 7  ;;  %3828 = vmatpush.bf16.msrb.mxu0 %v5826_v15  ;;  %3792 = vmatmul.bf16.gmra.mxu2 %v7304_v44 }
 0x229   : > { %v2090_v45 = vor.u32 %v2088_v39, %v2087_v18  ;;  %v2092_v46 = vrot.slane %v2087_v18, 4  ;;  %v5598_v18 = vld [vmem:[%s8296_s4 + $0x120] sm:$0xff] }
 0x22a   : > { %v1649_v55 = vpop.f32.mrf.mxu0  ;;  %v3852_v53 = vpop.f32.mrf.mxu3  ;;  %v5590_v39 = vld [vmem:[%s8296_s4 + $0xe0] sm:$0xff]  ;;  %4009 = vmatpush.bf16.msrb.mxu2 %v5598_v18 }
 0x22b   : > { %v2489_v0 = vld [vmem:[#allocation2 + $0x78] sm:$0x1]  ;;  %v2091_v36 = vsel %vm6672_vm14, %v2083_v5, %v2090_v45  ;;  %v2307_v28 = vsel %vm6680_vm9, %v2092_v46, %v2306_v1  ;;  %v1707_v63 = vmul.f32 %v7074_v16, %v1649_v55  ;;  %3829 = vmatpush.bf16.msrb.mxu0 %v5827_v48  ;;  %v7349_v46 = vpop.f32.mrf.mxu1  ;;  %3920 = vmatpush.bf16.msrb.mxu1 %v5590_v39 }
 0x22c   : > { %v7312_v12 = vld [vmem:[#allocation2 + $0x78] sm:$0xff]  ;;  %v2529_v4 = vsel %vm6766_vm13, %v2489_v0, %v2528_v17  ;;  %2305 = vst [vmem:[#allocation2 + $0x88] sm:$0xf] %v2091_v36  ;;  %v3763_v42 = vpop.f32.mrf.mxu2  ;;  %v2458_v25 = vld [vmem:[#allocation2 + $0x84] sm:$0x1] }
 0x22d   : > { %2530 = vst [vmem:[#allocation2 + $0x80] sm:$0x1] %v2529_v4  ;;  %v3764_v54 = vadd.f32 %v3763_v42, %v3674_v59  ;;  %v1747_v3 = vadd.f32 %v7080_v50, %v1707_v63  ;;  %3708 = vmatmul.bf16.gmra.mxu1 %v7312_v12  ;;  %v2873_v6 = vshll.u32 %v7312_v12, 16  ;;  %v5830_v45 = vld [vmem:[%s8296_s4 + $0x98] sm:$0xff]  ;;  %v2988_v0 = vrot.slane %v7312_v12, 1 }
 0x22e   : > { %2308 = vst [vmem:[#allocation2 + $0x8c] sm:$0x1] %v2307_v28  ;;  %v2871_v63 = vshrl.u32 %v7312_v12, 16 }
 0x22f   : > { %vm1783_vm8 = vcmp.ge.f32.partialorder %v1747_v3, 0.0  ;;  %v1819_v24 = vmul.f32 0.3, %v1747_v3  ;;  %3830 = vmatpush.bf16.msrb.mxu0 %v5828_v2  ;;  %v7324_v26 = vadd.f32 %v3852_v53, %v3764_v54  ;;  %v2875_v5 = vrot.slane %v2873_v6, 1 }
 0x231   : > { %v1855_v23 = vsel %vm1783_vm8, %v1747_v3, %v1819_v24  ;;  %v2876_v3 = vor.u32 %v2875_v5, %v2871_v63  ;;  %v5831_v24 = vld [vmem:[%s8296_s4 + $0x90] sm:$0xff] }
 0x232   : > { %v1891_v51 = vpack.c.bf16 %v1855_v23, %v1855_v23  ;;  %v1651_v31 = vpop.f32.mrf.mxu0  ;;  %v7357_v42 = vpop.f32.mrf.mxu3 }
 0x233   : > { %v1708_v52 = vmul.f32 %v7074_v16, %v1651_v31  ;;  %3831 = vmatpush.bf16.msrb.mxu0 %v5829_v61 }
 0x234   : > { %v2094_v43 = vshrl.u32 %v1891_v51, 16  ;;  %v2584_v22 = vld [vmem:[#allocation2 + $0x80] sm:$0x1]  ;;  %v2097_v21 = vshll.u32 %v1891_v51, 16  ;;  %v7352_v17 = vpop.f32.mrf.mxu2  ;;  %v2554_v51 = vld [vmem:[#allocation2 + $0x8] sm:$0x1] }
 0x235   : > { %v2418_v20 = vld [vmem:[#allocation2 + $0x8c] sm:$0x1]  ;;  %v1748_v62 = vadd.f32 %v7080_v50, %v1708_v52  ;;  %v2728_v8 = vunpack.c.l.b16 %v2584_v22  ;;  %v5606_v50 = vld [vmem:[%s8296_s4 + $0x160] sm:$0xff]  ;;  %v2313_v22 = vld [vmem:[#allocation2 + $0x98] sm:$0x1]  ;;  %v2718_v18 = vunpack.c.l.b16 %v2554_v51  ;;  %v2753_v51 = vshll.u32 %v7293_v47, 16 }
 0x236   : > { %v2459_v16 = vsel %vm6680_vm9, %v2418_v20, %v2458_v25  ;;  %v2096_v32 = vrot.slane %v2094_v43, 7  ;;  %3663 = vmatmul.bf16.gmra.mxu0 %v7331_v9  ;;  %4098 = vmatpush.bf16.msrb.mxu3 %v5606_v50  ;;  %v2531_v12 = vld [vmem:[#allocation2 + $0x8c] sm:$0x1] }
 0x237   : > { %2460 = vst [vmem:[#allocation2 + $0x84] sm:$0x1] %v2459_v16  ;;  %vm1784_vm10 = vcmp.ge.f32.partialorder %v1748_v62, 0.0  ;;  %v1820_v15 = vmul.f32 0.3, %v1748_v62  ;;  %v2744_v1 = vpack.c.b16 %v2728_v8, %v2728_v8  ;;  %3832 = vmatpush.bf16.msrb.mxu0 %v5830_v45  ;;  %v5832_v20 = vld [vmem:[%s8296_s4 + $0x88] sm:$0xff] }
 0x238   : > { %v2099_v55 = vor.u32 %v2097_v21, %v2096_v32  ;;  %v2100_v25 = vrot.slane %v2096_v32, 4  ;;  %v5834_v45 = vld [vmem:[%s8296_s4 + $0x80] sm:$0xff] }
 0x239   : > { %v1856_v36 = vsel %vm1784_vm10, %v1748_v62, %v1820_v15  ;;  %v2989_v28 = vrot.slane %v2744_v1, 1  ;;  %v2878_v48 = vshll.u32 %v2744_v1, 16  ;;  %v7385_v1 = vld [vmem:[%s8294_s2] ss:$0 sm:$0xff]  ;;  %vm8382_vm10 = vcmask 1041408  }
 0x23a   : > { %v2310_v4 = vsel %vm6649_vm15, %v2099_v55, %v2309_v14  ;;  %v1892_v59 = vpack.c.bf16 %v1856_v36, %v1856_v36  ;;  %v3679_v14 = vpop.f32.mrf.mxu1  ;;  %v7394_v55 = vld [vmem:[%s8295_s3] ss:$0 sm:$0xff]  ;;  %v7397_v36 = vld [vmem:[#allocation2 + $0x18] sm:$0xff] }
 0x23b   : > { %2311 = vst [vmem:[#allocation2 + $0x90] sm:$0xf] %v2310_v4  ;;  %v7360_v54 = vsel %vm870_vm0, %v2988_v0, %v2989_v28  ;;  %v2880_v53 = vrot.slane %v2878_v48, 1  ;;  %3833 = vmatpush.bf16.msrb.mxu0 %v5831_v24  ;;  %v7402_v48 = vpack.c.b16 %v2718_v18, %v2718_v18 }
 0x23c   : > { %v2102_v2 = vshrl.u32 %v1892_v59, 16  ;;  %3886 = vmatmul.bf16.gmra.mxu3 %v7360_v54  ;;  %v2105_v6 = vshll.u32 %v1892_v59, 16 }
 0x23d   : > { %v7367_v23 = vsel %vm617_vm1, %v2876_v3, %v2880_v53 }
 0x23e   : > { %v2490_v31 = vld [vmem:[#allocation2 + $0x84] sm:$0x1]  ;;  %v2104_v52 = vrot.slane %v2102_v2, 7  ;;  %3797 = vmatmul.bf16.gmra.mxu2 %v7367_v23 }
 0x23f   : > { %v7370_v61 = vld [vmem:[#allocation2 + $0x84] sm:$0xff]  ;;  %v2532_v43 = vsel %vm6766_vm13, %v2490_v31, %v2531_v12  ;;  %3834 = vmatpush.bf16.msrb.mxu0 %v5832_v20  ;;  %v3857_v5 = vpop.f32.mrf.mxu3  ;;  %v2758_v31 = vshll.u32 %v7402_v48, 16 }
 0x240   : > { %2533 = vst [vmem:[#allocation2 + $0x8c] sm:$0x1] %v2532_v43  ;;  %v2107_v62 = vor.u32 %v2105_v6, %v2104_v52  ;;  %v2109_v8 = vrot.slane %v2104_v52, 4  ;;  %3713 = vmatmul.bf16.gmra.mxu1 %v7370_v61  ;;  %v2885_v63 = vshll.u32 %v7370_v61, 16  ;;  %v2991_v43 = vrot.slane %v7370_v61, 1 }
 0x241   : > { %v3768_v16 = vpop.f32.mrf.mxu2  ;;  %v1654_v21 = vpop.f32.mrf.mxu0 }
 0x242   : > { %v2108_v39 = vsel %vm6672_vm14, %v2100_v25, %v2107_v62  ;;  %v2314_v50 = vsel %vm6680_vm9, %v2109_v8, %v2313_v22  ;;  %v3769_v15 = vadd.f32 %v3768_v16, %v3679_v14  ;;  %v1709_v32 = vmul.f32 %v7385_v1, %v1654_v21  ;;  %v2461_v25 = vld [vmem:[#allocation2 + $0x90] sm:$0x1] }
 0x243   : > { %2312 = vst [vmem:[#allocation2 + $0x94] sm:$0xf] %v2108_v39  ;;  %3835 = vmatpush.bf16.msrb.mxu0 %v5834_v45  ;;  %v2887_v12 = vrot.slane %v2885_v63, 1  ;;  %v2883_v22 = vshrl.u32 %v7370_v61, 16  ;;  %v7413_v39 = vpop.f32.mrf.mxu1  ;;  %v5597_v61 = vld [vmem:[%s8296_s4 + $0x118] sm:$0xff] }
 0x244   : > { %2315 = vst [vmem:[#allocation2 + $0x98] sm:$0x1] %v2314_v50  ;;  %v1749_v0 = vadd.f32 %v7394_v55, %v1709_v32  ;;  %v7399_v28 = vadd.f32 %v3857_v5, %v3769_v15  ;;  %v5589_v5 = vld [vmem:[%s8296_s4 + $0xd8] sm:$0xff]  ;;  %4010 = vmatpush.bf16.msrb.mxu2 %v5597_v61 }
 0x245   : > { %v2888_v32 = vor.u32 %v2887_v12, %v2883_v22  ;;  %v5605_v45 = vld [vmem:[%s8296_s4 + $0x158] sm:$0xff]  ;;  %3921 = vmatpush.bf16.msrb.mxu1 %v5589_v5  ;;  %v2751_v22 = vshrl.u32 %v7293_v47, 16 }
 0x246   : > { %vm1785_vm11 = vcmp.ge.f32.partialorder %v1749_v0, 0.0  ;;  %v1821_v4 = vmul.f32 0.3, %v1749_v0  ;;  %3668 = vmatmul.bf16.gmra.mxu0 %v7397_v36  ;;  %4099 = vmatpush.bf16.msrb.mxu3 %v5605_v45 }
 0x247   : > { %v2587_v59 = vld [vmem:[#allocation2 + $0x8c] sm:$0x1] }
 0x248   : > { %v1857_v3 = vsel %vm1785_vm11, %v1749_v0, %v1821_v4  ;;  %v2729_v53 = vunpack.c.l.b16 %v2587_v59  ;;  %v2316_v0 = vld [vmem:[#allocation2 + $0x9c] sm:$0xf] }
 0x249   : > { %v1893_v24 = vpack.c.bf16 %v1857_v3, %v1857_v3  ;;  %v1656_v2 = vpop.f32.mrf.mxu0  ;;  %v7415_v15 = vpop.f32.mrf.mxu2 }
 0x24a   : > { %v1710_v52 = vmul.f32 %v7385_v1, %v1656_v2  ;;  %v2745_v6 = vpack.c.b16 %v2729_v53, %v2729_v53  ;;  %8369 = vst [vmem:[#allocation15_spill] sm:$0xff] %v7415_v15  ;;  %v7429_v53 = vpop.f32.mrf.mxu3 }
 0x24b   : > { %v2419_v20 = vld [vmem:[#allocation2 + $0x98] sm:$0x1]  ;;  %v2111_v14 = vshrl.u32 %v1893_v24, 16  ;;  %v2114_v62 = vshll.u32 %v1893_v24, 16  ;;  %8370 = vst [vmem:[#allocation16_spill] sm:$0xff] %v7429_v53  ;;  %v2755_v24 = vrot.slane %v2753_v51, 1 }
 0x24c   : > { %v2462_v8 = vsel %vm6680_vm9, %v2419_v20, %v2461_v25  ;;  %v1750_v16 = vadd.f32 %v7394_v55, %v1710_v52  ;;  %v2992_v21 = vrot.slane %v2745_v6, 1  ;;  %v2890_v18 = vshll.u32 %v2745_v6, 16  ;;  %v2557_v52 = vld [vmem:[#allocation2 + $0x14] sm:$0x1] }
 0x24d   : > { %2463 = vst [vmem:[#allocation2 + $0x90] sm:$0x1] %v2462_v8  ;;  %v2113_v50 = vrot.slane %v2111_v14, 7  ;;  %v2760_v20 = vrot.slane %v2758_v31, 1  ;;  %v2756_v51 = vor.u32 %v2755_v24, %v2751_v22 }
 0x24e   : > { %vm1786_vm2 = vcmp.ge.f32.partialorder %v1750_v16, 0.0  ;;  %v1822_v63 = vmul.f32 0.3, %v1750_v16  ;;  %v7427_v4 = vsel %vm870_vm0, %v2991_v43, %v2992_v21  ;;  %v2892_v59 = vrot.slane %v2890_v18, 1 }
 0x24f   : > { %v2116_v3 = vor.u32 %v2114_v62, %v2113_v50  ;;  %3891 = vmatmul.bf16.gmra.mxu3 %v7427_v4  ;;  %v2719_v62 = vunpack.c.l.b16 %v2557_v52  ;;  %v2761_v31 = vsel %vm617_vm1, %v2756_v51, %v2760_v20  ;;  %v2117_v24 = vrot.slane %v2113_v50, 4 }
 0x250   : > { %v1858_v2 = vsel %vm1786_vm2, %v1750_v16, %v1822_v63  ;;  %v7433_v12 = vsel %vm617_vm1, %v2888_v32, %v2892_v59  ;;  %v2534_v16 = vld [vmem:[#allocation2 + $0x98] sm:$0x1]  ;;  %v3684_v32 = vpop.f32.mrf.mxu1  ;;  %v2320_v63 = vld [vmem:[#allocation2 + $0xa4] sm:$0x1] }
 0x251   : > { %v2317_v6 = vsel %vm6649_vm15, %v2116_v3, %v2316_v0  ;;  %v1894_v43 = vpack.c.bf16 %v1858_v2, %v1858_v2  ;;  %3802 = vmatmul.bf16.gmra.mxu2 %v7433_v12  ;;  %v7447_v22 = vpack.c.b16 %v2719_v62, %v2719_v62 }
 0x252   : > { %2318 = vst [vmem:[#allocation2 + $0x9c] sm:$0xf] %v2317_v6  ;;  %v3862_v6 = vpop.f32.mrf.mxu3 }
 0x253   : > { %v2119_v25 = vshrl.u32 %v1894_v43, 16  ;;  %v1659_v14 = vpop.f32.mrf.mxu0  ;;  %v2122_v45 = vshll.u32 %v1894_v43, 16  ;;  %v2770_v62 = vshll.u32 %v7447_v22, 16 }
 0x254   : > { %v2491_v8 = vld [vmem:[#allocation2 + $0x90] sm:$0x1]  ;;  %v1711_v21 = vmul.f32 %v7385_v1, %v1659_v14  ;;  %v3773_v0 = vpop.f32.mrf.mxu2 }
 0x255   : > { %v7440_v18 = vld [vmem:[#allocation2 + $0x90] sm:$0xff]  ;;  %v2535_v61 = vsel %vm6766_vm13, %v2491_v8, %v2534_v16  ;;  %v2121_v5 = vrot.slane %v2119_v25, 7  ;;  %v3774_v59 = vadd.f32 %v3773_v0, %v3684_v32  ;;  %v2765_v8 = vshll.u32 %v7331_v9, 16 }
 0x256   : > { %2536 = vst [vmem:[#allocation2 + $0x98] sm:$0x1] %v2535_v61  ;;  %v1751_v3 = vadd.f32 %v7394_v55, %v1711_v21  ;;  %3718 = vmatmul.bf16.gmra.mxu1 %v7440_v18  ;;  %3747 = vmatmul.bf16.vlgmr.msra.gmra.mxu0 %v2761_v31  ;;  %v2897_v61 = vshll.u32 %v7440_v18, 16 }
 0x257   : > { %v2124_v2 = vor.u32 %v2122_v45, %v2121_v5  ;;  %v2126_v52 = vrot.slane %v2121_v5, 4  ;;  %v7449_v43 = vadd.f32 %v3862_v6, %v3774_v59  ;;  %v2767_v31 = vrot.slane %v2765_v8, 1 }
 0x258   : > { %vm1787_vm12 = vcmp.ge.f32.partialorder %v1751_v3, 0.0  ;;  %v1823_v25 = vmul.f32 0.3, %v1751_v3  ;;  %v2895_v8 = vshrl.u32 %v7440_v18, 16 }
 0x259   : > { %v2125_v20 = vsel %vm6672_vm14, %v2117_v24, %v2124_v2  ;;  %v2321_v14 = vsel %vm6680_vm9, %v2126_v52, %v2320_v63  ;;  %v2763_v24 = vshrl.u32 %v7331_v9, 16  ;;  %v2772_v2 = vrot.slane %v2770_v62, 1  ;;  %v5604_v62 = vld [vmem:[%s8296_s4 + $0x150] sm:$0xff] }
 0x25a   : > { %2319 = vst [vmem:[#allocation2 + $0xa0] sm:$0xf] %v2125_v20  ;;  %v1859_v51 = vsel %vm1787_vm12, %v1751_v3, %v1823_v25  ;;  %v2323_v3 = vld [vmem:[#allocation2 + $0xa8] sm:$0xf]  ;;  %v2899_v25 = vrot.slane %v2897_v61, 1  ;;  %v5596_v20 = vld [vmem:[%s8296_s4 + $0x110] sm:$0xff]  ;;  %4100 = vmatpush.bf16.msrb.mxu3 %v5604_v62 }
 0x25b   : > { %2322 = vst [vmem:[#allocation2 + $0xa4] sm:$0x1] %v2321_v14  ;;  %v1895_v50 = vpack.c.bf16 %v1859_v51, %v1859_v51  ;;  %v1661_v16 = vpop.f32.mrf.mxu0  ;;  %v7464_v14 = vpop.f32.mrf.mxu1  ;;  %4011 = vmatpush.bf16.msrb.mxu2 %v5596_v20 }
 0x25c   : > { %v1712_v21 = vmul.f32 %v7385_v1, %v1661_v16  ;;  %8371 = vst [vmem:[#allocation17_spill] sm:$0xff] %v7464_v14  ;;  %v2994_v16 = vrot.slane %v7440_v18, 1  ;;  %v2900_v15 = vor.u32 %v2899_v25, %v2895_v8 }
 0x25d   : > { %v2128_v32 = vshrl.u32 %v1895_v50, 16  ;;  %v2590_v5 = vld [vmem:[#allocation2 + $0x98] sm:$0x1]  ;;  %v2131_v59 = vshll.u32 %v1895_v50, 16  ;;  %v5588_v50 = vld [vmem:[%s8296_s4 + $0xd0] sm:$0xff] }
 0x25e   : > { %v1752_v45 = vadd.f32 %v7394_v55, %v1712_v21  ;;  %v2730_v0 = vunpack.c.l.b16 %v2590_v5  ;;  %v2560_v21 = vld [vmem:[#allocation2 + $0x20] sm:$0x1]  ;;  %v7474_v5 = vpop.f32.mrf.mxu2  ;;  %3922 = vmatpush.bf16.msrb.mxu1 %v5588_v50  ;;  %v2777_v50 = vshll.u32 %v7397_v36, 16 }
 0x25f   : > { %v2130_v63 = vrot.slane %v2128_v32, 7  ;;  %v2464_v32 = vld [vmem:[#allocation2 + $0x9c] sm:$0x1]  ;;  %8372 = vst [vmem:[#allocation18_spill] sm:$0xff] %v7474_v5 }
 0x260   : > { %vm1788_vm4 = vcmp.ge.f32.partialorder %v1752_v45, 0.0  ;;  %v1824_v52 = vmul.f32 0.3, %v1752_v45  ;;  %v2746_v6 = vpack.c.b16 %v2730_v0, %v2730_v0 }
 0x261   : > { %v2133_v51 = vor.u32 %v2131_v59, %v2130_v63  ;;  %v2768_v59 = vor.u32 %v2767_v31, %v2763_v24 }
 0x262   : > { %v2420_v61 = vld [vmem:[#allocation2 + $0xa4] sm:$0x1]  ;;  %v1860_v0 = vsel %vm1788_vm4, %v1752_v45, %v1824_v52  ;;  %v2995_v38 = vrot.slane %v2746_v6, 1  ;;  %v2902_v33 = vshll.u32 %v2746_v6, 16  ;;  %v7483_v45 = vpop.f32.mrf.mxu3  ;;  %v2720_v52 = vunpack.c.l.b16 %v2560_v21 }
 0x263   : > { %v2465_v18 = vsel %vm6680_vm9, %v2420_v61, %v2464_v32  ;;  %v2324_v34 = vsel %vm6649_vm15, %v2133_v51, %v2323_v3  ;;  %v1896_v14 = vpack.c.bf16 %v1860_v0, %v1860_v0  ;;  %8373 = vst [vmem:[#allocation19_spill] sm:$0xff] %v7483_v45  ;;  %v7487_v24 = vsel %vm617_vm1, %v2768_v59, %v2772_v2  ;;  %v3689_v25 = vpop.f32.mrf.mxu1  ;;  %v2537_v21 = vld [vmem:[#allocation2 + $0xa4] sm:$0x1] }
 0x264   : > { %2466 = vst [vmem:[#allocation2 + $0x9c] sm:$0x1] %v2465_v18  ;;  %v7481_v53 = vsel %vm870_vm0, %v2994_v16, %v2995_v38  ;;  %v2904_v5 = vrot.slane %v2902_v33, 1  ;;  %v2327_v33 = vld [vmem:[#allocation2 + $0xb0] sm:$0x1]  ;;  %v7494_v16 = vpack.c.b16 %v2720_v52, %v2720_v52 }
 0x265   : > { %2325 = vst [vmem:[#allocation2 + $0xa8] sm:$0xf] %v2324_v34  ;;  %v2136_v31 = vshrl.u32 %v1896_v14, 16  ;;  %3896 = vmatmul.bf16.gmra.mxu3 %v7481_v53  ;;  %v2139_v38 = vshll.u32 %v1896_v14, 16  ;;  %v2134_v34 = vrot.slane %v2130_v63, 4 }
 0x266   : > { %3752 = vmatmul.bf16.gmra.mxu0 %v7487_v24  ;;  %v7491_v3 = vsel %vm617_vm1, %v2900_v15, %v2904_v5  ;;  %v2782_v18 = vshll.u32 %v7494_v16, 16 }
 0x267   : > { %v2138_v6 = vrot.slane %v2136_v31, 7  ;;  %3807 = vmatmul.bf16.gmra.mxu2 %v7491_v3 }
 0x269   : > { %v2141_v20 = vor.u32 %v2139_v38, %v2138_v6  ;;  %v2143_v51 = vrot.slane %v2138_v6, 4  ;;  %v2779_v6 = vrot.slane %v2777_v50, 1 }
 0x26a   : > { %v3778_v8 = vpop.f32.mrf.mxu2  ;;  %v1664_v2 = vpop.f32.mrf.mxu0 }
 0x26b   : > { %v2492_v62 = vld [vmem:[#allocation2 + $0x9c] sm:$0x1]  ;;  %v2142_v15 = vsel %vm6672_vm14, %v2134_v34, %v2141_v20  ;;  %v2328_v14 = vsel %vm6680_vm9, %v2143_v51, %v2327_v33  ;;  %v3779_v61 = vadd.f32 %v3778_v8, %v3689_v25  ;;  %v1713_v63 = vmul.f32 %v7385_v1, %v1664_v2  ;;  %v3867_v0 = vpop.f32.mrf.mxu3 }
 0x26c   : > { %v7502_v32 = vld [vmem:[#allocation2 + $0x9c] sm:$0xff]  ;;  %v2538_v5 = vsel %vm6766_vm13, %v2492_v62, %v2537_v21  ;;  %2326 = vst [vmem:[#allocation2 + $0xac] sm:$0xf] %v2142_v15  ;;  %v2775_v33 = vshrl.u32 %v7397_v36, 16  ;;  %v2784_v34 = vrot.slane %v2782_v18, 1 }
 0x26d   : > { %2539 = vst [vmem:[#allocation2 + $0xa4] sm:$0x1] %v2538_v5  ;;  %v1753_v59 = vadd.f32 %v7394_v55, %v1713_v63  ;;  %3723 = vmatmul.bf16.gmra.mxu1 %v7502_v32  ;;  %v7509_v31 = vadd.f32 %v3867_v0, %v3779_v61  ;;  %v2909_v2 = vshll.u32 %v7502_v32, 16  ;;  %v2330_v18 = vld [vmem:[#allocation2 + $0xb4] sm:$0xf] }
 0x26e   : > { %2329 = vst [vmem:[#allocation2 + $0xb0] sm:$0x1] %v2328_v14  ;;  %v2780_v8 = vor.u32 %v2779_v6, %v2775_v33  ;;  %v2467_v14 = vld [vmem:[#allocation2 + $0xa8] sm:$0x1] }
 0x26f   : > { %8374 = vst [vmem:[#allocation20_spill] sm:$0xff] %v7509_v31  ;;  %vm1789_vm5 = vcmp.ge.f32.partialorder %v1753_v59, 0.0  ;;  %v1825_v52 = vmul.f32 0.3, %v1753_v59  ;;  %v2911_v33 = vrot.slane %v2909_v2, 1  ;;  %v5603_v2 = vld [vmem:[%s8296_s4 + $0x148] sm:$0xff] }
 0x270   : > { %v7516_v63 = vsel %vm617_vm1, %v2780_v8, %v2784_v34  ;;  %v5595_v34 = vld [vmem:[%s8296_s4 + $0x108] sm:$0xff]  ;;  %4101 = vmatpush.bf16.msrb.mxu3 %v5603_v2  ;;  %v2404_v2 = vld [vmem:[#allocation2 + $0xd4] sm:$0x1] }
 0x271   : > { %v1861_v38 = vsel %vm1789_vm5, %v1753_v59, %v1825_v52  ;;  %v2400_v52 = vld [vmem:[#allocation2 + $0xcc] sm:$0xf]  ;;  %4012 = vmatpush.bf16.msrb.mxu2 %v5595_v34 }
 0x272   : > { %v1897_v25 = vpack.c.bf16 %v1861_v38, %v1861_v38  ;;  %v1666_v20 = vpop.f32.mrf.mxu0 }
 0x273   : > { %v1714_v51 = vmul.f32 %v7385_v1, %v1666_v20 }
 0x274   : > { %v2145_v62 = vshrl.u32 %v1897_v25, 16  ;;  %v2593_v21 = vld [vmem:[#allocation2 + $0xa4] sm:$0x1]  ;;  %v2148_v59 = vshll.u32 %v1897_v25, 16  ;;  %v5587_v25 = vld [vmem:[%s8296_s4 + $0xc8] sm:$0xff] }
 0x275   : > { %v2421_v15 = vld [vmem:[#allocation2 + $0xb0] sm:$0x1]  ;;  %v1754_v61 = vadd.f32 %v7394_v55, %v1714_v51  ;;  %v2731_v50 = vunpack.c.l.b16 %v2593_v21  ;;  %v2997_v51 = vrot.slane %v7502_v32, 1  ;;  %v2907_v21 = vshrl.u32 %v7502_v32, 16  ;;  %3923 = vmatpush.bf16.msrb.mxu1 %v5587_v25 }
 0x276   : > { %v2468_v5 = vsel %vm6680_vm9, %v2421_v15, %v2467_v14  ;;  %v2147_v0 = vrot.slane %v2145_v62, 7  ;;  %3757 = vmatmul.bf16.gmra.mxu0 %v7516_v63  ;;  %v7532_v14 = vpop.f32.mrf.mxu1 }
 0x277   : > { %2469 = vst [vmem:[#allocation2 + $0xa8] sm:$0x1] %v2468_v5  ;;  %vm1790_vm6 = vcmp.ge.f32.partialorder %v1754_v61, 0.0  ;;  %v1826_v6 = vmul.f32 0.3, %v1754_v61  ;;  %v2747_v38 = vpack.c.b16 %v2731_v50, %v2731_v50 }
 0x278   : > { %v2150_v20 = vor.u32 %v2148_v59, %v2147_v0  ;;  %8375 = vst [vmem:[#allocation21_spill] sm:$0xff] %v7532_v14  ;;  %v7538_v59 = vpop.f32.mrf.mxu2  ;;  %v7543_v14 = vpop.f32.mrf.mxu3 }
 0x279   : > { %v1862_v8 = vsel %vm1790_vm6, %v1754_v61, %v1826_v6  ;;  %v2998_v62 = vrot.slane %v2747_v38, 1  ;;  %v2914_v15 = vshll.u32 %v2747_v38, 16  ;;  %8376 = vst [vmem:[#allocation22_spill] sm:$0xff] %v7538_v59  ;;  %v2912_v6 = vor.u32 %v2911_v33, %v2907_v21 }
 0x27a   : > { %v2331_v50 = vsel %vm6649_vm15, %v2150_v20, %v2330_v18  ;;  %v2401_v5 = vsel %vm6649_vm15, %v2150_v20, %v2400_v52  ;;  %v1898_v45 = vpack.c.bf16 %v1862_v8, %v1862_v8  ;;  %8377 = vst [vmem:[#allocation23_spill] sm:$0xff] %v7543_v14  ;;  %v2540_v18 = vld [vmem:[#allocation2 + $0xb0] sm:$0x1]  ;;  %v2334_v8 = vld [vmem:[#allocation2 + $0xbc] sm:$0x1] }
 0x27b   : > { %2332 = vst [vmem:[#allocation2 + $0xb4] sm:$0xf] %v2331_v50  ;;  %v7541_v61 = vsel %vm870_vm0, %v2997_v51, %v2998_v62  ;;  %v2916_v38 = vrot.slane %v2914_v15, 1  ;;  %v2151_v62 = vrot.slane %v2147_v0, 4 }
 0x27c   : > { %2402 = vst [vmem:[#allocation2 + $0xcc] sm:$0xf] %v2401_v5  ;;  %v2153_v31 = vshrl.u32 %v1898_v45, 16  ;;  %3901 = vmatmul.bf16.gmra.mxu3 %v7541_v61  ;;  %v2156_v25 = vshll.u32 %v1898_v45, 16  ;;  %v2959_v5 = vrot.slane %v7402_v48, 1 }
 0x27d   : > { %v7547_v52 = vsel %vm617_vm1, %v2912_v6, %v2916_v38 }
 0x27e   : > { %v2493_v20 = vld [vmem:[#allocation2 + $0xa8] sm:$0x1]  ;;  %v2155_v34 = vrot.slane %v2153_v31, 7  ;;  %3812 = vmatmul.bf16.gmra.mxu2 %v7547_v52  ;;  %v3694_v31 = vpop.f32.mrf.mxu1 }
 0x27f   : > { %v7550_v51 = vld [vmem:[#allocation2 + $0xa8] sm:$0xff]  ;;  %v2541_v33 = vsel %vm6766_vm13, %v2493_v20, %v2540_v18 }
 0x280   : > { %2542 = vst [vmem:[#allocation2 + $0xb0] sm:$0x1] %v2541_v33  ;;  %v2158_v21 = vor.u32 %v2156_v25, %v2155_v34  ;;  %v2160_v15 = vrot.slane %v2155_v34, 4  ;;  %3728 = vmatmul.bf16.gmra.mxu1 %v7550_v51  ;;  %v2958_v34 = vrot.slane %v7293_v47, 1  ;;  %v3872_v25 = vpop.f32.mrf.mxu3  ;;  %v2921_v47 = vshll.u32 %v7550_v51, 16 }
 0x281   : > { %v1669_v50 = vpop.f32.mrf.mxu0  ;;  %v3783_v38 = vpop.f32.mrf.mxu2 }
 0x282   : > { %v2159_v45 = vsel %vm6672_vm14, %v2151_v62, %v2158_v21  ;;  %v2335_v6 = vsel %vm6680_vm9, %v2160_v15, %v2334_v8  ;;  %v1715_v18 = vmul.f32 %v7385_v1, %v1669_v50  ;;  %v2405_v0 = vsel %vm6680_vm9, %v2160_v15, %v2404_v2  ;;  %v5617_v8 = vld [vmem:[%s8296_s4 + $0x1b8] sm:$0xff] }
 0x283   : > { %2333 = vst [vmem:[#allocation2 + $0xb8] sm:$0xf] %v2159_v45  ;;  %v3784_v20 = vadd.f32 %v3783_v38, %v3694_v31  ;;  %v2960_v33 = vsel %vm870_vm0, %v2958_v34, %v2959_v5  ;;  %4184 = vmatpush.bf16.msra.mxu0 %v5617_v8  ;;  %v5616_v5 = vld [vmem:[%s8296_s4 + $0x1b0] sm:$0xff]  ;;  %v2923_v8 = vrot.slane %v2921_v47, 1  ;;  %v2476_v14 = vld [vmem:[#allocation2 + $0xcc] sm:$0x1] }
 0x284   : > { %2336 = vst [vmem:[#allocation2 + $0xbc] sm:$0x1] %v2335_v6  ;;  %v1755_v48 = vadd.f32 %v7394_v55, %v1715_v18  ;;  %v2470_v6 = vld [vmem:[#allocation2 + $0xb4] sm:$0x1]  ;;  %v2337_v47 = vld [vmem:[#allocation2 + $0xc0] sm:$0xf] }
 0x285   : > { %2403 = vst [vmem:[#allocation2 + $0xd0] sm:$0xf] %v2159_v45  ;;  %v7569_v62 = vadd.f32 %v3872_v25, %v3784_v20 }
 0x286   : > { %2406 = vst [vmem:[#allocation2 + $0xd4] sm:$0x1] %v2405_v0  ;;  %vm1791_vm7 = vcmp.ge.f32.partialorder %v1755_v48, 0.0  ;;  %v1827_v21 = vmul.f32 0.3, %v1755_v48  ;;  %3836 = vmatmul.bf16.vlgmr.msrb.gmra.mxu0 %v2960_v33  ;;  %v3000_v0 = vrot.slane %v7550_v51, 1 }
 0x287   : > { %8378 = vst [vmem:[#allocation24_spill] sm:$0xff] %v7569_v62  ;;  %v2596_v15 = vld [vmem:[#allocation2 + $0xb0] sm:$0x1]  ;;  %v2919_v33 = vshrl.u32 %v7550_v51, 16  ;;  %4185 = vmatpush.bf16.msra.mxu0 %v5616_v5 }
 0x288   : > { %v1863_v2 = vsel %vm1791_vm7, %v1755_v48, %v1827_v21  ;;  %v2732_v50 = vunpack.c.l.b16 %v2596_v15  ;;  %v4796_v48 = vld [vmem:[%s8299_s7] sm:$0x3]  ;;  %v7583_v15 = vpop.f32.mrf.mxu1 }
 0x289   : > { %v1899_v31 = vpack.c.bf16 %v1863_v2, %v1863_v2  ;;  %v1671_v45 = vpop.f32.mrf.mxu0  ;;  %8379 = vst [vmem:[#allocation25_spill] sm:$0xff] %v7583_v15 }
 0x28a   : > { %v1716_v38 = vmul.f32 %v7385_v1, %v1671_v45  ;;  %v2748_v18 = vpack.c.b16 %v2732_v50, %v2732_v50  ;;  %v7585_v1 = vpop.f32.mrf.mxu2 }
 0x28b   : > { %v2422_v20 = vld [vmem:[#allocation2 + $0xbc] sm:$0x1]  ;;  %v2162_v34 = vshrl.u32 %v1899_v31, 16  ;;  %v2165_v25 = vshll.u32 %v1899_v31, 16  ;;  %8380 = vst [vmem:[#allocation26_spill] sm:$0xff] %v7585_v1 }
 0x28c   : > { %v2471_v21 = vsel %vm6680_vm9, %v2422_v20, %v2470_v6  ;;  %v1756_v2 = vadd.f32 %v7394_v55, %v1716_v38  ;;  %v3001_v50 = vrot.slane %v2748_v18, 1  ;;  %v2926_v45 = vshll.u32 %v2748_v18, 16  ;;  %v5594_v6 = vld [vmem:[%s8296_s4 + $0x100] sm:$0xff]  ;;  %v5615_v55 = vld [vmem:[%s8296_s4 + $0x1a8] sm:$0xff]  ;;  %v7596_v38 = vpop.f32.mrf.mxu3 }
 0x28d   : > { %v2424_v31 = vld [vmem:[#allocation2 + $0xd4] sm:$0x1]  ;;  %2472 = vst [vmem:[#allocation2 + $0xb4] sm:$0x1] %v2471_v21  ;;  %v2164_v59 = vrot.slane %v2162_v34, 7  ;;  %v2924_v20 = vor.u32 %v2923_v8, %v2919_v33  ;;  %v5602_v34 = vld [vmem:[%s8296_s4 + $0x140] sm:$0xff]  ;;  %4013 = vmatpush.bf16.msrb.mxu2 %v5594_v6  ;;  %4186 = vmatpush.bf16.msra.mxu0 %v5615_v55 }
 0x28e   : > { %v2477_v5 = vsel %vm6680_vm9, %v2424_v31, %v2476_v14  ;;  %vm1792_vm8 = vcmp.ge.f32.partialorder %v1756_v2, 0.0  ;;  %v1828_v62 = vmul.f32 0.3, %v1756_v2  ;;  %v7599_v18 = vsel %vm870_vm0, %v3000_v0, %v3001_v50  ;;  %v5586_v14 = vld [vmem:[%s8296_s4 + $0xc0] sm:$0xff]  ;;  %4102 = vmatpush.bf16.msrb.mxu3 %v5602_v34  ;;  %v2543_v50 = vld [vmem:[#allocation2 + $0xbc] sm:$0x1] }
 0x28f   : > { %2478 = vst [vmem:[#allocation2 + $0xcc] sm:$0x1] %v2477_v5  ;;  %v2928_v21 = vrot.slane %v2926_v45, 1  ;;  %v4850_v31 = vsel %vm8382_vm10, %v4796_v48, 0  ;;  %v2167_v1 = vor.u32 %v2165_v25, %v2164_v59  ;;  %3906 = vmatmul.bf16.gmra.mxu3 %v7599_v18  ;;  %v2962_v5 = vrot.slane %v7447_v22, 1  ;;  %3924 = vmatpush.bf16.msrb.mxu1 %v5586_v14  ;;  %v5614_v8 = vld [vmem:[%s8296_s4 + $0x1a0] sm:$0xff] }
 0x290   : > { %8381 = vst [vmem:[#allocation27_spill] sm:$0xff] %v7599_v18  ;;  %v1864_v15 = vsel %vm1792_vm8, %v1756_v2, %v1828_v62  ;;  %v2961_v62 = vrot.slane %v7331_v9, 1  ;;  %v3699_v45 = vpop.f32.mrf.mxu1  ;;  %v5613_v34 = vld [vmem:[%s8296_s4 + $0x198] sm:$0xff] }
 0x291   : > { %v1900_v0 = vpack.c.bf16 %v1864_v15, %v1864_v15  ;;  %v7611_v33 = vsel %vm617_vm1, %v2924_v20, %v2928_v21  ;;  %v2338_v48 = vsel %vm6649_vm15, %v2167_v1, %v2337_v47  ;;  %v2168_v1 = vrot.slane %v2164_v59, 4  ;;  %v2341_v21 = vld [vmem:[#allocation2 + $0xc8] sm:$0x1]  ;;  %4187 = vmatpush.bf16.msra.mxu0 %v5614_v8  ;;  %v5633_v8 = vld [vmem:[%s8296_s4 + $0x238] sm:$0xff] }
 0x292   : > { %3817 = vmatmul.bf16.gmra.mxu2 %v7611_v33  ;;  %2339 = vst [vmem:[#allocation2 + $0xc0] sm:$0xf] %v2338_v48  ;;  %4859 = vmatpush.bf16.msra.mxu3 %v4850_v31  ;;  %v7623_v20 = vsel %vm870_vm0, %v2961_v62, %v2962_v5 }
 0x293   : > { %v2170_v22 = vshrl.u32 %v1900_v0, 16  ;;  %v2173_v25 = vshll.u32 %v1900_v0, 16  ;;  %v1674_v15 = vpop.f32.mrf.mxu0  ;;  %v2549_v0 = vld [vmem:[#allocation2 + $0xd4] sm:$0x1]  ;;  %4362 = vmatpush.bf16.msra.mxu2 %v5633_v8 }
 0x294   : > { %v2494_v2 = vld [vmem:[#allocation2 + $0xb4] sm:$0x1]  ;;  %v3788_v6 = vpop.f32.mrf.mxu2  ;;  %v3877_v62 = vpop.f32.mrf.mxu3 }
 0x295   : > { %v7620_v55 = vld [vmem:[#allocation2 + $0xb4] sm:$0xff]  ;;  %v2544_v13 = vsel %vm6766_vm13, %v2494_v2, %v2543_v50  ;;  %v2172_v47 = vrot.slane %v2170_v22, 7  ;;  %v3789_v14 = vadd.f32 %v3788_v6, %v3699_v45  ;;  %4188 = vmatpush.bf16.msra.mxu0 %v5613_v34 }
 0x296   : > { %v2496_v31 = vld [vmem:[#allocation2 + $0xcc] sm:$0x1]  ;;  %2545 = vst [vmem:[#allocation2 + $0xbc] sm:$0x1] %v2544_v13  ;;  %3733 = vmatmul.bf16.gmra.mxu1 %v7620_v55  ;;  %3841 = vmatmul.bf16.gmra.mxu0 %v7623_v20  ;;  %v5625_v22 = vld [vmem:[%s8296_s4 + $0x1f8] sm:$0xff]  ;;  %v2933_v6 = vshll.u32 %v7620_v55, 16 }
 0x297   : > { %v2550_v5 = vsel %vm6766_vm13, %v2496_v31, %v2549_v0  ;;  %v2175_v48 = vor.u32 %v2173_v25, %v2172_v47  ;;  %v2177_v59 = vrot.slane %v2172_v47, 4  ;;  %v7640_v15 = vadd.f32 %v3877_v62, %v3789_v14  ;;  %v5612_v25 = vld [vmem:[%s8296_s4 + $0x190] sm:$0xff]  ;;  %4273 = vmatpush.bf16.msra.mxu1 %v5625_v22  ;;  %v5610_v0 = vld [vmem:[%s8296_s4 + $0x180] sm:$0xff]  ;;  %4363 = vmatpush.bf16.msra.mxu2 %v5632_v60 }
 0x298   : > { %2551 = vst [vmem:[#allocation2 + $0xd4] sm:$0x1] %v2550_v5  ;;  %v2935_v34 = vrot.slane %v2933_v6, 1  ;;  %v2965_v31 = vrot.slane %v7494_v16, 1  ;;  %v2931_v62 = vshrl.u32 %v7620_v55, 16 }
 0x299   : > { %v2176_v2 = vsel %vm6672_vm14, %v2168_v1, %v2175_v48  ;;  %v2342_v50 = vsel %vm6680_vm9, %v2177_v59, %v2341_v21  ;;  %4189 = vmatpush.bf16.msra.mxu0 %v5612_v25  ;;  %v7653_v1 = vpop.f32.mrf.mxu1  ;;  %v2473_v21 = vld [vmem:[#allocation2 + $0xc0] sm:$0x1]  ;;  %v3003_v48 = vrot.slane %v7620_v55, 1 }
 0x29a   : > { %2340 = vst [vmem:[#allocation2 + $0xc4] sm:$0xf] %v2176_v2 }
 0x29b   : > { %2343 = vst [vmem:[#allocation2 + $0xc8] sm:$0x1] %v2342_v50  ;;  %v1676_v45 = vpop.f32.mrf.mxu0  ;;  %v2964_v50 = vrot.slane %v7397_v36, 1 }
 0x29c   : > { %v7664_v16 = vpop.f32.mrf.mxu2  ;;  %v2936_v45 = vor.u32 %v2935_v34, %v2931_v62  ;;  %v7673_v57 = vpop.f32.mrf.mxu3 }
 0x29d   : > { %v2599_v13 = vld [vmem:[#allocation2 + $0xbc] sm:$0x1]  ;;  %4190 = vmatpush.bf16.msra.mxu0 %v5611_v58 }
 0x29e   : > { %v2733_v47 = vunpack.c.l.b16 %v2599_v13  ;;  %v7671_v13 = vsel %vm870_vm0, %v2964_v50, %v2965_v31 }
 0x2a0   : > { %v2749_v14 = vpack.c.b16 %v2733_v47, %v2733_v47 }
 0x2a1   : > { %4191 = vmatpush.bf16.msra.mxu0 %v5610_v0  ;;  %v3704_v58 = vpop.f32.mrf.mxu1 }
 0x2a2   : > { %v2423_v5 = vld [vmem:[#allocation2 + $0xc8] sm:$0x1]  ;;  %v3004_v59 = vrot.slane %v2749_v14, 1  ;;  %v2938_v8 = vshll.u32 %v2749_v14, 16 }
 0x2a3   : > { %v2474_v22 = vsel %vm6680_vm9, %v2423_v5, %v2473_v21  ;;  %v3659_v2 = vpop.f32.mrf.mxu0  ;;  %v2546_v21 = vld [vmem:[#allocation2 + $0xc8] sm:$0x1] }
 0x2a4   : > { %2475 = vst [vmem:[#allocation2 + $0xc0] sm:$0x1] %v2474_v22  ;;  %v7667_v25 = vsel %vm870_vm0, %v3003_v48, %v3004_v59  ;;  %v2940_v6 = vrot.slane %v2938_v8, 1 }
 0x2a5   : > { %8383 = vst [vmem:[#allocation28_spill] sm:$0xff] %v7667_v25  ;;  %3911 = vmatmul.bf16.gmra.mxu3 %v7667_v25 }
 0x2a6   : > { %v7676_v47 = vsel %vm617_vm1, %v2936_v45, %v2940_v6  ;;  %3846 = vmatmul.bf16.gmra.mxu0 %v7671_v13  ;;  %3925 = vmatmul.bf16.vlgmr.msrb.gmra.mxu1 %v7331_v9 }
 0x2a7   : > { %8384 = vst [vmem:[#allocation29_spill] sm:$0xff] %v7676_v47  ;;  %3822 = vmatmul.bf16.gmra.mxu2 %v7676_v47 }
 0x2a8   : > { %v3882_v48 = vpop.f32.mrf.mxu3 }
 0x2a9   : > { %v7685_v62 = vpop.f32.mrf.mxu1 }
 0x2aa   : > { %v3793_v5 = vpop.f32.mrf.mxu2  ;;  %8385 = vst [vmem:[#allocation30_spill] sm:$0xff] %v7685_v62 }
 0x2ab   : > { %v2495_v14 = vld [vmem:[#allocation2 + $0xc0] sm:$0x1]  ;;  %v3661_v34 = vpop.f32.mrf.mxu0  ;;  %v3794_v0 = vadd.f32 %v3793_v5, %v3704_v58 }
 0x2ac   : > { %v2547_v31 = vsel %vm6766_vm13, %v2495_v14, %v2546_v21 }
 0x2ad   : > { %2548 = vst [vmem:[#allocation2 + $0xc8] sm:$0x1] %v2547_v31  ;;  %v7683_v59 = vadd.f32 %v3882_v48, %v3794_v0  ;;  %v5836_v31 = vld [vmem:[#allocation2 + $0x24] sm:$0xff] }
 0x2b0   : > { %v7696_v50 = vpop.f32.mrf.mxu3 }
 0x2b1   : > { %v3709_v9 = vpop.f32.mrf.mxu1  ;;  %8387 = vst [vmem:[#allocation32_spill] sm:$0xff] %v7696_v50  ;;  %v5837_v50 = vld [vmem:[#allocation2 + $0x30] sm:$0xff] }
 0x2b2   : > { %v7694_v22 = vpop.f32.mrf.mxu2 }
 0x2b3   : > { %v3664_v8 = vpop.f32.mrf.mxu0  ;;  %8386 = vst [vmem:[#allocation31_spill] sm:$0xff] %v7694_v22 }
 0x2b5   : > { %4103 = vmatmul.bf16.vlgmr.msrb.gmra.mxu3 %v7623_v20  ;;  %v5624_v20 = vld [vmem:[%s8296_s4 + $0x1f0] sm:$0xff] }
 0x2b6   : > { %3930 = vmatmul.bf16.gmra.mxu1 %v7397_v36  ;;  %4192 = vmatmul.bf16.vlgmr.msra.gmra.mxu0 %v7397_v36 }
 0x2b7   : > { %4014 = vmatmul.bf16.vlgmr.msrb.gmra.mxu2 %v7487_v24  ;;  %4274 = vmatpush.bf16.msra.mxu1 %v5624_v20 }
 0x2b9   : > { %v7701_v36 = vpop.f32.mrf.mxu1 }
 0x2ba   : > { %8388 = vst [vmem:[#allocation33_spill] sm:$0xff] %v7701_v36 }
 0x2bb   : > { %v3666_v45 = vpop.f32.mrf.mxu0 }
 0x2bf   : > { %v3887_v58 = vpop.f32.mrf.mxu3 }
 0x2c1   : > { %v3798_v6 = vpop.f32.mrf.mxu2  ;;  %v3714_v5 = vpop.f32.mrf.mxu1 }
 0x2c2   : > { %v3799_v24 = vadd.f32 %v3798_v6, %v3709_v9 }
 0x2c3   : > { %v3669_v21 = vpop.f32.mrf.mxu0 }
 0x2c4   : > { %v7703_v14 = vadd.f32 %v3887_v58, %v3799_v24 }
 0x2c5   : > { %4108 = vmatmul.bf16.gmra.mxu3 %v7671_v13 }
 0x2c6   : > { %8389 = vst [vmem:[#allocation34_spill] sm:$0xff] %v7703_v14  ;;  %3935 = vmatmul.bf16.gmra.mxu1 %v5836_v31  ;;  %4197 = vmatmul.bf16.gmra.mxu0 %v5836_v31  ;;  %v5631_v31 = vld [vmem:[%s8296_s4 + $0x228] sm:$0xff] }
 0x2c7   : > { %4019 = vmatmul.bf16.gmra.mxu2 %v7516_v63  ;;  %v7709_v60 = vpop.f32.mrf.mxu3 }
 0x2c8   : > { %8391 = vst [vmem:[#allocation36_spill] sm:$0xff] %v7709_v60  ;;  %v5623_v60 = vld [vmem:[%s8296_s4 + $0x1e8] sm:$0xff]  ;;  %4364 = vmatpush.bf16.msra.mxu2 %v5631_v31 }
 0x2c9   : > { %v7707_v48 = vpop.f32.mrf.mxu2  ;;  %v7711_v36 = vpop.f32.mrf.mxu1  ;;  %4275 = vmatpush.bf16.msra.mxu1 %v5623_v60 }
 0x2ca   : > { %8390 = vst [vmem:[#allocation35_spill] sm:$0xff] %v7707_v48 }
 0x2cb   : > { %v3671_v0 = vpop.f32.mrf.mxu0  ;;  %8392 = vst [vmem:[#allocation37_spill] sm:$0xff] %v7711_v36 }
 0x2d2   : > { %v3892_v58 = vpop.f32.mrf.mxu3 }
 0x2d3   : > { %v3748_v20 = vpop.f32.mrf.mxu0 }
 0x2d4   : > { %v3803_v9 = vpop.f32.mrf.mxu2  ;;  %v3749_v6 = vadd.f32 %v3748_v20, %v3659_v2 }
 0x2d5   : > { %v3804_v24 = vadd.f32 %v3803_v9, %v3714_v5  ;;  %4113 = vmatmul.bf16.gmra.mxu3 %v7045_v37  ;;  %v3719_v5 = vpop.f32.mrf.mxu1  ;;  %v5838_v37 = vld [vmem:[#allocation2 + $0x3c] sm:$0xff] }
 0x2d6   : > { %3940 = vmatmul.bf16.gmra.mxu1 %v5837_v50  ;;  %4202 = vmatmul.bf16.gmra.mxu0 %v5837_v50 }
 0x2d7   : > { %4024 = vmatmul.bf16.gmra.mxu2 %v7050_v56  ;;  %v7721_v36 = vadd.f32 %v3892_v58, %v3804_v24 }
 0x2d9   : > { %8393 = vst [vmem:[#allocation38_spill] sm:$0xff] %v7721_v36 }
 0x2da   : > { %v7723_v9 = vpop.f32.mrf.mxu3 }
 0x2db   : > { %v3750_v2 = vpop.f32.mrf.mxu0  ;;  %8394 = vst [vmem:[#allocation39_spill] sm:$0xff] %v7723_v9 }
 0x2dc   : > { %v3751_v20 = vadd.f32 %v3750_v2, %v3661_v34  ;;  %v7725_v50 = vpop.f32.mrf.mxu2 }
 0x2dd   : > { %8395 = vst [vmem:[#allocation40_spill] sm:$0xff] %v7725_v50  ;;  %v3721_v62 = vpop.f32.mrf.mxu1 }
 0x2e3   : > { %v3753_v48 = vpop.f32.mrf.mxu0 }
 0x2e4   : > { %v3754_v22 = vadd.f32 %v3753_v48, %v3664_v8 }
 0x2e5   : > { %4118 = vmatmul.bf16.gmra.mxu3 %v7094_v19 }
 0x2e6   : > { %3945 = vmatmul.bf16.gmra.mxu1 %v5838_v37  ;;  %4207 = vmatmul.bf16.gmra.mxu0 %v5838_v37  ;;  %v5839_v37 = vld [vmem:[#allocation2 + $0x48] sm:$0xff] }
 0x2e7   : > { %4029 = vmatmul.bf16.gmra.mxu2 %v7099_v29 }
 0x2e8   : > { %v3897_v24 = vpop.f32.mrf.mxu3 }
 0x2ea   : > { %v3808_v58 = vpop.f32.mrf.mxu2  ;;  %v3724_v2 = vpop.f32.mrf.mxu1 }
 0x2eb   : > { %v3809_v60 = vadd.f32 %v3808_v58, %v3719_v5  ;;  %v3755_v31 = vpop.f32.mrf.mxu0 }
 0x2ec   : > { %v3756_v36 = vadd.f32 %v3755_v31, %v3666_v45  ;;  %v5630_v45 = vld [vmem:[%s8296_s4 + $0x220] sm:$0xff] }
 0x2ed   : > { %v7729_v34 = vadd.f32 %v3897_v24, %v3809_v60  ;;  %4365 = vmatpush.bf16.msra.mxu2 %v5630_v45 }
 0x2ef   : > { %8396 = vst [vmem:[#allocation41_spill] sm:$0xff] %v7729_v34 }
 0x2f0   : > { %v3899_v8 = vpop.f32.mrf.mxu3 }
 0x2f2   : > { %v3810_v9 = vpop.f32.mrf.mxu2  ;;  %v3726_v5 = vpop.f32.mrf.mxu1 }
 0x2f3   : > { %v3811_v50 = vadd.f32 %v3810_v9, %v3721_v62  ;;  %v3758_v14 = vpop.f32.mrf.mxu0 }
 0x2f4   : > { %v3759_v48 = vadd.f32 %v3758_v14, %v3669_v21  ;;  %v5622_v21 = vld [vmem:[%s8296_s4 + $0x1e0] sm:$0xff] }
 0x2f5   : > { %4123 = vmatmul.bf16.gmra.mxu3 %v7129_v10  ;;  %v7732_v19 = vadd.f32 %v3899_v8, %v3811_v50  ;;  %4276 = vmatpush.bf16.msra.mxu1 %v5622_v21 }
 0x2f6   : > { %3950 = vmatmul.bf16.gmra.mxu1 %v5839_v37  ;;  %4212 = vmatmul.bf16.gmra.mxu0 %v5839_v37  ;;  %v5840_v37 = vld [vmem:[#allocation2 + $0x54] sm:$0xff] }
 0x2f7   : > { %8397 = vst [vmem:[#allocation42_spill] sm:$0xff] %v7732_v19  ;;  %4034 = vmatmul.bf16.gmra.mxu2 %v7136_v40 }
 0x2fb   : > { %v3760_v24 = vpop.f32.mrf.mxu0 }
 0x2fc   : > { %v3761_v62 = vadd.f32 %v3760_v24, %v3671_v0 }
 0x2fd   : > { %v3729_v14 = vpop.f32.mrf.mxu1 }
 0x2ff   : > { %v3902_v9 = vpop.f32.mrf.mxu3 }
 0x301   : > { %v3813_v50 = vpop.f32.mrf.mxu2 }
 0x302   : > { %v3814_v58 = vadd.f32 %v3813_v50, %v3724_v2 }
 0x303   : > { %v3837_v60 = vpop.f32.mrf.mxu0 }
 0x304   : > { %v3838_v31 = vadd.f32 %v3837_v60, %v3749_v6  ;;  %v7741_v8 = vadd.f32 %v3902_v9, %v3814_v58 }
 0x305   : > { %4128 = vmatmul.bf16.gmra.mxu3 %v7184_v41  ;;  %v3731_v45 = vpop.f32.mrf.mxu1  ;;  %v5841_v41 = vld [vmem:[#allocation2 + $0x60] sm:$0xff] }
 0x306   : > { %3955 = vmatmul.bf16.gmra.mxu1 %v5840_v37  ;;  %4217 = vmatmul.bf16.gmra.mxu0 %v5840_v37 }
 0x307   : > { %4039 = vmatmul.bf16.gmra.mxu2 %v7188_v30  ;;  %v3904_v19 = vpop.f32.mrf.mxu3 }
 0x309   : > { %v3815_v0 = vpop.f32.mrf.mxu2 }
 0x30a   : > { %v3816_v24 = vadd.f32 %v3815_v0, %v3726_v5  ;;  %v5629_v5 = vld [vmem:[%s8296_s4 + $0x218] sm:$0xff] }
 0x30b   : > { %v3839_v10 = vpop.f32.mrf.mxu0  ;;  %4366 = vmatpush.bf16.msra.mxu2 %v5629_v5 }
 0x30c   : > { %v3840_v21 = vadd.f32 %v3839_v10, %v3751_v20  ;;  %v7745_v34 = vadd.f32 %v3904_v19, %v3816_v24 }
 0x30e   : > { %8398 = vst [vmem:[#allocation43_spill] sm:$0xff] %v7745_v34 }
 0x312   : > { %v3907_v6 = vpop.f32.mrf.mxu3 }
 0x313   : > { %v3734_v2 = vpop.f32.mrf.mxu1  ;;  %v3842_v50 = vpop.f32.mrf.mxu0 }
 0x314   : > { %v3843_v58 = vadd.f32 %v3842_v50, %v3754_v22  ;;  %v5621_v22 = vld [vmem:[%s8296_s4 + $0x1d8] sm:$0xff] }
 0x315   : > { %v3818_v9 = vpop.f32.mrf.mxu2  ;;  %4133 = vmatmul.bf16.gmra.mxu3 %v7227_v35  ;;  %4277 = vmatpush.bf16.msra.mxu1 %v5621_v22 }
 0x316   : > { %v3819_v60 = vadd.f32 %v3818_v9, %v3729_v14  ;;  %3960 = vmatmul.bf16.gmra.mxu1 %v5841_v41  ;;  %4222 = vmatmul.bf16.gmra.mxu0 %v5841_v41 }
 0x317   : > { %4044 = vmatmul.bf16.gmra.mxu2 %v7232_v7 }
 0x318   : > { %v7752_v10 = vadd.f32 %v3907_v6, %v3819_v60  ;;  %v5842_v6 = vld [vmem:[#allocation2 + $0x6c] sm:$0xff] }
 0x31a   : > { %v3909_v24 = vpop.f32.mrf.mxu3 }
 0x31b   : > { %v3736_v19 = vpop.f32.mrf.mxu1  ;;  %v3844_v20 = vpop.f32.mrf.mxu0 }
 0x31c   : > { %v3845_v0 = vadd.f32 %v3844_v20, %v3756_v36 }
 0x31d   : > { %v3820_v37 = vpop.f32.mrf.mxu2 }
 0x31e   : > { %v3821_v14 = vadd.f32 %v3820_v37, %v3731_v45 }
 0x320   : > { %v7757_v41 = vadd.f32 %v3909_v24, %v3821_v14 }
 0x322   : > { %8399 = vst [vmem:[#allocation44_spill] sm:$0xff] %v7757_v41 }
 0x323   : > { %v3926_v50 = vpop.f32.mrf.mxu1  ;;  %v3847_v9 = vpop.f32.mrf.mxu0 }
 0x324   : > { %v3927_v35 = vadd.f32 %v3926_v50, %v3838_v31  ;;  %v3848_v34 = vadd.f32 %v3847_v9, %v3759_v48 }
 0x325   : > { %4138 = vmatmul.bf16.gmra.mxu3 %v7259_v49  ;;  %v5843_v49 = vld [vmem:[#allocation2 + $0x78] sm:$0xff] }
 0x326   : > { %3965 = vmatmul.bf16.gmra.mxu1 %v5842_v6  ;;  %4227 = vmatmul.bf16.gmra.mxu0 %v5842_v6 }
 0x327   : > { %4049 = vmatmul.bf16.gmra.mxu2 %v7264_v11 }
 0x328   : > { %v3912_v36 = vpop.f32.mrf.mxu3 }
 0x32a   : > { %v3823_v60 = vpop.f32.mrf.mxu2 }
 0x32b   : > { %v3824_v5 = vadd.f32 %v3823_v60, %v3734_v2  ;;  %v3928_v20 = vpop.f32.mrf.mxu1  ;;  %v3849_v45 = vpop.f32.mrf.mxu0 }
 0x32c   : > { %v3929_v37 = vadd.f32 %v3928_v20, %v3840_v21  ;;  %v3850_v22 = vadd.f32 %v3849_v45, %v3761_v62  ;;  %v5628_v62 = vld [vmem:[%s8296_s4 + $0x210] sm:$0xff] }
 0x32d   : > { %v7761_v14 = vadd.f32 %v3912_v36, %v3824_v5  ;;  %4367 = vmatpush.bf16.msra.mxu2 %v5628_v62  ;;  %v5620_v5 = vld [vmem:[%s8296_s4 + $0x1d0] sm:$0xff] }
 0x32e   : > { %4278 = vmatpush.bf16.msra.mxu1 %v5620_v5 }
 0x330   : > { %v3914_v24 = vpop.f32.mrf.mxu3 }
 0x332   : > { %v3825_v41 = vpop.f32.mrf.mxu2 }
 0x333   : > { %v3826_v31 = vadd.f32 %v3825_v41, %v3736_v19  ;;  %v3931_v48 = vpop.f32.mrf.mxu1  ;;  %v4193_v9 = vpop.f32.mrf.mxu0 }
 0x334   : > { %v3932_v50 = vadd.f32 %v3931_v48, %v3843_v58 }
 0x335   : > { %4143 = vmatmul.bf16.gmra.mxu3 %v7296_v27  ;;  %v7764_v6 = vadd.f32 %v3914_v24, %v3826_v31 }
 0x336   : > { %3970 = vmatmul.bf16.gmra.mxu1 %v5843_v49  ;;  %4232 = vmatmul.bf16.gmra.mxu0 %v5843_v49 }
 0x337   : > { %4054 = vmatmul.bf16.gmra.mxu2 %v7304_v44 }
 0x338   : > { %v4104_v21 = vpop.f32.mrf.mxu3 }
 0x33a   : > { %v4015_v2 = vpop.f32.mrf.mxu2 }
 0x33b   : > { %v4016_v19 = vadd.f32 %v4015_v2, %v3927_v35  ;;  %v3933_v41 = vpop.f32.mrf.mxu1  ;;  %v4195_v36 = vpop.f32.mrf.mxu0  ;;  %v5844_v35 = vld [vmem:[#allocation2 + $0x84] sm:$0xff] }
 0x33c   : > { %v3934_v58 = vadd.f32 %v3933_v41, %v3845_v0 }
 0x33d   : > { %v4105_v60 = vadd.f32 %v4104_v21, %v4016_v19 }
 0x33f   : > { %v7773_v49 = vadd.f32 %v4193_v9, %v4105_v60 }
 0x340   : > { %v4106_v20 = vpop.f32.mrf.mxu3 }
 0x342   : > { %v4017_v45 = vpop.f32.mrf.mxu2 }
 0x343   : > { %v4018_v24 = vadd.f32 %v4017_v45, %v3929_v37  ;;  %v3936_v31 = vpop.f32.mrf.mxu1  ;;  %v4198_v27 = vpop.f32.mrf.mxu0 }
 0x344   : > { %v3937_v48 = vadd.f32 %v3936_v31, %v3848_v34 }
 0x345   : > { %v4107_v62 = vadd.f32 %v4106_v20, %v4018_v24  ;;  %4148 = vmatmul.bf16.gmra.mxu3 %v7360_v54 }
 0x346   : > { %3975 = vmatmul.bf16.gmra.mxu1 %v5844_v35  ;;  %4237 = vmatmul.bf16.gmra.mxu0 %v5844_v35 }
 0x347   : > { %4059 = vmatmul.bf16.gmra.mxu2 %v7367_v23  ;;  %v7777_v0 = vadd.f32 %v4195_v36, %v4107_v62  ;;  %v5845_v36 = vld [vmem:[#allocation2 + $0x90] sm:$0xff] }
 0x348   : > { %v4109_v21 = vpop.f32.mrf.mxu3 }
 0x34a   : > { %v4020_v2 = vpop.f32.mrf.mxu2 }
 0x34b   : > { %v4021_v9 = vadd.f32 %v4020_v2, %v3932_v50  ;;  %v3938_v19 = vpop.f32.mrf.mxu1  ;;  %v4200_v37 = vpop.f32.mrf.mxu0 }
 0x34c   : > { %v3939_v41 = vadd.f32 %v3938_v19, %v3850_v22  ;;  %v5627_v22 = vld [vmem:[%s8296_s4 + $0x208] sm:$0xff] }
 0x34d   : > { %v4110_v60 = vadd.f32 %v4109_v21, %v4021_v9  ;;  %4368 = vmatpush.bf16.msra.mxu2 %v5627_v22  ;;  %v5619_v9 = vld [vmem:[%s8296_s4 + $0x1c8] sm:$0xff] }
 0x34e   : > { %4279 = vmatpush.bf16.msra.mxu1 %v5619_v9 }
 0x34f   : > { %v7779_v5 = vadd.f32 %v4198_v27, %v4110_v60 }
 0x350   : > { %v4111_v34 = vpop.f32.mrf.mxu3 }
 0x352   : > { %v4022_v20 = vpop.f32.mrf.mxu2 }
 0x353   : > { %v4023_v45 = vadd.f32 %v4022_v20, %v3934_v58  ;;  %v3941_v24 = vpop.f32.mrf.mxu1  ;;  %v4203_v50 = vpop.f32.mrf.mxu0 }
 0x354   : > { %v3942_v31 = vadd.f32 %v3941_v24, %v7324_v26 }
 0x355   : > { %v4112_v35 = vadd.f32 %v4111_v34, %v4023_v45  ;;  %4153 = vmatmul.bf16.gmra.mxu3 %v7427_v4 }
 0x356   : > { %3980 = vmatmul.bf16.gmra.mxu1 %v5845_v36  ;;  %4242 = vmatmul.bf16.gmra.mxu0 %v5845_v36 }
 0x357   : > { %4064 = vmatmul.bf16.gmra.mxu2 %v7433_v12  ;;  %v7787_v27 = vadd.f32 %v4200_v37, %v4112_v35 }
 0x358   : > { %v4114_v62 = vpop.f32.mrf.mxu3 }
 0x35a   : > { %v4025_v58 = vpop.f32.mrf.mxu2 }
 0x35b   : > { %v4026_v21 = vadd.f32 %v4025_v58, %v3937_v48  ;;  %v3943_v26 = vpop.f32.mrf.mxu1  ;;  %v4205_v34 = vpop.f32.mrf.mxu0 }
 0x35d   : > { %v4115_v2 = vadd.f32 %v4114_v62, %v4026_v21 }
 0x35f   : > { %v7792_v19 = vadd.f32 %v4203_v50, %v4115_v2  ;;  %v3766_v50 = vadd.f32 %v7352_v17, %v7349_v46  ;;  %v5626_v46 = vld [vmem:[%s8296_s4 + $0x200] sm:$0xff] }
 0x360   : > { %v4116_v60 = vpop.f32.mrf.mxu3  ;;  %4369 = vmatpush.bf16.msra.mxu2 %v5626_v46  ;;  %v8406_v46 = vld [vmem:[#allocation18_spill] sm:$0xff] }
 0x361   : > { %v3855_v21 = vadd.f32 %v7357_v42, %v3766_v50 }
 0x362   : > { %v4027_v20 = vpop.f32.mrf.mxu2 }
 0x363   : > { %v4028_v45 = vadd.f32 %v4027_v20, %v3939_v41  ;;  %v3946_v37 = vpop.f32.mrf.mxu1  ;;  %v4208_v58 = vpop.f32.mrf.mxu0 }
 0x364   : > { %v3947_v24 = vadd.f32 %v3946_v37, %v7399_v28 }
 0x365   : > { %v4117_v35 = vadd.f32 %v4116_v60, %v4028_v45  ;;  %4158 = vmatmul.bf16.gmra.mxu3 %v7481_v53  ;;  %v3944_v60 = vadd.f32 %v3943_v26, %v3855_v21 }
 0x366   : > { %3985 = vmatmul.bf16.gmra.mxu1 %v7502_v32  ;;  %4247 = vmatmul.bf16.gmra.mxu0 %v7502_v32 }
 0x367   : > { %4069 = vmatmul.bf16.gmra.mxu2 %v7491_v3  ;;  %v7799_v48 = vadd.f32 %v4205_v34, %v4117_v35 }
 0x368   : > { %v4119_v36 = vpop.f32.mrf.mxu3 }
 0x36a   : > { %v4030_v22 = vpop.f32.mrf.mxu2 }
 0x36b   : > { %v4031_v41 = vadd.f32 %v4030_v22, %v3942_v31  ;;  %v3948_v62 = vpop.f32.mrf.mxu1  ;;  %v4210_v35 = vpop.f32.mrf.mxu0 }
 0x36d   : > { %v4120_v28 = vadd.f32 %v4119_v36, %v4031_v41  ;;  %v8402_v41 = vld [vmem:[#allocation16_spill] sm:$0xff] }
 0x36f   : > { %v7804_v2 = vadd.f32 %v4208_v58, %v4120_v28 }
 0x370   : > { %v4121_v9 = vpop.f32.mrf.mxu3 }
 0x372   : > { %v4032_v32 = vpop.f32.mrf.mxu2 }
 0x373   : > { %v4033_v20 = vadd.f32 %v4032_v32, %v3944_v60  ;;  %v3951_v45 = vpop.f32.mrf.mxu1 }
 0x374   : > { %v3952_v34 = vadd.f32 %v3951_v45, %v7449_v43  ;;  %v8400_v43 = vld [vmem:[#allocation15_spill] sm:$0xff] }
 0x375   : > { %v4122_v37 = vadd.f32 %v4121_v9, %v4033_v20  ;;  %4163 = vmatmul.bf16.gmra.mxu3 %v7541_v61  ;;  %v3771_v26 = vadd.f32 %v8400_v43, %v7413_v39  ;;  %v8403_v20 = vld [vmem:[#allocation20_spill] sm:$0xff] }
 0x376   : > { %3990 = vmatmul.bf16.gmra.mxu1 %v7550_v51  ;;  %4252 = vmatmul.bf16.gmra.mxu0 %v7550_v51  ;;  %v5618_v51 = vld [vmem:[%s8296_s4 + $0x1c0] sm:$0xff] }
 0x377   : > { %4074 = vmatmul.bf16.gmra.mxu2 %v7547_v52  ;;  %v7814_v17 = vadd.f32 %v4210_v35, %v4122_v37  ;;  %v3860_v58 = vadd.f32 %v8402_v41, %v3771_v26  ;;  %4280 = vmatpush.bf16.msra.mxu1 %v5618_v51  ;;  %v8405_v35 = vld [vmem:[#allocation17_spill] sm:$0xff]  ;;  %v8408_v26 = vld [vmem:[#allocation19_spill] sm:$0xff] }
 0x378   : > { %v4124_v42 = vpop.f32.mrf.mxu3 }
 0x379   : > { %v3949_v21 = vadd.f32 %v3948_v62, %v3860_v58  ;;  %v3776_v62 = vadd.f32 %v8406_v46, %v8405_v35  ;;  %v8411_v46 = vld [vmem:[#allocation21_spill] sm:$0xff] }
 0x37a   : > { %v4035_v31 = vpop.f32.mrf.mxu2 }
 0x37b   : > { %v4036_v36 = vadd.f32 %v4035_v31, %v3947_v24  ;;  %v3953_v22 = vpop.f32.mrf.mxu1 }
 0x37d   : > { %v7818_v50 = vadd.f32 %v4124_v42, %v4036_v36  ;;  %v3865_v36 = vadd.f32 %v8408_v26, %v3776_v62  ;;  %v8412_v62 = vld [vmem:[#allocation22_spill] sm:$0xff] }
 0x37f   : > { %8401 = vst [vmem:[#allocation15_spill] sm:$0xff] %v7818_v50  ;;  %v3954_v41 = vadd.f32 %v3953_v22, %v3865_v36 }
 0x380   : > { %v4126_v28 = vpop.f32.mrf.mxu3 }
 0x382   : > { %v4037_v9 = vpop.f32.mrf.mxu2 }
 0x383   : > { %v4038_v60 = vadd.f32 %v4037_v9, %v3949_v21  ;;  %v3956_v32 = vpop.f32.mrf.mxu1  ;;  %v2602_v9 = vld [vmem:[#allocation2 + $0xc8] sm:$0x1] }
 0x384   : > { %v3957_v45 = vadd.f32 %v3956_v32, %v8403_v20  ;;  %v5560_v32 = vld [vmem:[#allocation2 + $0xc0] sm:$0xff] }
 0x385   : > { %v7825_v37 = vadd.f32 %v4126_v28, %v4038_v60  ;;  %4168 = vmatmul.bf16.gmra.mxu3 %v7599_v18  ;;  %v3034_v22 = vshll.u32 %v5560_v32, 16 }
 0x386   : > { %3995 = vmatmul.bf16.gmra.mxu1 %v7620_v55  ;;  %4257 = vmatmul.bf16.gmra.mxu0 %v7620_v55  ;;  %v8409_v55 = vld [vmem:[#allocation24_spill] sm:$0xff] }
 0x387   : > { %8404 = vst [vmem:[#allocation16_spill] sm:$0xff] %v7825_v37  ;;  %4079 = vmatmul.bf16.gmra.mxu2 %v7611_v33 }
 0x388   : > { %v4129_v39 = vpop.f32.mrf.mxu3 }
 0x38a   : > { %v4040_v24 = vpop.f32.mrf.mxu2 }
 0x38b   : > { %v4041_v42 = vadd.f32 %v4040_v24, %v3952_v34  ;;  %v3958_v31 = vpop.f32.mrf.mxu1  ;;  %v3029_v34 = vunpack.c.l.b16 %v2602_v9  ;;  %v3044_v9 = vrot.slane %v5560_v32, 1 }
 0x38d   : > { %v7833_v43 = vadd.f32 %v4129_v39, %v4041_v42  ;;  %v3030_v35 = vpack.c.b16 %v3029_v34, %v3029_v34  ;;  %v3781_v42 = vadd.f32 %v8412_v62, %v8411_v46 }
 0x38f   : > { %8407 = vst [vmem:[#allocation20_spill] sm:$0xff] %v7833_v43 }
 0x390   : > { %v4131_v51 = vpop.f32.mrf.mxu3 }
 0x392   : > { %v4042_v58 = vpop.f32.mrf.mxu2 }
 0x393   : > { %v4043_v28 = vadd.f32 %v4042_v58, %v3954_v41  ;;  %v3961_v21 = vpop.f32.mrf.mxu1  ;;  %v3036_v58 = vrot.slane %v3034_v22, 1 }
 0x394   : > { %v3962_v60 = vadd.f32 %v3961_v21, %v8409_v55  ;;  %v8413_v21 = vld [vmem:[#allocation23_spill] sm:$0xff] }
 0x395   : > { %v7837_v20 = vadd.f32 %v4131_v51, %v4043_v28  ;;  %4173 = vmatmul.bf16.gmra.mxu3 %v7667_v25  ;;  %v3032_v51 = vshrl.u32 %v5560_v32, 16  ;;  %v3039_v28 = vshll.u32 %v3030_v35, 16  ;;  %v3870_v55 = vadd.f32 %v8413_v21, %v3781_v42 }
 0x396   : > { %4000 = vmatmul.bf16.gmra.mxu1 %v5560_v32  ;;  %4262 = vmatmul.bf16.gmra.mxu0 %v5560_v32  ;;  %v3045_v25 = vrot.slane %v3030_v35, 1 }
 0x397   : > { %8410 = vst [vmem:[#allocation17_spill] sm:$0xff] %v7837_v20  ;;  %4084 = vmatmul.bf16.gmra.mxu2 %v7676_v47  ;;  %v3959_v43 = vadd.f32 %v3958_v31, %v3870_v55  ;;  %v3037_v18 = vor.u32 %v3036_v58, %v3032_v51  ;;  %v3041_v34 = vrot.slane %v3039_v28, 1  ;;  %v8416_v58 = vld [vmem:[#allocation7_spill] sm:$0xff]  ;;  %v8417_v28 = vld [vmem:[#allocation6_spill] sm:$0xff] }
 0x398   : > { %v4134_v39 = vpop.f32.mrf.mxu3  ;;  %v8418_v21 = vpack.c.bf16 %v8416_v58, %v8417_v28  ;;  %v8420_v58 = vld [vmem:[#allocation8_spill] sm:$0xff] }
 0x399   : > { %v7856_v32 = vsel %vm617_vm1, %v3037_v18, %v3041_v34 }
 0x39a   : > { %v4045_v24 = vpop.f32.mrf.mxu2 }
 0x39b   : > { %v4046_v26 = vadd.f32 %v4045_v24, %v3957_v45  ;;  %v3963_v36 = vpop.f32.mrf.mxu1  ;;  %v7848_v45 = vsel %vm870_vm0, %v3044_v9, %v3045_v25  ;;  %v8415_v25 = vld [vmem:[#allocation26_spill] sm:$0xff]  ;;  %v5847_v9 = vld [vmem:[%s6093_s27 + $0x48] sm:$0xff] }
 0x39c   : > { %v4673_v34 = vrot.slane %v5847_v9, 1  ;;  %v8421_v9 = vld [vmem:[#allocation30_spill] sm:$0xff] }
 0x39d   : > { %v7843_v41 = vadd.f32 %v4134_v39, %v4046_v26  ;;  %v7850_v39 = vld [vmem:[#allocation2 + $0xcc] sm:$0xff] }
 0x3a0   : > { %v4136_v20 = vpop.f32.mrf.mxu3 }
 0x3a2   : > { %v4047_v37 = vpop.f32.mrf.mxu2 }
 0x3a3   : > { %v4048_v50 = vadd.f32 %v4047_v37, %v3959_v43  ;;  %v3966_v47 = vpop.f32.mrf.mxu1 }
 0x3a4   : > { %v3967_v46 = vadd.f32 %v3966_v47, %v7640_v15  ;;  %v8414_v47 = vld [vmem:[#allocation25_spill] sm:$0xff] }
 0x3a5   : > { %v7852_v24 = vadd.f32 %v4136_v20, %v4048_v50  ;;  %4178 = vmatmul.bf16.gmra.mxu3 %v7848_v45  ;;  %v3786_v31 = vadd.f32 %v8415_v25, %v8414_v47 }
 0x3a6   : > { %4267 = vmatmul.bf16.gmra.mxu0 %v7850_v39  ;;  %4281 = vmatmul.bf16.vlgmr.msra.gmra.mxu1 %v7516_v63 }
 0x3a7   : > { %4089 = vmatmul.bf16.gmra.mxu2 %v7856_v32  ;;  %v3875_v18 = vadd.f32 %v7596_v38, %v3786_v31 }
 0x3a8   : > { %v4139_v37 = vpop.f32.mrf.mxu3 }
 0x3a9   : > { %v3964_v22 = vadd.f32 %v3963_v36, %v3875_v18 }
 0x3aa   : > { %v4050_v15 = vpop.f32.mrf.mxu2 }
 0x3ab   : > { %v4051_v43 = vadd.f32 %v4050_v15, %v3962_v60  ;;  %v3968_v50 = vpop.f32.mrf.mxu1  ;;  %v5846_v60 = vld [vmem:[%s6093_s27 + $0x58] sm:$0x3] }
 0x3ac   : > { %v4676_v55 = vrot.slane %v5846_v60, 1 }
 0x3ad   : > { %v7863_v20 = vadd.f32 %v4139_v37, %v4051_v43  ;;  %v5848_v37 = vld [vmem:[%s6093_s27 + $0x50] sm:$0xff] }
 0x3ae   : > { %v4674_v15 = vrot.slane %v5848_v37, 1 }
 0x3b0   : > { %v4141_v35 = vpop.f32.mrf.mxu3 }
 0x3b2   : > { %v4052_v62 = vpop.f32.mrf.mxu2 }
 0x3b3   : > { %v4053_v63 = vadd.f32 %v4052_v62, %v3964_v22  ;;  %v3971_v42 = vpop.f32.mrf.mxu1 }
 0x3b4   : > { %v3972_v26 = vadd.f32 %v3971_v42, %v7683_v59  ;;  %v3791_v59 = vadd.f32 %v7664_v16, %v7653_v1  ;;  %v8419_v1 = vld [vmem:[#allocation34_spill] sm:$0xff] }
 0x3b5   : > { %v7867_v51 = vadd.f32 %v4141_v35, %v4053_v63  ;;  %5521 = vmatmul.msk.bf16.vlgmr.msra.gmra.mxu3 %vm1223_vm3, %v8418_v21 }
 0x3b6   : > { %4286 = vmatmul.bf16.gmra.mxu1 %v7050_v56  ;;  %v4675_v56 = vsel %vm870_vm0, %v4673_v34, %v4674_v15  ;;  %v3880_v43 = vadd.f32 %v7673_v57, %v3791_v59  ;;  %v5849_v57 = vld [vmem:[%s6093_s27 + $0x70] sm:$0x3]  ;;  %v8422_v34 = vld [vmem:[#allocation31_spill] sm:$0xff] }
 0x3b7   : > { %4370 = vmatmul.bf16.vlgmr.msra.gmra.mxu2 %v7671_v13  ;;  %v4677_v13 = vsel %vm870_vm0, %v4674_v15, %v4676_v55  ;;  %v4681_v21 = vrot.slane %v5849_v57, 1  ;;  %v5851_v55 = vld [vmem:[%s6093_s27 + $0x68] sm:$0xff]  ;;  %v3796_v37 = vadd.f32 %v8422_v34, %v8421_v9  ;;  %v8426_v9 = vld [vmem:[#allocation33_spill] sm:$0xff]  ;;  %v8427_v34 = vld [vmem:[#allocation35_spill] sm:$0xff] }
 0x3b8   : > { %v4144_v38 = vpop.f32.mrf.mxu3  ;;  %v3969_v35 = vadd.f32 %v3968_v50, %v3880_v43  ;;  %v4781_v22 = vpack.c.bf16 %v4677_v13, %v4675_v56  ;;  %v5850_v50 = vld [vmem:[%s6093_s27 + $0x60] sm:$0xff]  ;;  %v8423_v13 = vld [vmem:[#allocation32_spill] sm:$0xff] }
 0x3b9   : > { %v4678_v60 = vrot.slane %v5850_v50, 1  ;;  %v3885_v43 = vadd.f32 %v8423_v13, %v3796_v37  ;;  %v3801_v37 = vadd.f32 %v8427_v34, %v8426_v9  ;;  %v8431_v34 = vld [vmem:[#allocation37_spill] sm:$0xff] }
 0x3ba   : > { %v4055_v36 = vpop.f32.mrf.mxu2 }
 0x3bb   : > { %v4056_v47 = vadd.f32 %v4055_v36, %v3967_v46  ;;  %v3973_v25 = vpop.f32.mrf.mxu1  ;;  %v4679_v36 = vrot.slane %v5851_v55, 1  ;;  %v5854_v55 = vld [vmem:[%s6093_s27 + $0x80] sm:$0xff] }
 0x3bd   : > { %v7880_v31 = vadd.f32 %v4144_v38, %v4056_v47  ;;  %v4682_v56 = vsel %vm870_vm0, %v4679_v36, %v4681_v21  ;;  %v5852_v21 = vld [vmem:[%s6093_s27 + $0x88] sm:$0x3] }
 0x3c0   : > { %v4146_v18 = vpop.f32.mrf.mxu3 }
 0x3c2   : > { %v4057_v62 = vpop.f32.mrf.mxu2 }
 0x3c3   : > { %v4058_v63 = vadd.f32 %v4057_v62, %v3969_v35  ;;  %v3976_v42 = vpop.f32.mrf.mxu1  ;;  %v3974_v35 = vadd.f32 %v3973_v25, %v3885_v43  ;;  %v5853_v25 = vld [vmem:[%s6093_s27 + $0x78] sm:$0xff]  ;;  %v8428_v43 = vld [vmem:[#allocation36_spill] sm:$0xff] }
 0x3c4   : > { %v3977_v16 = vadd.f32 %v3976_v42, %v8419_v1  ;;  %v8424_v1 = vld [vmem:[#allocation38_spill] sm:$0xff] }
 0x3c5   : > { %v7886_v46 = vadd.f32 %v4146_v18, %v4058_v63  ;;  %5522 = vmatmul.msk.bf16.gmra.mxu3 %vm1223_vm3, %v4781_v22 }
 0x3c6   : > { %4291 = vmatmul.bf16.gmra.mxu1 %v7099_v29  ;;  %v4680_v29 = vsel %vm870_vm0, %v4678_v60, %v4679_v36  ;;  %v4683_v60 = vrot.slane %v5853_v25, 1  ;;  %v4684_v36 = vrot.slane %v5854_v55, 1 }
 0x3c7   : > { %4375 = vmatmul.bf16.gmra.mxu2 %v8420_v58  ;;  %v4782_v22 = vpack.c.bf16 %v4682_v56, %v4680_v29 }
 0x3c8   : > { %v4149_v28 = vpop.f32.mrf.mxu3 }
 0x3ca   : > { %v4060_v38 = vpop.f32.mrf.mxu2 }
 0x3cb   : > { %v4061_v15 = vadd.f32 %v4060_v38, %v3972_v26  ;;  %v3978_v59 = vpop.f32.mrf.mxu1  ;;  %v4686_v38 = vrot.slane %v5852_v21, 1 }
 0x3cd   : > { %v7896_v47 = vadd.f32 %v4149_v28, %v4061_v15  ;;  %v8425_v28 = vld [vmem:[#allocation9_spill] sm:$0xff]  ;;  %v4687_v13 = vsel %vm870_vm0, %v4684_v36, %v4686_v38 }
 0x3d0   : > { %v4151_v18 = vpop.f32.mrf.mxu3 }
 0x3d2   : > { %v4062_v62 = vpop.f32.mrf.mxu2 }
 0x3d3   : > { %v4063_v63 = vadd.f32 %v4062_v62, %v3974_v35  ;;  %v3981_v42 = vpop.f32.mrf.mxu1 }
 0x3d4   : > { %v3982_v26 = vadd.f32 %v3981_v42, %v8424_v1 }
 0x3d5   : > { %v7902_v58 = vadd.f32 %v4151_v18, %v4063_v63  ;;  %5523 = vmatmul.msk.bf16.gmra.mxu3 %vm1223_vm3, %v4782_v22  ;;  %v3890_v18 = vadd.f32 %v8428_v43, %v3801_v37  ;;  %v8432_v37 = vld [vmem:[#allocation40_spill] sm:$0xff]  ;;  %v8433_v43 = vld [vmem:[#allocation42_spill] sm:$0xff] }
 0x3d6   : > { %4296 = vmatmul.bf16.gmra.mxu1 %v7136_v40  ;;  %v4685_v40 = vsel %vm870_vm0, %v4683_v60, %v4684_v36  ;;  %v5857_v36 = vld [vmem:[%s6093_s27 + $0x98] sm:$0xff] }
 0x3d7   : > { %4380 = vmatmul.bf16.gmra.mxu2 %v8425_v28  ;;  %v3979_v22 = vadd.f32 %v3978_v59, %v3890_v18  ;;  %v4783_v62 = vpack.c.bf16 %v4687_v13, %v4685_v40  ;;  %v8429_v28 = vld [vmem:[#allocation41_spill] sm:$0xff]  ;;  %v4689_v9 = vrot.slane %v5857_v36, 1 }
 0x3d8   : > { %v4154_v57 = vpop.f32.mrf.mxu3  ;;  %v5856_v59 = vld [vmem:[%s6093_s27 + $0x90] sm:$0xff] }
 0x3d9   : > { %v4688_v55 = vrot.slane %v5856_v59, 1 }
 0x3da   : > { %v4065_v50 = vpop.f32.mrf.mxu2 }
 0x3db   : > { %v4066_v15 = vadd.f32 %v4065_v50, %v3977_v16  ;;  %v3983_v29 = vpop.f32.mrf.mxu1  ;;  %v5855_v50 = vld [vmem:[%s6093_s27 + $0xa0] sm:$0x3] }
 0x3dc   : > { %v4691_v25 = vrot.slane %v5855_v50, 1 }
 0x3dd   : > { %v7912_v56 = vadd.f32 %v4154_v57, %v4066_v15  ;;  %v8430_v57 = vld [vmem:[#allocation10_spill] sm:$0xff]  ;;  %v3806_v15 = vadd.f32 %v8432_v37, %v8431_v34  ;;  %v5860_v37 = vld [vmem:[%s6093_s27 + $0xb0] sm:$0xff] }
 0x3e0   : > { %v4156_v35 = vpop.f32.mrf.mxu3 }
 0x3e2   : > { %v4067_v63 = vpop.f32.mrf.mxu2 }
 0x3e3   : > { %v4068_v42 = vadd.f32 %v4067_v63, %v3979_v22  ;;  %v3986_v1 = vpop.f32.mrf.mxu1  ;;  %v4692_v22 = vsel %vm870_vm0, %v4689_v9, %v4691_v25 }
 0x3e4   : > { %v3987_v16 = vadd.f32 %v3986_v1, %v8429_v28 }
 0x3e5   : > { %v7918_v21 = vadd.f32 %v4156_v35, %v4068_v42  ;;  %5524 = vmatmul.msk.bf16.gmra.mxu3 %vm1223_vm3, %v4783_v62  ;;  %v8434_v62 = vld [vmem:[#allocation39_spill] sm:$0xff] }
 0x3e6   : > { %4301 = vmatmul.bf16.gmra.mxu1 %v7188_v30  ;;  %v4690_v30 = vsel %vm870_vm0, %v4688_v55, %v4689_v9  ;;  %v3895_v63 = vadd.f32 %v8434_v62, %v3806_v15  ;;  %v5858_v55 = vld [vmem:[%s6093_s27 + $0xb8] sm:$0x3]  ;;  %v4694_v15 = vrot.slane %v5860_v37, 1 }
 0x3e7   : > { %4385 = vmatmul.bf16.gmra.mxu2 %v8430_v57  ;;  %v4784_v28 = vpack.c.bf16 %v4692_v22, %v4690_v30  ;;  %v4696_v36 = vrot.slane %v5858_v55, 1 }
 0x3e8   : > { %v4159_v38 = vpop.f32.mrf.mxu3  ;;  %v3984_v1 = vadd.f32 %v3983_v29, %v3895_v63  ;;  %v5859_v29 = vld [vmem:[%s6093_s27 + $0xa8] sm:$0xff] }
 0x3e9   : > { %v4693_v34 = vrot.slane %v5859_v29, 1  ;;  %v5863_v29 = vld [vmem:[%s6093_s27 + $0xc8] sm:$0xff] }
 0x3ea   : > { %v4070_v60 = vpop.f32.mrf.mxu2 }
 0x3eb   : > { %v4071_v40 = vadd.f32 %v4070_v60, %v3982_v26  ;;  %v3988_v13 = vpop.f32.mrf.mxu1  ;;  %v4695_v22 = vsel %vm870_vm0, %v4693_v34, %v4694_v15  ;;  %v4699_v34 = vrot.slane %v5863_v29, 1 }
 0x3ec   : > { %v3989_v18 = vadd.f32 %v3988_v13, %v8433_v43  ;;  %v8436_v43 = vld [vmem:[#allocation43_spill] sm:$0xff] }
 0x3ed   : > { %v7929_v35 = vadd.f32 %v4159_v38, %v4071_v40  ;;  %v8435_v38 = vld [vmem:[#allocation11_spill] sm:$0xff] }
 0x3f0   : > { %v4161_v42 = vpop.f32.mrf.mxu3 }
 0x3f2   : > { %v4072_v57 = vpop.f32.mrf.mxu2 }
 0x3f3   : > { %v4073_v50 = vadd.f32 %v4072_v57, %v3984_v1  ;;  %v3991_v26 = vpop.f32.mrf.mxu1 }
 0x3f4   : > { %v3992_v60 = vadd.f32 %v3991_v26, %v7741_v8 }
 0x3f5   : > { %v7935_v59 = vadd.f32 %v4161_v42, %v4073_v50  ;;  %5525 = vmatmul.msk.bf16.gmra.mxu3 %vm1223_vm3, %v4784_v28  ;;  %v8437_v50 = vld [vmem:[#allocation12_spill] sm:$0xff] }
 0x3f6   : > { %4306 = vmatmul.bf16.gmra.mxu1 %v7232_v7  ;;  %v4697_v7 = vsel %vm870_vm0, %v4694_v15, %v4696_v36  ;;  %v5862_v36 = vld [vmem:[%s6093_s27 + $0xc0] sm:$0xff]  ;;  %v8438_v15 = vld [vmem:[#allocation44_spill] sm:$0xff] }
 0x3f7   : > { %4390 = vmatmul.bf16.gmra.mxu2 %v8435_v38  ;;  %v4785_v63 = vpack.c.bf16 %v4697_v7, %v4695_v22  ;;  %v5861_v38 = vld [vmem:[%s6093_s27 + $0xd0] sm:$0x3] }
 0x3f8   : > { %v4164_v25 = vpop.f32.mrf.mxu3 }
 0x3fa   : > { %v4075_v9 = vpop.f32.mrf.mxu2 }
 0x3fb   : > { %v4076_v40 = vadd.f32 %v4075_v9, %v3987_v16  ;;  %v3993_v13 = vpop.f32.mrf.mxu1  ;;  %v4698_v9 = vrot.slane %v5862_v36, 1  ;;  %v5866_v36 = vld [vmem:[%s6093_s27 + $0xe0] sm:$0xff] }
 0x3fc   : > { %v3994_v8 = vadd.f32 %v3993_v13, %v8436_v43 }
 0x3fd   : > { %v7944_v30 = vadd.f32 %v4164_v25, %v4076_v40  ;;  %v4701_v25 = vrot.slane %v5861_v38, 1  ;;  %v4700_v13 = vsel %vm870_vm0, %v4698_v9, %v4699_v34  ;;  %v4704_v9 = vrot.slane %v5866_v36, 1 }
 0x400   : > { %v4166_v62 = vpop.f32.mrf.mxu3 }
 0x402   : > { %v4077_v42 = vpop.f32.mrf.mxu2 }
 0x403   : > { %v4078_v1 = vadd.f32 %v4077_v42, %v3989_v18  ;;  %v3996_v28 = vpop.f32.mrf.mxu1 }
 0x404   : > { %v3997_v57 = vadd.f32 %v3996_v28, %v7752_v10 }
 0x405   : > { %v7949_v16 = vadd.f32 %v4166_v62, %v4078_v1  ;;  %5526 = vmatmul.msk.bf16.gmra.mxu3 %vm1223_vm3, %v4785_v63  ;;  %v8439_v1 = vld [vmem:[#allocation13_spill] sm:$0xff] }
 0x406   : > { %4311 = vmatmul.bf16.gmra.mxu1 %v7264_v11  ;;  %v4702_v11 = vsel %vm870_vm0, %v4699_v34, %v4701_v25  ;;  %v5865_v25 = vld [vmem:[%s6093_s27 + $0xd8] sm:$0xff] }
 0x407   : > { %4395 = vmatmul.bf16.gmra.mxu2 %v8437_v50  ;;  %v4786_v22 = vpack.c.bf16 %v4702_v11, %v4700_v13  ;;  %v5864_v50 = vld [vmem:[%s6093_s27 + $0xe8] sm:$0x3] }
 0x408   : > { %v4169_v26 = vpop.f32.mrf.mxu3 }
 0x40a   : > { %v4080_v55 = vpop.f32.mrf.mxu2 }
 0x40b   : > { %v4081_v18 = vadd.f32 %v4080_v55, %v3992_v60  ;;  %v3998_v37 = vpop.f32.mrf.mxu1  ;;  %v4703_v55 = vrot.slane %v5865_v25, 1 }
 0x40c   : > { %v3999_v10 = vadd.f32 %v3998_v37, %v8438_v15 }
 0x40d   : > { %v7958_v40 = vadd.f32 %v4169_v26, %v4081_v18  ;;  %v4706_v26 = vrot.slane %v5864_v50, 1  ;;  %v5869_v50 = vld [vmem:[%s6093_s27 + $0xf8] sm:$0xff] }
 0x40f   : > { %v4707_v18 = vsel %vm870_vm0, %v4704_v9, %v4706_v26  ;;  %v4709_v26 = vrot.slane %v5869_v50, 1 }
 0x410   : > { %v4171_v43 = vpop.f32.mrf.mxu3 }
 0x412   : > { %v4082_v7 = vpop.f32.mrf.mxu2 }
 0x413   : > { %v4083_v62 = vadd.f32 %v4082_v7, %v3994_v8  ;;  %v4001_v63 = vpop.f32.mrf.mxu1  ;;  %v5867_v7 = vld [vmem:[%s6093_s27 + $0x100] sm:$0x3] }
 0x414   : > { %v4002_v42 = vadd.f32 %v4001_v63, %v7761_v14 }
 0x415   : > { %v7963_v60 = vadd.f32 %v4171_v43, %v4083_v62  ;;  %5527 = vmatmul.msk.bf16.gmra.mxu3 %vm1223_vm3, %v4786_v22  ;;  %v4711_v62 = vrot.slane %v5867_v7, 1  ;;  %v5872_v7 = vld [vmem:[%s6093_s27 + $0x110] sm:$0xff] }
 0x416   : > { %4316 = vmatmul.bf16.gmra.mxu1 %v7304_v44  ;;  %v4705_v44 = vsel %vm870_vm0, %v4703_v55, %v4704_v9 }
 0x417   : > { %4400 = vmatmul.bf16.gmra.mxu2 %v8439_v1  ;;  %v4787_v15 = vpack.c.bf16 %v4707_v18, %v4705_v44  ;;  %v5868_v1 = vld [vmem:[%s6093_s27 + $0xf0] sm:$0xff]  ;;  %v4712_v36 = vsel %vm870_vm0, %v4709_v26, %v4711_v62  ;;  %v4714_v62 = vrot.slane %v5872_v7, 1 }
 0x418   : > { %v4174_v28 = vpop.f32.mrf.mxu3 }
 0x41a   : > { %v4085_v38 = vpop.f32.mrf.mxu2 }
 0x41b   : > { %v4086_v8 = vadd.f32 %v4085_v38, %v3997_v57  ;;  %v4003_v29 = vpop.f32.mrf.mxu1 }
 0x41c   : > { %v4004_v14 = vadd.f32 %v4003_v29, %v7764_v6  ;;  %v8440_v6 = vld [vmem:[#allocation14_spill] sm:$0xff] }
 0x41d   : > { %v7972_v34 = vadd.f32 %v4174_v28, %v4086_v8  ;;  %v4708_v28 = vrot.slane %v5868_v1, 1 }
 0x41f   : > { %v4710_v55 = vsel %vm870_vm0, %v4708_v28, %v4709_v26 }
 0x420   : > { %v4176_v37 = vpop.f32.mrf.mxu3  ;;  %v4788_v9 = vpack.c.bf16 %v4712_v36, %v4710_v55 }
 0x422   : > { %v4087_v13 = vpop.f32.mrf.mxu2 }
 0x423   : > { %v4088_v11 = vadd.f32 %v4087_v13, %v3999_v10  ;;  %v4282_v43 = vpop.f32.mrf.mxu1  ;;  %v5870_v13 = vld [vmem:[%s6093_s27 + $0x118] sm:$0x3] }
 0x425   : > { %v7976_v22 = vadd.f32 %v4176_v37, %v4088_v11  ;;  %5528 = vmatmul.msk.bf16.gmra.mxu3 %vm1223_vm3, %v4787_v15  ;;  %v4283_v37 = vadd.f32 %v4282_v43, %v7773_v49  ;;  %v7997_v15 = vld [vmem:[%s8297_s5] ss:$0 sm:$0xff]  ;;  %v4716_v11 = vrot.slane %v5870_v13, 1 }
 0x426   : > { %4321 = vmatmul.bf16.gmra.mxu1 %v7367_v23 }
 0x427   : > { %4405 = vmatmul.bf16.gmra.mxu2 %v8440_v6  ;;  %v5871_v6 = vld [vmem:[%s6093_s27 + $0x108] sm:$0xff]  ;;  %v4717_v43 = vsel %vm870_vm0, %v4714_v62, %v4716_v11 }
 0x428   : > { %v4179_v57 = vpop.f32.mrf.mxu3 }
 0x42a   : > { %v4090_v63 = vpop.f32.mrf.mxu2 }
 0x42b   : > { %v4091_v38 = vadd.f32 %v4090_v63, %v4002_v42  ;;  %v4284_v25 = vpop.f32.mrf.mxu1 }
 0x42c   : > { %v4285_v50 = vadd.f32 %v4284_v25, %v7777_v0  ;;  %v8020_v0 = vpop.f32.mrf.mxu0 }
 0x42d   : > { %v7984_v10 = vadd.f32 %v4179_v57, %v4091_v38  ;;  %v4713_v57 = vrot.slane %v5871_v6, 1 }
 0x42f   : > { %v4715_v49 = vsel %vm870_vm0, %v4713_v57, %v4714_v62  ;;  %v5873_v57 = vld [vmem:[%s6093_s27 + $0x130] sm:$0x3] }
 0x430   : > { %v4181_v23 = vpop.f32.mrf.mxu3  ;;  %v4789_v38 = vpack.c.bf16 %v4717_v43, %v4715_v49  ;;  %v4721_v7 = vrot.slane %v5873_v57, 1  ;;  %v5875_v49 = vld [vmem:[%s6093_s27 + $0x128] sm:$0xff] }
 0x431   : > { %v4719_v43 = vrot.slane %v5875_v49, 1  ;;  %v5876_v49 = vld [vmem:[%s6093_s27 + $0x148] sm:$0x3] }
 0x432   : > { %v4092_v8 = vpop.f32.mrf.mxu2 }
 0x433   : > { %v4093_v29 = vadd.f32 %v4092_v8, %v4004_v14  ;;  %v4287_v44 = vpop.f32.mrf.mxu1 }
 0x434   : > { %v4288_v11 = vadd.f32 %v4287_v44, %v7779_v5 }
 0x435   : > { %v7988_v18 = vadd.f32 %v4181_v23, %v4093_v29  ;;  %5529 = vmatmul.msk.bf16.gmra.mxu3 %vm1223_vm3, %v4788_v9  ;;  %v8015_v9 = vld [vmem:[%s8300_s8] ss:$0 sm:$0xff] }
 0x436   : > { %4326 = vmatmul.bf16.gmra.mxu1 %v7433_v12 }
 0x437   : > { %4410 = vmatmul.bf16.gmra.mxu2 %v7360_v54  ;;  %v8006_v54 = vld [vmem:[%s8298_s6] ss:$0 sm:$0xff] }
 0x438   : > { %v4861_v42 = vpop.f32.mrf.mxu3 }
 0x43a   : > { %v4371_v14 = vpop.f32.mrf.mxu2 }
 0x43b   : > { %v4372_v63 = vadd.f32 %v4371_v14, %v4283_v37  ;;  %v4289_v1 = vpop.f32.mrf.mxu1  ;;  %v4862_v37 = vadd.f32 %v8015_v9, %v4861_v42 }
 0x43d   : > { %v4455_v12 = vmul.f32 %v7997_v15, %v4372_v63  ;;  %v5874_v63 = vld [vmem:[%s6093_s27 + $0x120] sm:$0xff] }
 0x43f   : > { %v4491_v26 = vadd.f32 %v8006_v54, %v4455_v12  ;;  %v4718_v12 = vrot.slane %v5874_v63, 1 }
 0x440   : > { %v4863_v28 = vpop.f32.mrf.mxu3 }
 0x441   : > { %v4555_v8 = vmul.f32 0.3, %v4491_v26  ;;  %vm4523_vm9 = vcmp.ge.f32.partialorder %v4491_v26, 0.0 }
 0x442   : > { %v4373_v55 = vpop.f32.mrf.mxu2 }
 0x443   : > { %v4374_v36 = vadd.f32 %v4373_v55, %v4285_v50  ;;  %v4292_v23 = vpop.f32.mrf.mxu1  ;;  %v4587_v14 = vsel %vm4523_vm9, %v4491_v26, %v4555_v8  ;;  %v4720_v26 = vsel %vm870_vm0, %v4718_v12, %v4719_v43  ;;  %v8039_v8 = vpop.f32.mrf.mxu0 }
 0x445   : > { %v4456_v29 = vmul.f32 %v7997_v15, %v4374_v36  ;;  %5530 = vmatmul.msk.bf16.gmra.mxu3 %vm1223_vm3, %v4789_v38  ;;  %v4941_v38 = vadd.f32 %v4862_v37, %v4587_v14  ;;  %v4722_v36 = vsel %vm870_vm0, %v4719_v43, %v4721_v7  ;;  %v4726_v43 = vrot.slane %v5876_v49, 1 }
 0x446   : > { %4331 = vmatmul.bf16.gmra.mxu1 %v7491_v3  ;;  %v4864_v3 = vadd.f32 %v8015_v9, %v4863_v28  ;;  %v4790_v37 = vpack.c.bf16 %v4722_v36, %v4720_v26 }
 0x447   : > { %v4492_v25 = vadd.f32 %v8006_v54, %v4456_v29  ;;  %4415 = vmatmul.bf16.gmra.mxu2 %v7427_v4  ;;  %v4290_v29 = vadd.f32 %v4289_v1, %v7787_v27 }
 0x448   : > { %v4866_v13 = vpop.f32.mrf.mxu3 }
 0x449   : > { %vm4524_vm14 = vcmp.ge.f32.partialorder %v4492_v25, 0.0  ;;  %v4556_v6 = vmul.f32 0.3, %v4492_v25  ;;  %v4867_v27 = vadd.f32 %v8015_v9, %v4866_v13 }
 0x44a   : > { %v4376_v62 = vpop.f32.mrf.mxu2 }
 0x44b   : > { %v4588_v4 = vsel %vm4524_vm14, %v4492_v25, %v4556_v6  ;;  %v4377_v50 = vadd.f32 %v4376_v62, %v4288_v11  ;;  %v4294_v42 = vpop.f32.mrf.mxu1  ;;  %v4293_v62 = vadd.f32 %v4292_v23, %v7792_v19 }
 0x44c   : > { %v4942_v55 = vadd.f32 %v4864_v3, %v4588_v4 }
 0x44d   : > { %v4457_v5 = vmul.f32 %v7997_v15, %v4377_v50 }
 0x44e   : > { %v5638_v44 = vpack.c.bf16 %v4942_v55, %v4941_v38  ;;  %v5877_v38 = vld [vmem:[%s6093_s27 + $0x138] sm:$0xff]  ;;  %v5878_v55 = vld [vmem:[%s6093_s27 + $0x140] sm:$0xff] }
 0x44f   : > { %v4493_v25 = vadd.f32 %v8006_v54, %v4457_v5  ;;  %v4724_v5 = vrot.slane %v5878_v55, 1 }
 0x450   : > { %5639 = vst [vmem:[%s8036_s15] sm:$0xff] %v5638_v44   ;;  %v4868_v28 = vpop.f32.mrf.mxu3  ;;  %v8054_v44 = vpop.f32.mrf.mxu0 }
 0x451   : > { %v4557_v57 = vmul.f32 0.3, %v4493_v25  ;;  %vm4525_vm15 = vcmp.ge.f32.partialorder %v4493_v25, 0.0  ;;  %v4869_v4 = vadd.f32 %v8015_v9, %v4868_v28  ;;  %v4727_v28 = vsel %vm870_vm0, %v4724_v5, %v4726_v43 }
 0x452   : > { %v4378_v11 = vpop.f32.mrf.mxu2 }
 0x453   : > { %v4379_v14 = vadd.f32 %v4378_v11, %v4290_v29  ;;  %v4297_v6 = vpop.f32.mrf.mxu1  ;;  %v4589_v63 = vsel %vm4525_vm15, %v4493_v25, %v4557_v57  ;;  %v4295_v11 = vadd.f32 %v4294_v42, %v7799_v48 }
 0x454   : > { %v4943_v36 = vadd.f32 %v4867_v27, %v4589_v63  ;;  %v4298_v43 = vadd.f32 %v4297_v6, %v7804_v2 }
 0x455   : > { %v4458_v3 = vmul.f32 %v7997_v15, %v4379_v14  ;;  %5531 = vmatmul.msk.bf16.gmra.mxu3 %vm1223_vm3, %v4790_v37 }
 0x456   : > { %4336 = vmatmul.bf16.gmra.mxu1 %v7547_v52  ;;  %v4723_v52 = vrot.slane %v5877_v38, 1  ;;  %v5879_v38 = vld [vmem:[%s6093_s27 + $0x160] sm:$0x3] }
 0x457   : > { %v4494_v7 = vadd.f32 %v8006_v54, %v4458_v3  ;;  %4420 = vmatmul.bf16.gmra.mxu2 %v7481_v53 }
 0x458   : > { %v4871_v1 = vpop.f32.mrf.mxu3  ;;  %v4725_v25 = vsel %vm870_vm0, %v4723_v52, %v4724_v5  ;;  %v8062_v27 = vpop.f32.mrf.mxu0  ;;  %v4731_v52 = vrot.slane %v5879_v38, 1 }
 0x459   : > { %vm4526_vm13 = vcmp.ge.f32.partialorder %v4494_v7, 0.0  ;;  %v4558_v12 = vmul.f32 0.3, %v4494_v7  ;;  %v4791_v57 = vpack.c.bf16 %v4727_v28, %v4725_v25  ;;  %v4872_v42 = vadd.f32 %v8015_v9, %v4871_v1 }
 0x45a   : > { %v4381_v50 = vpop.f32.mrf.mxu2 }
 0x45b   : > { %v4590_v53 = vsel %vm4526_vm13, %v4494_v7, %v4558_v12  ;;  %v4382_v13 = vadd.f32 %v4381_v50, %v4293_v62  ;;  %v4299_v26 = vpop.f32.mrf.mxu1 }
 0x45c   : > { %v4944_v19 = vadd.f32 %v4869_v4, %v4590_v53  ;;  %v5880_v53 = vld [vmem:[%s6093_s27 + $0x150] sm:$0xff] }
 0x45d   : > { %v4459_v23 = vmul.f32 %v7997_v15, %v4382_v13  ;;  %v5881_v13 = vld [vmem:[%s6093_s27 + $0x158] sm:$0xff] }
 0x45e   : > { %v5643_v29 = vpack.c.bf16 %v4944_v19, %v4943_v36  ;;  %v4729_v36 = vrot.slane %v5881_v13, 1  ;;  %v5882_v13 = vld [vmem:[%s6093_s27 + $0x178] sm:$0x3] }
 0x45f   : > { %v4495_v14 = vadd.f32 %v8006_v54, %v4459_v23 }
 0x460   : > { %5715 = vst [vmem:[%s8036_s15 + $0x8] sm:$0xff] %v5643_v29   ;;  %v4873_v37 = vpop.f32.mrf.mxu3  ;;  %v4732_v28 = vsel %vm870_vm0, %v4729_v36, %v4731_v52 }
 0x461   : > { %v4559_v63 = vmul.f32 0.3, %v4495_v14  ;;  %vm4527_vm11 = vcmp.ge.f32.partialorder %v4495_v14, 0.0  ;;  %v4874_v55 = vadd.f32 %v8015_v9, %v4873_v37 }
 0x462   : > { %v4383_v3 = vpop.f32.mrf.mxu2 }
 0x463   : > { %v4384_v7 = vadd.f32 %v4383_v3, %v4295_v11  ;;  %v4302_v62 = vpop.f32.mrf.mxu1  ;;  %v4591_v4 = vsel %vm4527_vm11, %v4495_v14, %v4559_v63  ;;  %v8078_v11 = vpop.f32.mrf.mxu0  ;;  %v4300_v14 = vadd.f32 %v4299_v26, %v7814_v17  ;;  %v8443_v26 = vld [vmem:[#allocation27_spill] sm:$0xff] }
 0x464   : > { %v4945_v1 = vadd.f32 %v4872_v42, %v4591_v4  ;;  %v8442_v4 = vld [vmem:[#allocation15_spill] sm:$0xff] }
 0x465   : > { %v4460_v12 = vmul.f32 %v7997_v15, %v4384_v7  ;;  %5532 = vmatmul.msk.bf16.gmra.mxu3 %vm1223_vm3, %v4791_v57 }
 0x466   : > { %4341 = vmatmul.bf16.gmra.mxu1 %v7611_v33  ;;  %v4728_v33 = vrot.slane %v5880_v53, 1 }
 0x467   : > { %v4496_v48 = vadd.f32 %v8006_v54, %v4460_v12  ;;  %4425 = vmatmul.bf16.gmra.mxu2 %v7541_v61 }
 0x468   : > { %v4876_v49 = vpop.f32.mrf.mxu3  ;;  %v4730_v25 = vsel %vm870_vm0, %v4728_v33, %v4729_v36  ;;  %v4736_v36 = vrot.slane %v5882_v13, 1 }
 0x469   : > { %vm4528_vm2 = vcmp.ge.f32.partialorder %v4496_v48, 0.0  ;;  %v4560_v50 = vmul.f32 0.3, %v4496_v48  ;;  %v4792_v3 = vpack.c.bf16 %v4732_v28, %v4730_v25  ;;  %v4877_v38 = vadd.f32 %v8015_v9, %v4876_v49 }
 0x46a   : > { %v4386_v5 = vpop.f32.mrf.mxu2 }
 0x46b   : > { %v4592_v19 = vsel %vm4528_vm2, %v4496_v48, %v4560_v50  ;;  %v4387_v61 = vadd.f32 %v4386_v5, %v4298_v43  ;;  %v4304_v23 = vpop.f32.mrf.mxu1  ;;  %v8441_v43 = vld [vmem:[#allocation29_spill] sm:$0xff]  ;;  %v4214_v50 = vadd.f32 %v8020_v0, %v8442_v4 }
 0x46c   : > { %v4946_v29 = vadd.f32 %v4874_v55, %v4592_v19  ;;  %v8091_v55 = vpop.f32.mrf.mxu0 }
 0x46d   : > { %v4461_v2 = vmul.f32 %v7997_v15, %v4387_v61  ;;  %v4303_v5 = vadd.f32 %v4302_v62, %v4214_v50  ;;  %v5883_v61 = vld [vmem:[%s6093_s27 + $0x168] sm:$0xff]  ;;  %v2605_v50 = vld [vmem:[#allocation2 + $0xd4] sm:$0x1] }
 0x46e   : > { %v5648_v6 = vpack.c.bf16 %v4946_v29, %v4945_v1  ;;  %v4733_v1 = vrot.slane %v5883_v61, 1  ;;  %v5884_v29 = vld [vmem:[%s6093_s27 + $0x170] sm:$0xff] }
 0x46f   : > { %v4497_v57 = vadd.f32 %v8006_v54, %v4461_v2  ;;  %v4734_v2 = vrot.slane %v5884_v29, 1 }
 0x470   : > { %5716 = vst [vmem:[%s8036_s15 + $0x10] sm:$0xff] %v5648_v6   ;;  %v4878_v37 = vpop.f32.mrf.mxu3 }
 0x471   : > { %v4561_v48 = vmul.f32 0.3, %v4497_v57  ;;  %vm4529_vm12 = vcmp.ge.f32.partialorder %v4497_v57, 0.0  ;;  %v4879_v19 = vadd.f32 %v8015_v9, %v4878_v37 }
 0x472   : > { %v4388_v7 = vpop.f32.mrf.mxu2 }
 0x473   : > { %v4389_v63 = vadd.f32 %v4388_v7, %v4300_v14  ;;  %v4307_v12 = vpop.f32.mrf.mxu1  ;;  %v4593_v53 = vsel %vm4529_vm12, %v4497_v57, %v4561_v48  ;;  %v4737_v7 = vsel %vm870_vm0, %v4734_v2, %v4736_v36 }
 0x474   : > { %v4947_v28 = vadd.f32 %v4877_v38, %v4593_v53  ;;  %v3055_v53 = vunpack.c.l.b16 %v2605_v50 }
 0x475   : > { %v4462_v42 = vmul.f32 %v7997_v15, %v4389_v63  ;;  %5533 = vmatmul.msk.bf16.gmra.mxu3 %vm1223_vm3, %v4792_v3  ;;  %v4735_v3 = vsel %vm870_vm0, %v4733_v1, %v4734_v2  ;;  %v8444_v63 = vld [vmem:[#allocation16_spill] sm:$0xff] }
 0x476   : > { %4346 = vmatmul.bf16.gmra.mxu1 %v8441_v43  ;;  %v4216_v37 = vadd.f32 %v8039_v8, %v8444_v63  ;;  %v4793_v4 = vpack.c.bf16 %v4737_v7, %v4735_v3  ;;  %v8445_v8 = vld [vmem:[#allocation20_spill] sm:$0xff]  ;;  %v8114_v1 = vpack.c.b16 %v3055_v53, %v3055_v53  ;;  %v8447_v53 = vld [vmem:[#allocation17_spill] sm:$0xff] }
 0x477   : > { %v4498_v17 = vadd.f32 %v8006_v54, %v4462_v42  ;;  %4430 = vmatmul.bf16.gmra.mxu2 %v8443_v26  ;;  %v8104_v26 = vpop.f32.mrf.mxu0 }
 0x478   : > { %v4881_v52 = vpop.f32.mrf.mxu3  ;;  %v4305_v42 = vadd.f32 %v4304_v23, %v4216_v37  ;;  %v4219_v23 = vadd.f32 %v8054_v44, %v8445_v8  ;;  %v5886_v44 = vld [vmem:[%s6093_s27 + $0x180] sm:$0xff]  ;;  %v3060_v37 = vshll.u32 %v7850_v39, 16  ;;  %v3065_v50 = vshll.u32 %v8114_v1, 16 }
 0x479   : > { %vm4530_vm4 = vcmp.ge.f32.partialorder %v4498_v17, 0.0  ;;  %v4562_v33 = vmul.f32 0.3, %v4498_v17 }
 0x47a   : > { %v4391_v0 = vpop.f32.mrf.mxu2  ;;  %v4308_v29 = vadd.f32 %v4307_v12, %v4219_v23  ;;  %v3058_v23 = vshrl.u32 %v7850_v39, 16 }
 0x47b   : > { %v4594_v6 = vsel %vm4530_vm4, %v4498_v17, %v4562_v33  ;;  %v4392_v25 = vadd.f32 %v4391_v0, %v4303_v5  ;;  %v4309_v49 = vpop.f32.mrf.mxu1  ;;  %v4882_v0 = vadd.f32 %v8015_v9, %v4881_v52 }
 0x47c   : > { %v4948_v14 = vadd.f32 %v4879_v19, %v4594_v6  ;;  %v8446_v19 = vld [vmem:[#allocation28_spill] sm:$0xff] }
 0x47d   : > { %v4463_v62 = vmul.f32 %v7997_v15, %v4392_v25  ;;  %v5885_v25 = vld [vmem:[%s6093_s27 + $0x190] sm:$0x3] }
 0x47e   : > { %v5653_v57 = vpack.c.bf16 %v4948_v14, %v4947_v28  ;;  %v4741_v28 = vrot.slane %v5885_v25, 1 }
 0x47f   : > { %v4499_v43 = vadd.f32 %v8006_v54, %v4463_v62  ;;  %v4738_v62 = vrot.slane %v5886_v44, 1  ;;  %v4224_v44 = vadd.f32 %v8078_v11, %v7843_v41  ;;  %v5890_v41 = vld [vmem:[%s6093_s27 + $0x1a0] sm:$0xff] }
 0x480   : > { %5717 = vst [vmem:[%s8036_s15 + $0x18] sm:$0xff] %v5653_v57   ;;  %v4883_v48 = vpop.f32.mrf.mxu3  ;;  %v5887_v57 = vld [vmem:[%s6093_s27 + $0x188] sm:$0xff]  ;;  %v4744_v11 = vrot.slane %v5890_v41, 1 }
 0x481   : > { %v4563_v33 = vmul.f32 0.3, %v4499_v43  ;;  %vm4531_vm5 = vcmp.ge.f32.partialorder %v4499_v43, 0.0  ;;  %v4739_v3 = vrot.slane %v5887_v57, 1 }
 0x482   : > { %v4393_v17 = vpop.f32.mrf.mxu2 }
 0x483   : > { %v4394_v38 = vadd.f32 %v4393_v17, %v4305_v42  ;;  %v4312_v5 = vpop.f32.mrf.mxu1  ;;  %v4595_v2 = vsel %vm4531_vm5, %v4499_v43, %v4563_v33  ;;  %v8121_v43 = vpop.f32.mrf.mxu0  ;;  %v4740_v17 = vsel %vm870_vm0, %v4738_v62, %v4739_v3  ;;  %v4221_v33 = vadd.f32 %v8062_v27, %v8447_v53 }
 0x484   : > { %v4949_v42 = vadd.f32 %v4882_v0, %v4595_v2 }
 0x485   : > { %v4464_v13 = vmul.f32 %v7997_v15, %v4394_v38  ;;  %5534 = vmatmul.msk.bf16.gmra.mxu3 %vm1223_vm3, %v4793_v4  ;;  %v4742_v38 = vsel %vm870_vm0, %v4739_v3, %v4741_v28 }
 0x486   : > { %4351 = vmatmul.bf16.gmra.mxu1 %v7856_v32  ;;  %v4884_v32 = vadd.f32 %v8015_v9, %v4883_v48  ;;  %v4794_v0 = vpack.c.bf16 %v4742_v38, %v4740_v17 }
 0x487   : > { %v4500_v36 = vadd.f32 %v8006_v54, %v4464_v13  ;;  %4435 = vmatmul.bf16.gmra.mxu2 %v8446_v19  ;;  %v3062_v13 = vrot.slane %v3060_v37, 1 }
 0x488   : > { %v4886_v61 = vpop.f32.mrf.mxu3 }
 0x489   : > { %vm4532_vm6 = vcmp.ge.f32.partialorder %v4500_v36, 0.0  ;;  %v4564_v6 = vmul.f32 0.3, %v4500_v36  ;;  %v4887_v57 = vadd.f32 %v8015_v9, %v4886_v61 }
 0x48a   : > { %v4396_v14 = vpop.f32.mrf.mxu2 }
 0x48b   : > { %v4596_v7 = vsel %vm4532_vm6, %v4500_v36, %v4564_v6  ;;  %v4397_v63 = vadd.f32 %v4396_v14, %v4308_v29  ;;  %v4314_v52 = vpop.f32.mrf.mxu1  ;;  %v4310_v36 = vadd.f32 %v4309_v49, %v4221_v33  ;;  %v3067_v29 = vrot.slane %v3065_v50, 1  ;;  %v8135_v49 = vpop.f32.mrf.mxu0 }
 0x48c   : > { %v4950_v12 = vadd.f32 %v4884_v32, %v4596_v7  ;;  %v3063_v32 = vor.u32 %v3062_v13, %v3058_v23  ;;  %v4313_v7 = vadd.f32 %v4312_v5, %v4224_v44  ;;  %v3070_v44 = vrot.slane %v7850_v39, 1 }
 0x48d   : > { %v4465_v4 = vmul.f32 %v7997_v15, %v4397_v63 }
 0x48e   : > { %v5658_v48 = vpack.c.bf16 %v4950_v12, %v4949_v42  ;;  %v3068_v27 = vsel %vm617_vm1, %v3063_v32, %v3067_v29  ;;  %v5888_v42 = vld [vmem:[%s6093_s27 + $0x1a8] sm:$0x3] }
 0x48f   : > { %v4501_v19 = vadd.f32 %v8006_v54, %v4465_v4  ;;  %v4746_v12 = vrot.slane %v5888_v42, 1 }
 0x490   : > { %5718 = vst [vmem:[%s8036_s15 + $0x20] sm:$0xff] %v5658_v48   ;;  %v4888_v8 = vpop.f32.mrf.mxu3  ;;  %v5889_v48 = vld [vmem:[%s6093_s27 + $0x198] sm:$0xff]  ;;  %s5914_s27 = scalar_lea.hbm %s8301_s9, 256 }
 0x491   : > { %v4565_v14 = vmul.f32 0.3, %v4501_v19  ;;  %vm4533_vm7 = vcmp.ge.f32.partialorder %v4501_v19, 0.0  ;;  %v4889_v4 = vadd.f32 %v8015_v9, %v4888_v8  ;;  %v4743_v17 = vrot.slane %v5889_v48, 1  ;;  %p5916_p2 = scmp.lt.s32.totalorder %s5914_s27, %s5910_s28 }
 0x492   : > { %v4398_v2 = vpop.f32.mrf.mxu2  ;;  %v4226_v8 = vadd.f32 %v8091_v55, %v7852_v24  ;;  %v4229_v55 = vadd.f32 %v8104_v26, %v7863_v20 }
 0x493   : > { %v4399_v6 = vadd.f32 %v4398_v2, %v4310_v36  ;;  %v4317_v25 = vpop.f32.mrf.mxu1  ;;  %v4597_v63 = vsel %vm4533_vm7, %v4501_v19, %v4565_v14  ;;  %v4745_v23 = vsel %vm870_vm0, %v4743_v17, %v4744_v11  ;;  %v4747_v36 = vsel %vm870_vm0, %v4744_v11, %v4746_v12  ;;  %p5917_p3 = por %p5916_p2, %p5915_p1 }
 0x494   : > { %v4951_v33 = vadd.f32 %v4887_v57, %v4597_v63  ;;  %v4315_v29 = vadd.f32 %v4314_v52, %v4226_v8  ;;  %v3071_v14 = vrot.slane %v8114_v1, 1  ;;  %v4318_v63 = vadd.f32 %v4317_v25, %v4229_v55 }
 0x495   : > { %v4466_v28 = vmul.f32 %v7997_v15, %v4399_v6  ;;  %5535 = vmatmul.msk.bf16.gmra.mxu3 %vm1223_vm3, %v4794_v0  ;;  %v8152_v0 = vpop.f32.mrf.mxu0  ;;  %v4795_v6 = vpack.c.bf16 %v4747_v36, %v4745_v23  ;;  %v4234_v8 = vadd.f32 %v8135_v49, %v7880_v31  ;;  %p5918_p5 = pnand %p5917_p3, %p5913_p0 }
 0x496   : > { %4356 = vmatmul.bf16.gmra.mxu1 %v3068_v27  ;;  %v3072_v24 = vsel %vm870_vm0, %v3070_v44, %v3071_v14  ;;  %v4236_v55 = vadd.f32 %v8152_v0, %v7886_v46 }
 0x497   : > { %v4502_v62 = vadd.f32 %v8006_v54, %v4466_v28  ;;  %4440 = vmatmul.bf16.gmra.mxu2 %v7848_v45 }
 0x498   : > { %v4891_v3 = vpop.f32.mrf.mxu3 }
 0x499   : > { %vm4534_vm8 = vcmp.ge.f32.partialorder %v4502_v62, 0.0  ;;  %v4566_v37 = vmul.f32 0.3, %v4502_v62  ;;  %v4892_v1 = vadd.f32 %v8015_v9, %v4891_v3  ;;  %v4231_v3 = vadd.f32 %v8121_v43, %v7867_v51 }
 0x49a   : > { %v4401_v50 = vpop.f32.mrf.mxu2 }
 0x49b   : > { %v4598_v38 = vsel %vm4534_vm8, %v4502_v62, %v4566_v37  ;;  %v4402_v53 = vadd.f32 %v4401_v50, %v4313_v7  ;;  %v4319_v45 = vpop.f32.mrf.mxu1 }
 0x49c   : > { %v4952_v61 = vadd.f32 %v4889_v4, %v4598_v38  ;;  %v4320_v38 = vadd.f32 %v4319_v45, %v4231_v3 }
 0x49d   : > { %v4467_v5 = vmul.f32 %v7997_v15, %v4402_v53  ;;  %v4238_v4 = vpop.f32.mrf.mxu0 }
 0x49e   : > { %v5663_v13 = vpack.c.bf16 %v4952_v61, %v4951_v33 }
 0x49f   : > { %v4503_v2 = vadd.f32 %v8006_v54, %v4467_v5 }
 0x4a0   : > { %5719 = vst [vmem:[%s8036_s15 + $0x28] sm:$0xff] %v5663_v13   ;;  %v4893_v19 = vpop.f32.mrf.mxu3 }
 0x4a1   : > { %v4567_v62 = vmul.f32 0.3, %v4503_v2  ;;  %vm4535_vm1 = vcmp.ge.f32.partialorder %v4503_v2, 0.0  ;;  %v4894_v42 = vadd.f32 %v8015_v9, %v4893_v19 }
 0x4a2   : > { %v4403_v32 = vpop.f32.mrf.mxu2 }
 0x4a3   : > { %v4404_v28 = vadd.f32 %v4403_v32, %v4315_v29  ;;  %v4322_v27 = vpop.f32.mrf.mxu1  ;;  %v4599_v39 = vsel %vm4535_vm1, %v4503_v2, %v4567_v62 }
 0x4a4   : > { %v4953_v41 = vadd.f32 %v4892_v1, %v4599_v39  ;;  %v4323_v45 = vadd.f32 %v4322_v27, %v4234_v8 }
 0x4a5   : > { %v4468_v57 = vmul.f32 %v7997_v15, %v4404_v28  ;;  %5536 = vmatmul.msk.bf16.gmra.mxu3 %vm1223_vm3, %v4795_v6  ;;  %v4240_v13 = vpop.f32.mrf.mxu0 }
 0x4a7   : > { %v4504_v52 = vadd.f32 %v8006_v54, %v4468_v57  ;;  %4445 = vmatmul.bf16.gmra.mxu2 %v3072_v24 }
 0x4a8   : > { %v4896_v7 = vpop.f32.mrf.mxu3 }
 0x4a9   : > { %vm4536_vm10 = vcmp.ge.f32.partialorder %v4504_v52, 0.0  ;;  %v4568_v37 = vmul.f32 0.3, %v4504_v52  ;;  %v4897_v51 = vadd.f32 %v8015_v9, %v4896_v7 }
 0x4aa   : > { %v4406_v12 = vpop.f32.mrf.mxu2 }
 0x4ab   : > { %v4600_v50 = vsel %vm4536_vm10, %v4504_v52, %v4568_v37  ;;  %v4407_v48 = vadd.f32 %v4406_v12, %v4318_v63  ;;  %v4324_v17 = vpop.f32.mrf.mxu1  ;;  %v4239_v12 = vadd.f32 %v4238_v4, %v7896_v47 }
 0x4ac   : > { %v4954_v20 = vadd.f32 %v4894_v42, %v4600_v50  ;;  %v4325_v52 = vadd.f32 %v4324_v17, %v4236_v55 }
 0x4ad   : > { %v4469_v26 = vmul.f32 %v7997_v15, %v4407_v48  ;;  %v4243_v24 = vpop.f32.mrf.mxu0 }
 0x4ae   : > { %v5668_v11 = vpack.c.bf16 %v4954_v20, %v4953_v41 }
 0x4af   : > { %v4505_v53 = vadd.f32 %v8006_v54, %v4469_v26 }
 0x4b0   : > { %5720 = vst [vmem:[%s8036_s15 + $0x30] sm:$0xff] %v5668_v11   ;;  %v4898_v25 = vpop.f32.mrf.mxu3 }
 0x4b1   : > { %v4569_v23 = vmul.f32 0.3, %v4505_v53  ;;  %vm4537_vm0 = vcmp.ge.f32.partialorder %v4505_v53, 0.0  ;;  %v4899_v6 = vadd.f32 %v8015_v9, %v4898_v25 }
 0x4b2   : > { %v4408_v33 = vpop.f32.mrf.mxu2 }
 0x4b3   : > { %v4409_v61 = vadd.f32 %v4408_v33, %v4320_v38  ;;  %v4327_v5 = vpop.f32.mrf.mxu1  ;;  %v4601_v29 = vsel %vm4537_vm0, %v4505_v53, %v4569_v23 }
 0x4b4   : > { %v4955_v62 = vadd.f32 %v4897_v51, %v4601_v29  ;;  %v4328_v0 = vadd.f32 %v4327_v5, %v4239_v12 }
 0x4b5   : > { %v4470_v36 = vmul.f32 %v7997_v15, %v4409_v61  ;;  %v4245_v46 = vpop.f32.mrf.mxu0  ;;  %v4241_v61 = vadd.f32 %v4240_v13, %v7902_v58 }
 0x4b7   : > { %v4506_v19 = vadd.f32 %v8006_v54, %v4470_v36 }
 0x4b8   : > { %v4901_v43 = vpop.f32.mrf.mxu3 }
 0x4b9   : > { %vm4538_vm3 = vcmp.ge.f32.partialorder %v4506_v19, 0.0  ;;  %v4570_v2 = vmul.f32 0.3, %v4506_v19  ;;  %v4902_v48 = vadd.f32 %v8015_v9, %v4901_v43 }
 0x4ba   : > { %v4411_v32 = vpop.f32.mrf.mxu2 }
 0x4bb   : > { %v4602_v14 = vsel %vm4538_vm3, %v4506_v19, %v4570_v2  ;;  %v4412_v28 = vadd.f32 %v4411_v32, %v4323_v45  ;;  %v4329_v44 = vpop.f32.mrf.mxu1  ;;  %v4244_v2 = vadd.f32 %v4243_v24, %v7912_v56 }
 0x4bc   : > { %v4956_v57 = vadd.f32 %v4899_v6, %v4602_v14  ;;  %v4330_v36 = vadd.f32 %v4329_v44, %v4241_v61 }
 0x4bd   : > { %v4471_v31 = vmul.f32 %v7997_v15, %v4412_v28  ;;  %v4248_v19 = vpop.f32.mrf.mxu0 }
 0x4be   : > { %v5673_v49 = vpack.c.bf16 %v4956_v57, %v4955_v62 }
 0x4bf   : > { %v4507_v1 = vadd.f32 %v8006_v54, %v4471_v31 }
 0x4c0   : > { %5721 = vst [vmem:[%s8036_s15 + $0x38] sm:$0xff] %v5673_v49   ;;  %v4903_v27 = vpop.f32.mrf.mxu3 }
 0x4c1   : > { %v4571_v37 = vmul.f32 0.3, %v4507_v1  ;;  %vm4539_vm9 = vcmp.ge.f32.partialorder %v4507_v1, 0.0  ;;  %v4904_v26 = vadd.f32 %v8015_v9, %v4903_v27 }
 0x4c2   : > { %v4413_v7 = vpop.f32.mrf.mxu2 }
 0x4c3   : > { %v4414_v63 = vadd.f32 %v4413_v7, %v4325_v52  ;;  %v4332_v39 = vpop.f32.mrf.mxu1  ;;  %v4603_v17 = vsel %vm4539_vm9, %v4507_v1, %v4571_v37  ;;  %v4246_v1 = vadd.f32 %v4245_v46, %v7918_v21 }
 0x4c4   : > { %v4957_v53 = vadd.f32 %v4902_v48, %v4603_v17  ;;  %v4333_v13 = vadd.f32 %v4332_v39, %v4244_v2 }
 0x4c5   : > { %v4472_v42 = vmul.f32 %v7997_v15, %v4414_v63  ;;  %v4250_v27 = vpop.f32.mrf.mxu0 }
 0x4c6   : > { %v4251_v61 = vadd.f32 %v4250_v27, %v7935_v59 }
 0x4c7   : > { %v4508_v50 = vadd.f32 %v8006_v54, %v4472_v42 }
 0x4c8   : > { %v4906_v41 = vpop.f32.mrf.mxu3 }
 0x4c9   : > { %vm4540_vm14 = vcmp.ge.f32.partialorder %v4508_v50, 0.0  ;;  %v4572_v20 = vmul.f32 0.3, %v4508_v50  ;;  %v4907_v32 = vadd.f32 %v8015_v9, %v4906_v41  ;;  %v4249_v41 = vadd.f32 %v4248_v19, %v7929_v35 }
 0x4ca   : > { %v4416_v11 = vpop.f32.mrf.mxu2 }
 0x4cb   : > { %v4604_v3 = vsel %vm4540_vm14, %v4508_v50, %v4572_v20  ;;  %v4417_v25 = vadd.f32 %v4416_v11, %v4328_v0  ;;  %v4334_v38 = vpop.f32.mrf.mxu1 }
 0x4cc   : > { %v4958_v33 = vadd.f32 %v4904_v26, %v4604_v3  ;;  %v4335_v63 = vadd.f32 %v4334_v38, %v4246_v1 }
 0x4cd   : > { %v4473_v47 = vmul.f32 %v7997_v15, %v4417_v25  ;;  %v4253_v48 = vpop.f32.mrf.mxu0 }
 0x4ce   : > { %v5678_v4 = vpack.c.bf16 %v4958_v33, %v4957_v53  ;;  %v4254_v2 = vadd.f32 %v4253_v48, %v7944_v30 }
 0x4cf   : > { %v4509_v5 = vadd.f32 %v8006_v54, %v4473_v47 }
 0x4d0   : > { %5722 = vst [vmem:[%s8036_s15 + $0x40] sm:$0xff] %v5678_v4   ;;  %v4908_v23 = vpop.f32.mrf.mxu3 }
 0x4d1   : > { %v4573_v45 = vmul.f32 0.3, %v4509_v5  ;;  %vm4541_vm15 = vcmp.ge.f32.partialorder %v4509_v5, 0.0  ;;  %v4909_v44 = vadd.f32 %v8015_v9, %v4908_v23 }
 0x4d2   : > { %v4418_v8 = vpop.f32.mrf.mxu2 }
 0x4d3   : > { %v4419_v51 = vadd.f32 %v4418_v8, %v4330_v36  ;;  %v4337_v43 = vpop.f32.mrf.mxu1  ;;  %v4605_v14 = vsel %vm4541_vm15, %v4509_v5, %v4573_v45 }
 0x4d4   : > { %v4959_v49 = vadd.f32 %v4907_v32, %v4605_v14  ;;  %v4338_v20 = vadd.f32 %v4337_v43, %v4249_v41 }
 0x4d5   : > { %v4474_v29 = vmul.f32 %v7997_v15, %v4419_v51  ;;  %v4255_v36 = vpop.f32.mrf.mxu0 }
 0x4d7   : > { %v4510_v6 = vadd.f32 %v8006_v54, %v4474_v29 }
 0x4d8   : > { %v4911_v58 = vpop.f32.mrf.mxu3 }
 0x4d9   : > { %vm4542_vm13 = vcmp.ge.f32.partialorder %v4510_v6, 0.0  ;;  %v4574_v28 = vmul.f32 0.3, %v4510_v6  ;;  %v4912_v17 = vadd.f32 %v8015_v9, %v4911_v58 }
 0x4da   : > { %v4421_v62 = vpop.f32.mrf.mxu2 }
 0x4db   : > { %v4606_v57 = vsel %vm4542_vm13, %v4510_v6, %v4574_v28  ;;  %v4422_v31 = vadd.f32 %v4421_v62, %v4333_v13  ;;  %v4339_v52 = vpop.f32.mrf.mxu1 }
 0x4dc   : > { %v4960_v55 = vadd.f32 %v4909_v44, %v4606_v57  ;;  %v4340_v5 = vadd.f32 %v4339_v52, %v4251_v61 }
 0x4dd   : > { %v4475_v56 = vmul.f32 %v7997_v15, %v4422_v31  ;;  %v4258_v62 = vpop.f32.mrf.mxu0 }
 0x4de   : > { %v5683_v24 = vpack.c.bf16 %v4960_v55, %v4959_v49  ;;  %v4259_v48 = vadd.f32 %v4258_v62, %v7958_v40 }
 0x4df   : > { %v4511_v39 = vadd.f32 %v8006_v54, %v4475_v56 }
 0x4e0   : > { %5723 = vst [vmem:[%s8036_s15 + $0x48] sm:$0xff] %v5683_v24   ;;  %v4913_v7 = vpop.f32.mrf.mxu3  ;;  %v4256_v24 = vadd.f32 %v4255_v36, %v7949_v16 }
 0x4e1   : > { %v4575_v12 = vmul.f32 0.3, %v4511_v39  ;;  %vm4543_vm11 = vcmp.ge.f32.partialorder %v4511_v39, 0.0  ;;  %v4914_v3 = vadd.f32 %v8015_v9, %v4913_v7 }
 0x4e2   : > { %v4423_v37 = vpop.f32.mrf.mxu2 }
 0x4e3   : > { %v4424_v42 = vadd.f32 %v4423_v37, %v4335_v63  ;;  %v4342_v21 = vpop.f32.mrf.mxu1  ;;  %v4607_v26 = vsel %vm4543_vm11, %v4511_v39, %v4575_v12 }
 0x4e4   : > { %v4961_v33 = vadd.f32 %v4912_v17, %v4607_v26  ;;  %v4343_v58 = vadd.f32 %v4342_v21, %v4254_v2 }
 0x4e5   : > { %v4476_v50 = vmul.f32 %v7997_v15, %v4424_v42  ;;  %v4260_v37 = vpop.f32.mrf.mxu0 }
 0x4e7   : > { %v4512_v0 = vadd.f32 %v8006_v54, %v4476_v50 }
 0x4e8   : > { %v4916_v46 = vpop.f32.mrf.mxu3 }
 0x4e9   : > { %vm4544_vm2 = vcmp.ge.f32.partialorder %v4512_v0, 0.0  ;;  %v4576_v11 = vmul.f32 0.3, %v4512_v0  ;;  %v4917_v32 = vadd.f32 %v8015_v9, %v4916_v46 }
 0x4ea   : > { %v4426_v25 = vpop.f32.mrf.mxu2 }
 0x4eb   : > { %v4608_v38 = vsel %vm4544_vm2, %v4512_v0, %v4576_v11  ;;  %v4427_v53 = vadd.f32 %v4426_v25, %v4338_v20  ;;  %v4344_v19 = vpop.f32.mrf.mxu1 }
 0x4ec   : > { %v4962_v47 = vadd.f32 %v4914_v3, %v4608_v38  ;;  %v4345_v1 = vadd.f32 %v4344_v19, %v4256_v24 }
 0x4ed   : > { %v4477_v35 = vmul.f32 %v7997_v15, %v4427_v53 }
 0x4ee   : > { %v5688_v4 = vpack.c.bf16 %v4962_v47, %v4961_v33  ;;  %v4263_v33 = vpop.f32.mrf.mxu0  ;;  %v4261_v47 = vadd.f32 %v4260_v37, %v7963_v60 }
 0x4ef   : > { %v4513_v8 = vadd.f32 %v8006_v54, %v4477_v35 }
 0x4f0   : > { %5724 = vst [vmem:[%s8036_s15 + $0x50] sm:$0xff] %v5688_v4   ;;  %v4918_v23 = vpop.f32.mrf.mxu3 }
 0x4f1   : > { %v4577_v45 = vmul.f32 0.3, %v4513_v8  ;;  %vm4545_vm12 = vcmp.ge.f32.partialorder %v4513_v8, 0.0  ;;  %v4919_v28 = vadd.f32 %v8015_v9, %v4918_v23 }
 0x4f2   : > { %v4428_v51 = vpop.f32.mrf.mxu2 }
 0x4f3   : > { %v4429_v43 = vadd.f32 %v4428_v51, %v4340_v5  ;;  %v4609_v13 = vsel %vm4545_vm12, %v4513_v8, %v4577_v45  ;;  %v4347_v27 = vpop.f32.mrf.mxu1  ;;  %v4264_v51 = vadd.f32 %v4263_v33, %v7972_v34 }
 0x4f4   : > { %v4963_v49 = vadd.f32 %v4917_v32, %v4609_v13  ;;  %v4348_v17 = vadd.f32 %v4347_v27, %v4259_v48 }
 0x4f5   : > { %v4478_v29 = vmul.f32 %v7997_v15, %v4429_v43 }
 0x4f7   : > { %v4514_v6 = vadd.f32 %v8006_v54, %v4478_v29  ;;  %v4265_v29 = vpop.f32.mrf.mxu0 }
 0x4f8   : > { %v4921_v59 = vpop.f32.mrf.mxu3 }
 0x4f9   : > { %vm4546_vm4 = vcmp.ge.f32.partialorder %v4514_v6, 0.0  ;;  %v4578_v14 = vmul.f32 0.3, %v4514_v6  ;;  %v4922_v0 = vadd.f32 %v8015_v9, %v4921_v59 }
 0x4fa   : > { %v4431_v44 = vpop.f32.mrf.mxu2 }
 0x4fb   : > { %v4610_v57 = vsel %vm4546_vm4, %v4514_v6, %v4578_v14  ;;  %v4432_v31 = vadd.f32 %v4431_v44, %v4343_v58  ;;  %v4349_v50 = vpop.f32.mrf.mxu1 }
 0x4fc   : > { %v4964_v55 = vadd.f32 %v4919_v28, %v4610_v57  ;;  %v4350_v61 = vadd.f32 %v4349_v50, %v4261_v47 }
 0x4fd   : > { %v4479_v30 = vmul.f32 %v7997_v15, %v4432_v31  ;;  %v4266_v31 = vadd.f32 %v4265_v29, %v7976_v22 }
 0x4fe   : > { %v5693_v56 = vpack.c.bf16 %v4964_v55, %v4963_v49 }
 0x4ff   : > { %v4515_v7 = vadd.f32 %v8006_v54, %v4479_v30  ;;  %v4268_v24 = vpop.f32.mrf.mxu0 }
 0x500   : > { %5725 = vst [vmem:[%s8036_s15 + $0x58] sm:$0xff] %v5693_v56   ;;  %v4923_v52 = vpop.f32.mrf.mxu3 }
 0x501   : > { %v4579_v42 = vmul.f32 0.3, %v4515_v7  ;;  %vm4547_vm5 = vcmp.ge.f32.partialorder %v4515_v7, 0.0  ;;  %v4924_v20 = vadd.f32 %v8015_v9, %v4923_v52 }
 0x502   : > { %v4433_v63 = vpop.f32.mrf.mxu2 }
 0x503   : > { %v4434_v39 = vadd.f32 %v4433_v63, %v4345_v1  ;;  %v4611_v21 = vsel %vm4547_vm5, %v4515_v7, %v4579_v42  ;;  %v4352_v35 = vpop.f32.mrf.mxu1  ;;  %v4269_v63 = vadd.f32 %v4268_v24, %v7984_v10  ;;  %v5891_v10 = vld [vmem:[%s8297_s5] ss:$0 sm:$0xff] }
 0x504   : > { %v4965_v25 = vadd.f32 %v4922_v0, %v4611_v21  ;;  %v4353_v60 = vadd.f32 %v4352_v35, %v4264_v51 }
 0x505   : > { %v4480_v12 = vmul.f32 %v7997_v15, %v4434_v39 }
 0x507   : > { %v4516_v41 = vadd.f32 %v8006_v54, %v4480_v12  ;;  %v4270_v21 = vpop.f32.mrf.mxu0 }
 0x508   : > { %v4926_v16 = vpop.f32.mrf.mxu3 }
 0x509   : > { %vm4548_vm6 = vcmp.ge.f32.partialorder %v4516_v41, 0.0  ;;  %v4580_v46 = vmul.f32 0.3, %v4516_v41  ;;  %v4927_v45 = vadd.f32 %v8015_v9, %v4926_v16 }
 0x50a   : > { %v4436_v26 = vpop.f32.mrf.mxu2 }
 0x50b   : > { %v4612_v11 = vsel %vm4548_vm6, %v4516_v41, %v4580_v46  ;;  %v4437_v3 = vadd.f32 %v4436_v26, %v4348_v17  ;;  %v4354_v59 = vpop.f32.mrf.mxu1  ;;  %v4271_v26 = vadd.f32 %v4270_v21, %v7988_v18  ;;  %v5893_v18 = vld [vmem:[%s8300_s8] ss:$0 sm:$0xff] }
 0x50c   : > { %v4966_v38 = vadd.f32 %v4924_v20, %v4612_v11  ;;  %v4355_v49 = vadd.f32 %v4354_v59, %v4266_v31 }
 0x50d   : > { %v4481_v53 = vmul.f32 %v7997_v15, %v4437_v3 }
 0x50e   : > { %v5698_v40 = vpack.c.bf16 %v4966_v38, %v4965_v25 }
 0x50f   : > { %v4517_v23 = vadd.f32 %v8006_v54, %v4481_v53 }
 0x510   : > { %5726 = vst [vmem:[%s8036_s15 + $0x60] sm:$0xff] %v5698_v40   ;;  %v4928_v4 = vpop.f32.mrf.mxu3 }
 0x511   : > { %v4581_v8 = vmul.f32 0.3, %v4517_v23  ;;  %vm4549_vm7 = vcmp.ge.f32.partialorder %v4517_v23, 0.0  ;;  %v4929_v58 = vadd.f32 %v8015_v9, %v4928_v4 }
 0x512   : > { %v4438_v36 = vpop.f32.mrf.mxu2 }
 0x513   : > { %v4439_v5 = vadd.f32 %v4438_v36, %v4350_v61  ;;  %v4613_v2 = vsel %vm4549_vm7, %v4517_v23, %v4581_v8  ;;  %v4357_v52 = vpop.f32.mrf.mxu1 }
 0x514   : > { %v4967_v44 = vadd.f32 %v4927_v45, %v4613_v2  ;;  %v4358_v22 = vadd.f32 %v4357_v52, %v4269_v63 }
 0x515   : > { %v4482_v19 = vmul.f32 %v7997_v15, %v4439_v5 }
 0x517   : > { %v4518_v43 = vadd.f32 %v8006_v54, %v4482_v19 }
 0x518   : > { %v4931_v32 = vpop.f32.mrf.mxu3 }
 0x519   : > { %vm4550_vm8 = vcmp.ge.f32.partialorder %v4518_v43, 0.0  ;;  %v4582_v6 = vmul.f32 0.3, %v4518_v43  ;;  %v4932_v37 = vadd.f32 %v8015_v9, %v4931_v32 }
 0x51a   : > { %v4441_v13 = vpop.f32.mrf.mxu2 }
 0x51b   : > { %v4614_v14 = vsel %vm4550_vm8, %v4518_v43, %v4582_v6  ;;  %v4442_v28 = vadd.f32 %v4441_v13, %v4353_v60  ;;  %v4359_v46 = vpop.f32.mrf.mxu1 }
 0x51c   : > { %v4968_v62 = vadd.f32 %v4929_v58, %v4614_v14  ;;  %v4360_v11 = vadd.f32 %v4359_v46, %v4271_v26 }
 0x51d   : > { %v4483_v34 = vmul.f32 %v7997_v15, %v4442_v28 }
 0x51e   : > { %v5703_v57 = vpack.c.bf16 %v4968_v62, %v4967_v44 }
 0x51f   : > { %v4519_v55 = vadd.f32 %v8006_v54, %v4483_v34 }
 0x520   : > { %5727 = vst [vmem:[%s8036_s15 + $0x68] sm:$0xff] %v5703_v57   ;;  %v4933_v30 = vpop.f32.mrf.mxu3 }
 0x521   : > { %v4583_v1 = vmul.f32 0.3, %v4519_v55  ;;  %vm4551_vm1 = vcmp.ge.f32.partialorder %v4519_v55, 0.0  ;;  %v4934_v50 = vadd.f32 %v8015_v9, %v4933_v30  ;;  %v5892_v9 = vld [vmem:[%s8298_s6] ss:$0 sm:$0xff] }
 0x522   : > { %v4443_v27 = vpop.f32.mrf.mxu2 }
 0x523   : > { %v4444_v56 = vadd.f32 %v4443_v27, %v4355_v49  ;;  %v4615_v42 = vsel %vm4551_vm1, %v4519_v55, %v4583_v1 }
 0x524   : > { %v4969_v16 = vadd.f32 %v4932_v37, %v4615_v42 }
 0x525   : > { %v4484_v7 = vmul.f32 %v7997_v15, %v4444_v56 }
 0x527   : > { %v4520_v39 = vadd.f32 %v8006_v54, %v4484_v7 }
 0x528   : > { %v4936_v15 = vpop.f32.mrf.mxu3 }
 0x529   : > { %vm4552_vm10 = vcmp.ge.f32.partialorder %v4520_v39, 0.0  ;;  %v4584_v12 = vmul.f32 0.3, %v4520_v39  ;;  %v4937_v35 = vadd.f32 %v5893_v18, %v4936_v15 }
 0x52a   : > { %v4446_v48 = vpop.f32.mrf.mxu2 }
 0x52b   : > { %v4616_v41 = vsel %vm4552_vm10, %v4520_v39, %v4584_v12  ;;  %v4447_v0 = vadd.f32 %v4446_v48, %v4358_v22 }
 0x52c   : > { %v4970_v17 = vadd.f32 %v4934_v50, %v4616_v41 }
 0x52d   : > { %v4485_v54 = vmul.f32 %v5891_v10, %v4447_v0 }
 0x52e   : > { %v5708_v20 = vpack.c.bf16 %v4970_v17, %v4969_v16 }
 0x52f   : > { %v4521_v3 = vadd.f32 %v5892_v9, %v4485_v54 }
 0x530   : > { %5728 = vst [vmem:[%s8036_s15 + $0x70] sm:$0xff] %v5708_v20   ;;  %v4938_v33 = vpop.f32.mrf.mxu3 }
 0x531   : > { %v4585_v53 = vmul.f32 0.3, %v4521_v3  ;;  %vm4553_vm0 = vcmp.ge.f32.partialorder %v4521_v3, 0.0  ;;  %v4939_v23 = vadd.f32 %v5893_v18, %v4938_v33 }
 0x532   : > { %v4448_v25 = vpop.f32.mrf.mxu2 }
 0x533   : > { %v4449_v38 = vadd.f32 %v4448_v25, %v4360_v11  ;;  %v4617_v4 = vsel %vm4553_vm0, %v4521_v3, %v4585_v53 }
 0x534   : > { %v4971_v5 = vadd.f32 %v4937_v35, %v4617_v4 }
 0x535   : > { %v4486_v40 = vmul.f32 %v5891_v10, %v4449_v38 }
 0x537   : > { %v4522_v47 = vadd.f32 %v5892_v9, %v4486_v40 }
 0x539   : > { %vm4554_vm3 = vcmp.ge.f32.partialorder %v4522_v47, 0.0  ;;  %v4586_v61 = vmul.f32 0.3, %v4522_v47 }
 0x53b   : > { %v4618_v36 = vsel %vm4554_vm3, %v4522_v47, %v4586_v61 }
 0x53c   : > { %v4972_v8 = vadd.f32 %v4939_v23, %v4618_v36 }
 0x53e   : > { %v5713_v19 = vpack.c.bf16 %v4972_v8, %v4971_v5 }
 0x540   : > { %5729 = vst [vmem:[%s8036_s15 + $0x78] sm:$0xff] %v5713_v19  }
 0x541   : > { %5921 = shalt.err (!%p5918_p5)
}
 0x542   : > { %s5982_s23 = smov 64  }
 0x543   : > { %5755 = dma.vmem_to_hbm [thread:$0]  (%p6073_p4), %s5053_s12, 2048, %s5055_s18, %s5038_s24, %s5982_s23, %s5982_s23, %s8339_s16  }
 0x544 PF: > { %p5761_p6 = scmp.ge.s32.totalorder %s5972_s14, 2  ;;  %s5069_s15 = sand.u32 1, %s5952_s30  }
 0x545   : > { %s5070_s0 = scalar_lea.sflag [#allocation4], %s5069_s15 }
 0x546   : > { %p5758_p7 = pnand %p5761_p6, %p6080_p8 }
 0x548   : > { %p5759_p9 = pneg %p5758_p7 }
 0x54a   : > { %5947 = dma.done.wait (%p5759_p9), %s5070_s0, 2048  }
 0x54b   : > { %5949 = vsyncadd (%p5759_p9), %s5070_s0, 4294965248  ;;  %s22_s14 = sadd.s32 1, %s5972_s14   ;;  %s8448_s30 = smov %s5956_s10 }
 0x54c   : > { %p19_p10 = scmp.ge.s32.totalorder %s22_s14, 4   ;;  %s8449_s10 = smov %s5960_s11 }
 0x54d   : > { %s8450_s11 = smov %s6086_s22  ;;  %s8451_s12 = smov %s5968_s13 }
 0x54e   : > { %s8452_s13 = smov %s8454_s17  ;;  %21 = sbr.rel (!%p19_p10) target bundleno = 6 (0x6), region = 93 }
 0x553   :  { %5076 = vsyncpa [#allocation4], 1 }
 0x554   :  { %5078 = vsyncpa [#allocation4 + $0x1], 1 }

</bundles_post_ra>
